<compile_context>
chip_gen: v7x
topology: tpu7x:2x2x1
jax: 0.10.0
libtpu: 0.0.40
codegen_flags: <defaults>
</compile_context>

<pallas_src>
import jax
import jax.numpy as jnp
from jax.experimental import pallas as pl
from jax.experimental.pallas import tpu as pltpu

HIDDEN = 20
IN_F = 3
OUT_F = 3
_HIGHEST = jax.lax.Precision.HIGHEST


def _pinn_kernel(xyz_ref, l1_ref, hid_ref, out_w_ref, out_ref):
    # Feature-major: batch on the 128-lane axis, features on sublanes.
    xyz = xyz_ref[...]                              # (3, TB)
    l1 = l1_ref[...]                                # (HIDDEN, 4) = [W1 | b1]

    # Layer 1: Linear(3, 20) + tanh.  K=3 is too small for an MXU pass, so do
    # it as three lane-broadcast FMAs + bias on the VPU (exact f32).
    h = (l1[:, 0:1] * xyz[0:1]
         + l1[:, 1:2] * xyz[1:2]
         + l1[:, 2:3] * xyz[2:3]
         + l1[:, 3:4])                              # (HIDDEN, TB)
    h = jnp.tanh(h)

    # Layers 2-4: Linear(20, 20) + tanh.  Packed as (3, HIDDEN, HIDDEN+1) with
    # the bias in the last column.  precision=HIGHEST is essentially free here
    # (MXU utterly underutilized at 20x20) and keeps full f32 accuracy.
    for l in range(3):
        wl = hid_ref[l]                             # (HIDDEN, HIDDEN + 1)
        h = jnp.tanh(
            jnp.dot(wl[:, :HIDDEN], h,
                    preferred_element_type=jnp.float32,
                    precision=_HIGHEST)
            + wl[:, HIDDEN:HIDDEN + 1])             # (HIDDEN, TB)

    # Layer 5: Linear(20, 3), no activation.
    ow = out_w_ref[...]                             # (OUT_F, HIDDEN + 1)
    out = (jnp.dot(ow[:, :HIDDEN], h,
                   preferred_element_type=jnp.float32,
                   precision=_HIGHEST)
           + ow[:, HIDDEN:HIDDEN + 1])              # (OUT_F, TB)
    out_ref[...] = out.astype(out_ref.dtype)


def _pack_params(params):
    """Fold biases into the weight matrices: 3 small resident arrays."""
    (w1, b1), (w2, b2), (w3, b3), (w4, b4), (w5, b5) = params
    l1 = jnp.concatenate([w1, b1.reshape(HIDDEN, 1)], axis=1)        # (20, 4)
    hid = jnp.stack([
        jnp.concatenate([w, b.reshape(HIDDEN, 1)], axis=1)
        for w, b in ((w2, b2), (w3, b3), (w4, b4))])                 # (3, 20, 21)
    out_w = jnp.concatenate([w5, b5.reshape(OUT_F, 1)], axis=1)      # (3, 21)
    return (l1.astype(jnp.float32), hid.astype(jnp.float32),
            out_w.astype(jnp.float32))


def pinn_forward(x, y, t, params, *, tile_b=None):
    """x, y, t: (N, 1) float32. Returns (u, v, p), each (N, 1)."""
    N = x.shape[0]
    if tile_b is None:
        # >= 2 grid steps when N allows (feeds both v7x TensorCores via the
        # "parallel" axis), capped at 4096 lanes; v5e/v6e just get big tiles.
        tile_b = max(128, min(4096, 128 * pl.cdiv(N, 2 * 128)))
    assert tile_b % 128 == 0, "tile_b must be a multiple of the 128-lane width"
    n_pad = pl.cdiv(N, tile_b) * tile_b
    grid = n_pad // tile_b

    # One stacked (3, N) input -> one DMA per step; a single pad if ragged.
    # Padded tail lanes compute garbage that is sliced off after the call
    # (lanes never mix, so this is safe).
    xyz = jnp.concatenate(
        [x.reshape(1, N), y.reshape(1, N), t.reshape(1, N)], axis=0
    ).astype(jnp.float32)
    if n_pad != N:
        xyz = jnp.pad(xyz, ((0, 0), (0, n_pad - N)))

    l1, hid, out_w = _pack_params(params)

    def const_spec(shape):
        # Whole (tiny) array, constant block index -> DMA'd once, kept resident.
        return pl.BlockSpec(shape, lambda i, _n=len(shape): (0,) * _n)

    out = pl.pallas_call(
        _pinn_kernel,
        out_shape=jax.ShapeDtypeStruct((OUT_F, n_pad), jnp.float32),
        grid_spec=pltpu.PrefetchScalarGridSpec(
            num_scalar_prefetch=0,
            grid=(grid,),
            in_specs=[
                pl.BlockSpec((IN_F, tile_b), lambda i: (0, i)),  # stacked x,y,t
                const_spec(l1.shape),
                const_spec(hid.shape),
                const_spec(out_w.shape),
            ],
            out_specs=pl.BlockSpec((OUT_F, tile_b), lambda i: (0, i)),
        ),
        compiler_params=pltpu.CompilerParams(
            dimension_semantics=("parallel",)),
    )(xyz, l1, hid, out_w)

    u = out[0, :N].reshape(N, 1)
    v = out[1, :N].reshape(N, 1)
    p = out[2, :N].reshape(N, 1)
    return u, v, p


def init_params(key):
    """Deterministic init in PyTorch Linear convention: W (out, in), b (out,)."""
    dims = [(HIDDEN, IN_F), (HIDDEN, HIDDEN), (HIDDEN, HIDDEN),
            (HIDDEN, HIDDEN), (OUT_F, HIDDEN)]
    params = []
    for (fan_out, fan_in) in dims:
        key, kw, kb = jax.random.split(key, 3)
        bound = 1.0 / jnp.sqrt(fan_in)
        w = jax.random.uniform(kw, (fan_out, fan_in), jnp.float32,
                               minval=-bound, maxval=bound)
        b = jax.random.uniform(kb, (fan_out,), jnp.float32,
                               minval=-bound, maxval=bound)
        params.append((w, b))
    return params


def _reference(x, y, t, params):
    """Pure-JAX reference (HIGHEST precision to match the f32 kernel path)."""
    h = jnp.concatenate([x, y, t], axis=1).astype(jnp.float32)
    for i, (w, b) in enumerate(params):
        h = jnp.dot(h, w.T, precision=_HIGHEST) + b
        if i < len(params) - 1:
            h = jnp.tanh(h)
    return h[:, 0:1], h[:, 1:2], h[:, 2:3]


if __name__ == "__main__":
    key = jax.random.PRNGKey(0)
    kp, kx, ky, kt = jax.random.split(key, 4)

    params = init_params(kp)

    # N deliberately not a multiple of the tile to exercise the padding path;
    # the adaptive tile gives tile_b=1024 -> a 2-step "parallel" grid (both
    # v7x TensorCores busy; still only 2 cheap steps on v5e/v6e).
    N = 2000
    x = jax.random.normal(kx, (N, 1), jnp.float32)
    y = jax.random.normal(ky, (N, 1), jnp.float32)
    t = jax.random.normal(kt, (N, 1), jnp.float32)

    u, v, p = pinn_forward(x, y, t, params)
    jax.block_until_ready((u, v, p))

    u_ref, v_ref, p_ref = _reference(x, y, t, params)
    assert u.shape == (N, 1) and v.shape == (N, 1) and p.shape == (N, 1)
    assert jnp.allclose(u, u_ref, atol=1e-4)
    assert jnp.allclose(v, v_ref, atol=1e-4)
    assert jnp.allclose(p, p_ref, atol=1e-4)

    print("KERNEL_OK")
</pallas_src>

<mosaic_0001>
module attributes {stable_mosaic.version = 11 : i64} {
  func.func @_pinn_kernel(%arg0: i32, %arg1: memref<3x1024xf32, #tpu.memory_space<vmem>>, %arg2: memref<20x4xf32, #tpu.memory_space<vmem>>, %arg3: memref<3x20x21xf32, #tpu.memory_space<vmem>>, %arg4: memref<3x21xf32, #tpu.memory_space<vmem>>, %arg5: memref<3x1024xf32, #tpu.memory_space<vmem>>) attributes {dimension_semantics = [#tpu.dimension_semantics<parallel>], iteration_bounds = array<i64: 2>, scalar_prefetch = 0 : i64, scratch_operands = 0 : i64, tpu.core_type = #tpu.core_type<tc>, window_params = [{transform_indices = @transform_0, window_bounds = array<i64: 3, 1024>}, {pipeline_mode = #tpu.pipeline_mode<synchronous>, transform_indices = @transform_1, window_bounds = array<i64: 20, 4>}, {pipeline_mode = #tpu.pipeline_mode<synchronous>, transform_indices = @transform_2, window_bounds = array<i64: 3, 20, 21>}, {pipeline_mode = #tpu.pipeline_mode<synchronous>, transform_indices = @transform_3, window_bounds = array<i64: 3, 21>}, {transform_indices = @transform_4, window_bounds = array<i64: 3, 1024>}]} {
    %c0 = arith.constant 0 : index
    %c0_0 = arith.constant 0 : index
    %0 = vector.load %arg1[%c0, %c0_0] : memref<3x1024xf32, #tpu.memory_space<vmem>>, vector<3x1024xf32>
    %c0_1 = arith.constant 0 : index
    %c0_2 = arith.constant 0 : index
    %1 = vector.load %arg2[%c0_1, %c0_2] : memref<20x4xf32, #tpu.memory_space<vmem>>, vector<20x4xf32>
    %2 = vector.extract_strided_slice %1 {offsets = [0, 0], sizes = [20, 1], strides = [1, 1]} : vector<20x4xf32> to vector<20x1xf32>
    %3 = vector.extract_strided_slice %0 {offsets = [0, 0], sizes = [1, 1024], strides = [1, 1]} : vector<3x1024xf32> to vector<1x1024xf32>
    %4 = vector.broadcast %2 : vector<20x1xf32> to vector<20x1024xf32>
    %5 = vector.broadcast %3 : vector<1x1024xf32> to vector<20x1024xf32>
    %6 = arith.mulf %4, %5 : vector<20x1024xf32>
    %7 = vector.extract_strided_slice %1 {offsets = [0, 1], sizes = [20, 1], strides = [1, 1]} : vector<20x4xf32> to vector<20x1xf32>
    %8 = vector.extract_strided_slice %0 {offsets = [1, 0], sizes = [1, 1024], strides = [1, 1]} : vector<3x1024xf32> to vector<1x1024xf32>
    %9 = vector.broadcast %7 : vector<20x1xf32> to vector<20x1024xf32>
    %10 = vector.broadcast %8 : vector<1x1024xf32> to vector<20x1024xf32>
    %11 = arith.mulf %9, %10 : vector<20x1024xf32>
    %12 = arith.addf %6, %11 : vector<20x1024xf32>
    %13 = vector.extract_strided_slice %1 {offsets = [0, 2], sizes = [20, 1], strides = [1, 1]} : vector<20x4xf32> to vector<20x1xf32>
    %14 = vector.extract_strided_slice %0 {offsets = [2, 0], sizes = [1, 1024], strides = [1, 1]} : vector<3x1024xf32> to vector<1x1024xf32>
    %15 = vector.broadcast %13 : vector<20x1xf32> to vector<20x1024xf32>
    %16 = vector.broadcast %14 : vector<1x1024xf32> to vector<20x1024xf32>
    %17 = arith.mulf %15, %16 : vector<20x1024xf32>
    %18 = arith.addf %12, %17 : vector<20x1024xf32>
    %19 = vector.extract_strided_slice %1 {offsets = [0, 3], sizes = [20, 1], strides = [1, 1]} : vector<20x4xf32> to vector<20x1xf32>
    %20 = vector.broadcast %19 : vector<20x1xf32> to vector<20x1024xf32>
    %21 = arith.addf %18, %20 : vector<20x1024xf32>
    %22 = math.tanh %21 : vector<20x1024xf32>
    %c0_3 = arith.constant 0 : index
    %c0_4 = arith.constant 0 : index
    %c0_5 = arith.constant 0 : index
    %23 = vector.load %arg3[%c0_3, %c0_4, %c0_5] : memref<3x20x21xf32, #tpu.memory_space<vmem>>, vector<1x20x21xf32>
    %24 = vector.shape_cast %23 : vector<1x20x21xf32> to vector<20x21xf32>
    %25 = vector.extract_strided_slice %24 {offsets = [0, 0], sizes = [20, 20], strides = [1, 1]} : vector<20x21xf32> to vector<20x20xf32>
    %cst = arith.constant dense<0.000000e+00> : vector<20x1024xf32>
    %26 = tpu.matmul %25, %22, %cst {dimension_numbers = #tpu.dot_dimension_numbers<[1], [0], [0], [1], [0, 0, 1, 1], [], []>, precision = #tpu.contract_precision<fp32>} : vector<20x20xf32>, vector<20x1024xf32>, vector<20x1024xf32> -> vector<20x1024xf32>
    %27 = vector.extract_strided_slice %24 {offsets = [0, 20], sizes = [20, 1], strides = [1, 1]} : vector<20x21xf32> to vector<20x1xf32>
    %28 = vector.broadcast %27 : vector<20x1xf32> to vector<20x1024xf32>
    %29 = arith.addf %26, %28 : vector<20x1024xf32>
    %30 = math.tanh %29 : vector<20x1024xf32>
    %c1 = arith.constant 1 : index
    %c0_6 = arith.constant 0 : index
    %c0_7 = arith.constant 0 : index
    %31 = vector.load %arg3[%c1, %c0_6, %c0_7] : memref<3x20x21xf32, #tpu.memory_space<vmem>>, vector<1x20x21xf32>
    %32 = vector.shape_cast %31 : vector<1x20x21xf32> to vector<20x21xf32>
    %33 = vector.extract_strided_slice %32 {offsets = [0, 0], sizes = [20, 20], strides = [1, 1]} : vector<20x21xf32> to vector<20x20xf32>
    %cst_8 = arith.constant dense<0.000000e+00> : vector<20x1024xf32>
    %34 = tpu.matmul %33, %30, %cst_8 {dimension_numbers = #tpu.dot_dimension_numbers<[1], [0], [0], [1], [0, 0, 1, 1], [], []>, precision = #tpu.contract_precision<fp32>} : vector<20x20xf32>, vector<20x1024xf32>, vector<20x1024xf32> -> vector<20x1024xf32>
    %35 = vector.extract_strided_slice %32 {offsets = [0, 20], sizes = [20, 1], strides = [1, 1]} : vector<20x21xf32> to vector<20x1xf32>
    %36 = vector.broadcast %35 : vector<20x1xf32> to vector<20x1024xf32>
    %37 = arith.addf %34, %36 : vector<20x1024xf32>
    %38 = math.tanh %37 : vector<20x1024xf32>
    %c2 = arith.constant 2 : index
    %c0_9 = arith.constant 0 : index
    %c0_10 = arith.constant 0 : index
    %39 = vector.load %arg3[%c2, %c0_9, %c0_10] : memref<3x20x21xf32, #tpu.memory_space<vmem>>, vector<1x20x21xf32>
    %40 = vector.shape_cast %39 : vector<1x20x21xf32> to vector<20x21xf32>
    %41 = vector.extract_strided_slice %40 {offsets = [0, 0], sizes = [20, 20], strides = [1, 1]} : vector<20x21xf32> to vector<20x20xf32>
    %cst_11 = arith.constant dense<0.000000e+00> : vector<20x1024xf32>
    %42 = tpu.matmul %41, %38, %cst_11 {dimension_numbers = #tpu.dot_dimension_numbers<[1], [0], [0], [1], [0, 0, 1, 1], [], []>, precision = #tpu.contract_precision<fp32>} : vector<20x20xf32>, vector<20x1024xf32>, vector<20x1024xf32> -> vector<20x1024xf32>
    %43 = vector.extract_strided_slice %40 {offsets = [0, 20], sizes = [20, 1], strides = [1, 1]} : vector<20x21xf32> to vector<20x1xf32>
    %44 = vector.broadcast %43 : vector<20x1xf32> to vector<20x1024xf32>
    %45 = arith.addf %42, %44 : vector<20x1024xf32>
    %46 = math.tanh %45 : vector<20x1024xf32>
    %c0_12 = arith.constant 0 : index
    %c0_13 = arith.constant 0 : index
    %47 = vector.load %arg4[%c0_12, %c0_13] : memref<3x21xf32, #tpu.memory_space<vmem>>, vector<3x21xf32>
    %48 = vector.extract_strided_slice %47 {offsets = [0, 0], sizes = [3, 20], strides = [1, 1]} : vector<3x21xf32> to vector<3x20xf32>
    %cst_14 = arith.constant dense<0.000000e+00> : vector<3x1024xf32>
    %49 = tpu.matmul %48, %46, %cst_14 {dimension_numbers = #tpu.dot_dimension_numbers<[1], [0], [0], [1], [0, 0, 1, 1], [], []>, precision = #tpu.contract_precision<fp32>} : vector<3x20xf32>, vector<20x1024xf32>, vector<3x1024xf32> -> vector<3x1024xf32>
    %50 = vector.extract_strided_slice %47 {offsets = [0, 20], sizes = [3, 1], strides = [1, 1]} : vector<3x21xf32> to vector<3x1xf32>
    %51 = vector.broadcast %50 : vector<3x1xf32> to vector<3x1024xf32>
    %52 = arith.addf %49, %51 : vector<3x1024xf32>
    %c0_15 = arith.constant 0 : index
    %c0_16 = arith.constant 0 : index
    %53 = vector.load %arg5[%c0_15, %c0_16] : memref<3x1024xf32, #tpu.memory_space<vmem>>, vector<3x1024xf32>
    tpu.vector_store %arg5[%c0_15, %c0_16], %52 {strides = array<i32>} : memref<3x1024xf32, #tpu.memory_space<vmem>>, vector<3x1024xf32>,
    return
  }
  func.func @transform_0(%arg0: i32) -> (i32, i32) {
    %c0_i32 = arith.constant 0 : i32
    %c0_i32_0 = arith.constant 0 : i32
    return %c0_i32, %arg0 : i32, i32
  }
  func.func @transform_1(%arg0: i32) -> (i32, i32) {
    %c0_i32 = arith.constant 0 : i32
    %c0_i32_0 = arith.constant 0 : i32
    %c0_i32_1 = arith.constant 0 : i32
    return %c0_i32, %c0_i32_0 : i32, i32
  }
  func.func @transform_2(%arg0: i32) -> (i32, i32, i32) {
    %c0_i32 = arith.constant 0 : i32
    %c0_i32_0 = arith.constant 0 : i32
    %c0_i32_1 = arith.constant 0 : i32
    %c0_i32_2 = arith.constant 0 : i32
    return %c0_i32, %c0_i32_0, %c0_i32_1 : i32, i32, i32
  }
  func.func @transform_3(%arg0: i32) -> (i32, i32) {
    %c0_i32 = arith.constant 0 : i32
    %c0_i32_0 = arith.constant 0 : i32
    %c0_i32_1 = arith.constant 0 : i32
    return %c0_i32, %c0_i32_0 : i32, i32
  }
  func.func @transform_4(%arg0: i32) -> (i32, i32) {
    %c0_i32 = arith.constant 0 : i32
    %c0_i32_0 = arith.constant 0 : i32
    return %c0_i32, %arg0 : i32, i32
  }
}

</mosaic_0001>

<bundles_post_ra>
// kernel: tpu_custom_call.1
= control target key start
LH: loop header
LB: loop body
LE: loop exit
PB: predicated region body
PF: predicated region fallthrough
CT: control target
= control target key end

     0   :  { %9 = vsyncpa [#allocation3], 0  ;;  %s14302_s0 = inlined_call_operand.hbm [shape: f32[3,2048], index: 0, kind: input, shape index: {}]   ;;  %s14303_s1 = inlined_call_operand.vmem [shape: f32[20,4], index: 1, kind: input, shape index: {}]   ;;  %s14304_s2 = inlined_call_operand.hbm [shape: f32[3,20,21], index: 2, kind: input, shape index: {}]   ;;  %s14305_s3 = inlined_call_operand.vmem [shape: f32[3,21], index: 3, kind: input, shape index: {}]   ;;  %s14306_s4 = inlined_call_operand.hbm [shape: f32[3,2048], index: 4, kind: output, shape index: {}]  }
   0x1   :  { %11 = vsyncpa [#allocation3 + $0x1], 0 }
   0x2   :  { %12 = vsyncpa [#allocation6], 0 }
   0x3   :  { %13 = vsyncpa [#allocation4], 0 }
   0x4   :  { %15 = vsyncpa [#allocation4 + $0x1], 0  ;;  %s11811_s15 = smov 0   ;;  %s11813_s16 = smov 0  }
   0x5   :  { %s11815_s17 = smov 0   ;;  %s11817_s18 = smov 0  }
   0x6 LB: > { %s11832_s19 = sadd.s32 4294967295, %s11773_s18   ;;  %s10492_s20 = sadd.s32 4294967294, %s11773_s18   ;;  %s11773_s18 = sphi %s11817_s18, %s14441_s18   ;;  %s11769_s17 = sphi %s11815_s17, %s14440_s17   ;;  %s11765_s16 = sphi %s11813_s16, %s14439_s16   ;;  %s11761_s15 = sphi %s11811_s15, %s14438_s15  }
   0x7   : > { %p41_p0 = scmp.ne.s32.totalorder %s11765_s16, %s11761_s15  ;;  %p14307_p1 = scmp.eq.s32.totalorder %s11832_s19, 0 }
   0x8   : > { %p134_p3 = scmp.eq.s32.totalorder %s10492_s20, 1  ;;  %p10493_p5 = scmp.ge.s32.totalorder %s11773_s18, 1 }
   0x9   : > { %p11841_p4 = por %p14307_p1, %p41_p0  ;;  %p141_p7 = scmp.lt.s32.totalorder %s11773_s18, 3 }
   0xa   : > { %p11846_p6 = por %p134_p3, %p41_p0  ;;  %s11775_s24 = smov [#allocation5]  }
   0xb   : > { %s14348_s21 = scalar_select %p11841_p4, 1, 0 }
   0xc   : > { %s14349_s22 = scalar_select %p11846_p6, 1, 0 }
   0xd   : > { %p11851_p8 = pnand %p10493_p5, %p141_p7  ;;  %s156_s25 = sshll.u32 %s11775_s24, 4  ;;  %s11855_s25 = int_to_ptr.vmem [resolvable:$true] %s156_s25 }
   0xe   : > { %s11867_s27 = sadd.s32 1, %s11773_s18   ;;  %s28_s28 = sadd.s32 1, %s11769_s17 }
   0xf   : > { %s14350_s23 = scalar_select %p11851_p8, 1, 0 }
  0x10   : > { %p11382_p9 = pneg %p11851_p8  ;;  %s25_s29 = ssub.s32 %s11773_s18, %s11867_s27 }
  0x11   : > { %s11645_s6 = scalar_lea.hbm %s14304_s2, 1152 }
  0x12   : > { %p11862_p11 = pnand %p11382_p9, %p14307_p1  ;;  %p11646_p12 = scmp.ne.s32.totalorder %s14304_s2, %s11645_s6 }
  0x13   : > { %p11652_p5 = scmp.lt.u32.totalorder %s11645_s6, %s14304_s2 }
  0x14   : > { %p11647_p13 = pneg %p11862_p11 }
  0x16   : > { %p11648_p0 = pnand %p11647_p13, %p11646_p12 }
  0x18   : > { %p11649_p3 = pneg %p11648_p0 }
  0x1a   : > { %p11654_p7 = pnand %p11652_p5, %p11649_p3 }
  0x1c   : > { %11657 = shalt.err (!%p11654_p7)
}
  0x1d   : > { %s11658_s11 = scalar_lea.vmem %s11855_s25, 1152  ;;  %p11666_p2 = scmp.lt.s32.totalorder %s11855_s25, %s11855_s25 }
  0x1e   : > { %p11659_p9 = scmp.ne.s32.totalorder %s11855_s25, %s11658_s11  ;;  %p11667_p6 = scmp.lt.s32.totalorder %s11658_s11, %s11658_s11 }
  0x20   : > { %p11661_p10 = pnand %p11659_p9, %p11647_p13  ;;  %p11668_p4 = por %p11667_p6, %p11666_p2 }
  0x22   : > { %p11662_p1 = pneg %p11661_p10 }
  0x24   : > { %p11669_p8 = pnand %p11668_p4, %p11662_p1 }
  0x26   : > { %11672 = shalt.err (!%p11669_p8)
}
  0x27   : > { %s11776_s12 = smov 128   ;;  %s11777_s13 = smov 8  }
  0x28   : > { %11385 = dma.hbm_to_vmem [thread:$0]  (!%p11862_p11), %s14304_s2, 1152, %s11855_s25, [#allocation6], %s11776_s12, %s11776_s12, %s11777_s13  }
  0x29   : > { %p26_p2 = scmp.eq.s32.totalorder %s25_s29, 0  ;;  %p35_p1 = scmp.ne.s32.totalorder %s11769_s17, %s11765_s16 }
  0x2a   : > { %p36_p4 = scmp.eq.s32.totalorder %s11773_s18, 0  ;;  %p11395_p6 = scmp.lt.s32.totalorder %s11773_s18, 2 }
  0x2b   : > { %s11898_s24 = scalar_select %p26_p2, %s11769_s17, %s28_s28  }
  0x2c   : > { %p37_p8 = por %p36_p4, %p35_p1  ;;  %p14352_p10 = scmp.eq.s32.totalorder %s11832_s19, 1 }
  0x2d   : > { %s173_s5 = sand.u32 1, %s11769_s17   ;;  %s10508_s6 = sshll.u32 %s11773_s18, 9 }
  0x2e   : > { %p11902_p12 = por %p14352_p10, %p35_p1  ;;  %s10496_s7 = sshll.u32 %s173_s5, 5 }
  0x2f   : > { %s11911_s9 = scalar_lea.hbm %s14302_s0, %s10508_s6  ;;  %s177_s25 = scalar_lea.vmem [#allocation2], %s10496_s7 }
  0x30   : > { %s185_s28 = sshll.u32 %s177_s25, 4  ;;  %p11913_p11 = pnand %p11395_p6, %p37_p8  ;;  %s11917_s28 = int_to_ptr.vmem [resolvable:$true] %s185_s28 }
  0x31   : > { %s174_s10 = scalar_lea.sflag [#allocation3], %s173_s5  ;;  %s11673_s11 = scalar_lea.hbm %s11911_s9, 512 }
  0x32   : > { %p11674_p13 = scmp.ne.s32.totalorder %s11911_s9, %s11673_s11  ;;  %p11675_p0 = pneg %p11913_p11 }
  0x33   : > { %s11678_s14 = scalar_lea.hbm %s14302_s0, 1024  ;;  %p11679_p7 = scmp.lt.u32.totalorder %s11911_s9, %s14302_s0 }
  0x34   : > { %p11676_p3 = pnand %p11675_p0, %p11674_p13  ;;  %p11680_p9 = scmp.lt.u32.totalorder %s11678_s14, %s11673_s11 }
  0x35   : > { %p11682_p1 = scmp.lt.u32.totalorder %s11673_s11, %s11911_s9 }
  0x36   : > { %p11677_p5 = pneg %p11676_p3  ;;  %p11681_p2 = por %p11680_p9, %p11679_p7 }
  0x38   : > { %p11683_p4 = por %p11682_p1, %p11681_p2 }
  0x3a   : > { %p11684_p6 = pnand %p11683_p4, %p11677_p5 }
  0x3c   : > { %11687 = shalt.err (!%p11684_p6)
}
  0x3d   : > { %s11688_s5 = scalar_lea.vmem %s11917_s28, 512  ;;  %s11778_s7 = smov [#allocation2]  }
  0x3e   : > { %p11689_p8 = scmp.ne.s32.totalorder %s11917_s28, %s11688_s5  ;;  %s11693_s26 = sshll.u32 %s11778_s7, 4  ;;  %s11694_s26 = int_to_ptr.vmem [resolvable:$false] %s11693_s26 }
  0x3f   : > { %s11695_s8 = scalar_lea.vmem %s11694_s26, 1024  ;;  %p11696_p3 = scmp.lt.s32.totalorder %s11917_s28, %s11694_s26 }
  0x40   : > { %p11691_p10 = pnand %p11689_p8, %p11675_p0  ;;  %p11697_p7 = scmp.lt.s32.totalorder %s11695_s8, %s11688_s5 }
  0x42   : > { %p11692_p13 = pneg %p11691_p10  ;;  %p11698_p9 = por %p11697_p7, %p11696_p3 }
  0x44   : > { %p11699_p2 = pnand %p11698_p9, %p11692_p13 }
  0x46   : > { %11702 = shalt.err (!%p11699_p2)
}
  0x47   : > { %11389 = dma.hbm_to_vmem [thread:$0]  (!%p11913_p11), %s11911_s9, 512, %s11917_s28, %s174_s10  }
  0x48   : > { %p14355_p5 = scmp.ne.s32.totalorder %s14350_s23, 0 }
  0x4a   : > { %194 = sbr.rel (%p14355_p5) target bundleno = 1525 (0x5f5), region = 36 }
  0x51   : > { %s11947_s25 = sand.u32 1, %s11765_s16   ;;  %p14356_p0 = scmp.ne.s32.totalorder %s14348_s21, 0 }
  0x52   : > { %s10500_s11 = sshll.u32 %s11947_s25, 5  ;;  %s197_s12 = scalar_lea.sflag [#allocation3], %s11947_s25 }
  0x53   : > { %s11953_s13 = scalar_lea.vmem [#allocation2], %s10500_s11 }
  0x54   : > { %11748 = dma.done.wait (%p14356_p0), %s197_s12, 512  }
  0x55   : > { %11750 = vsyncadd (%p14356_p0), %s197_s12, 4294966784  ;;  %p14357_p11 = scmp.eq.s32.totalorder %s11832_s19, 0 }
  0x57   : > { %11752 = dma.done.wait (%p14357_p11), [#allocation6], 1152   ;;  %p14358_p1 = pmov %p14357_p11 }
  0x58   : > { %v11779_v0 = vmov 1   ;;  %v11780_v1 = vmov 0   ;;  %v257_v2 = vlaneseq  ;;  %v235_v5 = vld [vmem:[%s14303_s1] sm:$0xff]  ;;  %v11969_v6 = vld [vmem:[%s11953_s13 + $0x10] sm:$0x77]  ;;  %v236_v7 = vld [vmem:[%s14303_s1 + $0x8] sm:$0xff] }
  0x59   : > { %11754 = vsyncadd (%p14358_p1), [#allocation6], 4294966144  ;;  %11440 = vset.pattern.permute.xlu1 %v11779_v0  ;;  %11439 = vset.pattern.permute.xlu0 %v11780_v1  ;;  %v11975_v8 = vld [vmem:[%s11953_s13 + $0x18] sm:$0x77]  ;;  %v11781_v18 = vmov 2   ;;  %v11782_v28 = vmov 3  }
  0x5a   : > { %v258_v3 = vshrl.u32 %v257_v2, 7  ;;  %354 = vperm.xlu1 %11440, %v235_v5   ;;  %240 = vperm.xlu0 %11439, %v235_v5   ;;  %v237_v22 = vld [vmem:[%s14303_s1 + $0x10] sm:$0xf]  ;;  %v14310_v29 = vmov 0.0   ;;  %v12022_v30 = vld [vmem:[#allocation5] sm:$0xff]  ;;  %vm695_vm0 = vcmask 162816  }
  0x5b   : > { %797 = vmatprep.mubr.f32.mxu0 %v14310_v29  ;;  %1412 = vmatprep.mubr.f32.mxu1 %v14310_v29  ;;  %14359 = vst [vmem:[#allocation11_spill] sm:$0xff] %v12022_v30  ;;  %v12024_v31 = vld [vmem:[#allocation5 + $0x8] sm:$0xff]  ;;  %v231_v32 = vld [vmem:[%s11953_s13] sm:$0x77]  ;;  %v696_v34 = vsel %vm695_vm0, %v12022_v30, 0  ;;  %vm702_vm1 = vcmask 1043456  }
  0x5c   : > { %v11963_v4 = vsub.s32 5, %v258_v3  ;;  %v11977_v9 = vsub.s32 1, %v258_v3  ;;  %v11983_v12 = vsub.s32 4, %v258_v3  ;;  %v11991_v15 = vsub.s32 0, %v258_v3  ;;  %14360 = vst [vmem:[#allocation12_spill] sm:$0xff] %v12024_v31  ;;  %s228_s7 = scalar_lea.vmem [#allocation7], %s10500_s11 }
  0x5d   : > { %v12000_v20 = vsub.s32 6, %v258_v3  ;;  %v12008_v23 = vsub.s32 2, %v258_v3  ;;  %v232_v33 = vld [vmem:[%s11953_s13 + $0x8] sm:$0x77]  ;;  %v698_v35 = vsel %vm695_vm0, %v12024_v31, 0  ;;  %v12038_v41 = vand.u32 4294901760, %v696_v34 }
  0x5e   : > { %v388_v10 = vrot.slane %v11969_v6, %v11963_v4  ;;  %v396_v11 = vrot.slane %v11975_v8, %v11963_v4  ;;  %358 = vperm.xlu1 %11440, %v236_v7   ;;  %245 = vperm.xlu0 %11439, %v236_v7   ;;  %v280_v16 = vrot.slane %v11969_v6, %v11983_v12  ;;  %v12040_v42 = vand.u32 4294901760, %v698_v35  ;;  %v12042_v43 = vld [vmem:[#allocation5 + $0x10] sm:$0xf]  ;;  %s10509_s26 = sshll.u32 %s11832_s19, 9  ;;  %s10412_s8 = sshll.u32 %s228_s7, 4  ;;  %s14260_s8 = int_to_ptr.vmem [resolvable:$true] %s10412_s8 }
  0x5f   : > { %v288_v17 = vrot.slane %v11975_v8, %v11983_v12  ;;  %v520_v24 = vrot.slane %v11969_v6, %v12000_v20  ;;  %v528_v25 = vrot.slane %v11975_v8, %v12000_v20  ;;  %v368_v36 = vrot.slane %v231_v32, %v11977_v9  ;;  %14361 = vst [vmem:[#allocation13_spill] sm:$0xff] %v12038_v41  ;;  %s14258_s11 = scalar_lea.hbm %s14306_s4, %s10509_s26  ;;  %s10398_s23 = scalar_lea.sflag [#allocation4], %s11947_s25 }
  0x60   : > { %v11986_v13 = vrot.slane %v388_v10, %v11977_v9  ;;  %v11989_v14 = vrot.slane %v396_v11, %v11977_v9  ;;  %v11998_v19 = vrot.slane %v280_v16, %v11991_v15  ;;  %v372_v37 = vrot.slane %v231_v32, %v11963_v4  ;;  %14362 = vst [vmem:[#allocation14_spill] sm:$0xff] %v12040_v42  ;;  %s11703_s9 = scalar_lea.vmem %s14260_s8, 512  ;;  %s11785_s19 = smov [#allocation7]  }
  0x61   : > { %v12003_v21 = vrot.slane %v288_v17, %v11991_v15  ;;  %v12015_v26 = vrot.slane %v520_v24, %v12008_v23  ;;  %v12018_v27 = vrot.slane %v528_v25, %v12008_v23  ;;  %v376_v38 = vrot.slane %v232_v33, %v11977_v9  ;;  %14363 = vst [vmem:[#allocation15_spill] sm:$0xff] %v12042_v43  ;;  %p11704_p4 = scmp.ne.s32.totalorder %s14260_s8, %s11703_s9  ;;  %s11707_s21 = sshll.u32 %s11785_s19, 4  ;;  %s11708_s21 = int_to_ptr.vmem [resolvable:$false] %s11707_s21 }
  0x62   : > { %11442 = vset.pattern.permute.xlu1 %v11781_v18  ;;  %11441 = vset.pattern.permute.xlu0 %v11781_v18  ;;  %v380_v39 = vrot.slane %v232_v33, %v11963_v4  ;;  %v384_v40 = vrot.slane %v11969_v6, %v11977_v9  ;;  %v392_v44 = vrot.slane %v11975_v8, %v11977_v9  ;;  %v700_v55 = vsel %vm695_vm0, %v12042_v43, 0  ;;  %s11709_s28 = scalar_lea.vmem %s11708_s21, 1024  ;;  %p11710_p10 = scmp.lt.s32.totalorder %s14260_s8, %s11708_s21 }
  0x63   : > { %490 = vperm.xlu1 %11442, %v236_v7   ;;  %486 = vperm.xlu0 %11441, %v235_v5   ;;  %v12047_v45 = vrot.slane %v368_v36, %v11977_v9  ;;  %v12050_v46 = vrot.slane %v372_v37, %v11977_v9  ;;  %v12053_v47 = vrot.slane %v376_v38, %v11977_v9  ;;  %v12091_v3 = vand.u32 4294901760, %v700_v55  ;;  %p11705_p6 = pnand %p11704_p4, %p11902_p12  ;;  %p11711_p13 = scmp.lt.s32.totalorder %s11709_s28, %s11703_s9 }
  0x64   : > { %v12056_v48 = vrot.slane %v380_v39, %v11977_v9  ;;  %v12059_v49 = vrot.slane %v384_v40, %v11977_v9  ;;  %v12062_v50 = vsub.f32 %v696_v34, %v12038_v41  ;;  %v12065_v51 = vsub.f32 %v698_v35, %v12040_v42 }
  0x65   : > { %v260_v52 = vrot.slane %v231_v32, %v11991_v15  ;;  %v264_v53 = vrot.slane %v231_v32, %v11983_v12  ;;  %v268_v54 = vrot.slane %v232_v33, %v11991_v15  ;;  %v272_v56 = vrot.slane %v232_v33, %v11983_v12  ;;  %14368 = vst [vmem:[#allocation20_spill] sm:$0xff] %v12091_v3  ;;  %p11706_p8 = pneg %p11705_p6  ;;  %p11712_p3 = por %p11711_p13, %p11710_p10 }
  0x66   : > { %14364 = vst [vmem:[#allocation16_spill] sm:$0xff] %v12062_v50  ;;  %14365 = vst [vmem:[#allocation17_spill] sm:$0xff] %v12065_v51  ;;  %v276_v57 = vrot.slane %v11969_v6, %v11991_v15  ;;  %v284_v58 = vrot.slane %v11975_v8, %v11991_v15  ;;  %v500_v59 = vrot.slane %v231_v32, %v12008_v23  ;;  %v12089_v2 = vand.u32 4294901760, %v12065_v51 }
  0x67   : > { %11443 = vset.pattern.permute.xlu1 %v11780_v1  ;;  %11444 = vset.pattern.permute.xlu0 %v11779_v0  ;;  %v504_v60 = vrot.slane %v231_v32, %v12000_v20  ;;  %v508_v61 = vrot.slane %v232_v33, %v12008_v23  ;;  %v512_v62 = vrot.slane %v232_v33, %v12000_v20  ;;  %v12086_v1 = vand.u32 4294901760, %v12062_v50  ;;  %p11713_p7 = pnand %p11712_p3, %p11706_p8 }
  0x68   : > { %250 = vperm.xlu1 %11443, %v237_v22   ;;  %362 = vperm.xlu0 %11444, %v237_v22   ;;  %v516_v63 = vrot.slane %v11969_v6, %v12008_v23  ;;  %v524_v0 = vrot.slane %v11975_v8, %v12008_v23  ;;  %14367 = vst [vmem:[#allocation19_spill] sm:$0xff] %v12089_v2 }
  0x69   : > { %14366 = vst [vmem:[#allocation18_spill] sm:$0xff] %v12086_v1  ;;  %v12094_v4 = vrot.slane %v392_v44, %v11977_v9  ;;  %v12103_v6 = vrot.slane %v268_v54, %v11991_v15  ;;  %v12106_v8 = vrot.slane %v272_v56, %v11991_v15  ;;  %v12109_v10 = vrot.slane %v276_v57, %v11991_v15 }
  0x6a   : > { %v12112_v11 = vrot.slane %v284_v58, %v11991_v15  ;;  %v12115_v9 = vrot.slane %v500_v59, %v12008_v23  ;;  %v12118_v17 = vrot.slane %v504_v60, %v12008_v23  ;;  %v12124_v20 = vrot.slane %v512_v62, %v12008_v23 }
  0x6c   : > { %11445 = vset.pattern.permute.xlu1 %v11782_v28  ;;  %11446 = vset.pattern.permute.xlu0 %v11781_v18  ;;  %v12121_v18 = vrot.slane %v508_v61, %v12008_v23  ;;  %v12137_v28 = vsub.f32 %v700_v55, %v12091_v3 }
  0x6d   : > { %618 = vperm.xlu1 %11445, %v235_v5   ;;  %494 = vperm.xlu0 %11446, %v237_v22   ;;  %v12097_v5 = vrot.slane %v260_v52, %v11991_v15 }
  0x6e   : > { %14369 = vst [vmem:[#allocation21_spill] sm:$0xff] %v12137_v28 }
  0x71   : > { %622 = vperm.xlu1 %11445, %v236_v7   ;;  %v12100_v7 = vrot.slane %v264_v53, %v11991_v15  ;;  %v12130_v15 = vrot.slane %v524_v0, %v12008_v23 }
  0x75   : > { %626 = vperm.xlu1 %11445, %v237_v22   ;;  %v12127_v22 = vrot.slane %v516_v63, %v12008_v23 }
  0xd9   : > { %v355_v12 = vpop.permute.xlu1 %354  ;;  %v241_v16 = vpop.permute.xlu0 %240 }
  0xda   : > { %v441_v32 = vmul.f32 %v12059_v49, %v355_v12  ;;  %v12141_v33 = vmul.f32 %v11986_v13, %v355_v12  ;;  %v443_v34 = vmul.f32 %v12094_v4, %v355_v12  ;;  %v12145_v35 = vmul.f32 %v11989_v14, %v355_v12 }
  0xdb   : > { %v12148_v23 = vmul.f32 %v12047_v45, %v355_v12  ;;  %v438_v36 = vmul.f32 %v12050_v46, %v355_v12  ;;  %v12152_v37 = vmul.f32 %v12053_v47, %v355_v12  ;;  %v12155_v38 = vmul.f32 %v12056_v48, %v355_v12 }
  0xdc   : > { %14370 = vst [vmem:[#allocation22_spill] sm:$0xff] %v12145_v35  ;;  %v333_v39 = vmul.f32 %v12109_v10, %v241_v16  ;;  %v12159_v40 = vmul.f32 %v11998_v19, %v241_v16  ;;  %v335_v44 = vmul.f32 %v12112_v11, %v241_v16  ;;  %v12163_v52 = vmul.f32 %v12003_v21, %v241_v16 }
  0xdd   : > { %v359_v53 = vpop.permute.xlu1 %358  ;;  %v246_v54 = vpop.permute.xlu0 %245  ;;  %v12166_v55 = vmul.f32 %v12097_v5, %v241_v16  ;;  %v330_v56 = vmul.f32 %v12100_v7, %v241_v16  ;;  %v12170_v57 = vmul.f32 %v12103_v6, %v241_v16  ;;  %v12173_v58 = vmul.f32 %v12106_v8, %v241_v16 }
  0xde   : > { %14371 = vst [vmem:[#allocation23_spill] sm:$0xff] %v12163_v52  ;;  %v12175_v59 = vadd.f32 %v441_v32, %v333_v39  ;;  %v12177_v60 = vadd.f32 %v443_v34, %v335_v44  ;;  %v449_v61 = vmul.f32 %v12059_v49, %v359_v53  ;;  %v12181_v62 = vmul.f32 %v11986_v13, %v359_v53 }
  0xdf   : > { %v446_v63 = vmul.f32 %v12050_v46, %v359_v53  ;;  %v451_v0 = vmul.f32 %v12094_v4, %v359_v53  ;;  %v12186_v12 = vmul.f32 %v11989_v14, %v359_v53  ;;  %v338_v29 = vmul.f32 %v12100_v7, %v246_v54 }
  0xe0   : > { %14372 = vst [vmem:[#allocation24_spill] sm:$0xff] %v12181_v62  ;;  %v12190_v16 = vmul.f32 %v12047_v45, %v359_v53  ;;  %v12193_v32 = vmul.f32 %v12053_v47, %v359_v53  ;;  %v341_v34 = vmul.f32 %v12109_v10, %v246_v54  ;;  %v12197_v39 = vmul.f32 %v11998_v19, %v246_v54 }
  0xe1   : > { %14373 = vst [vmem:[#allocation25_spill] sm:$0xff] %v12186_v12  ;;  %v12200_v44 = vmul.f32 %v12056_v48, %v359_v53  ;;  %v12203_v25 = vmul.f32 %v12097_v5, %v246_v54  ;;  %v343_v24 = vmul.f32 %v12112_v11, %v246_v54  ;;  %v12207_v43 = vmul.f32 %v12003_v21, %v246_v54 }
  0xe2   : > { %14374 = vst [vmem:[#allocation26_spill] sm:$0xff] %v12197_v39  ;;  %v491_v31 = vpop.permute.xlu1 %490  ;;  %v487_v30 = vpop.permute.xlu0 %486  ;;  %v12210_v3 = vmul.f32 %v12103_v6, %v246_v54  ;;  %v12213_v42 = vmul.f32 %v12106_v8, %v246_v54  ;;  %v473_v41 = vadd.f32 %v449_v61, %v341_v34  ;;  %v12215_v2 = vadd.f32 %v438_v36, %v330_v56 }
  0xe3   : > { %14375 = vst [vmem:[#allocation27_spill] sm:$0xff] %v12207_v43  ;;  %v475_v53 = vadd.f32 %v451_v0, %v343_v24  ;;  %v581_v51 = vmul.f32 %v12127_v22, %v491_v31  ;;  %v12219_v1 = vmul.f32 %v12015_v26, %v491_v31  ;;  %v12221_v50 = vadd.f32 %v446_v63, %v338_v29 }
  0xe4   : > { %v12224_v28 = vmul.f32 %v12115_v9, %v491_v31  ;;  %v12227_v12 = vmul.f32 %v12118_v17, %v491_v31  ;;  %v583_v54 = vmul.f32 %v12130_v15, %v491_v31  ;;  %v12231_v61 = vmul.f32 %v12018_v27, %v491_v31 }
  0xe5   : > { %14376 = vst [vmem:[#allocation28_spill] sm:$0xff] %v12219_v1  ;;  %v12234_v24 = vmul.f32 %v12121_v18, %v491_v31  ;;  %v12237_v36 = vmul.f32 %v12124_v20, %v491_v31  ;;  %v573_v29 = vmul.f32 %v12127_v22, %v487_v30  ;;  %v12241_v56 = vmul.f32 %v12015_v26, %v487_v30 }
  0xe6   : > { %14377 = vst [vmem:[#allocation29_spill] sm:$0xff] %v12224_v28  ;;  %14378 = vst [vmem:[#allocation30_spill] sm:$0xff] %v12231_v61  ;;  %v575_v63 = vmul.f32 %v12130_v15, %v487_v30  ;;  %v12245_v0 = vmul.f32 %v12018_v27, %v487_v30  ;;  %v605_v35 = vadd.f32 %v581_v51, %v473_v41 }
  0xe7   : > { %14379 = vst [vmem:[#allocation31_spill] sm:$0xff] %v12234_v24  ;;  %14380 = vst [vmem:[#allocation32_spill] sm:$0xff] %v12241_v56  ;;  %v251_v34 = vpop.permute.xlu1 %250  ;;  %v363_v43 = vpop.permute.xlu0 %362  ;;  %v607_v61 = vadd.f32 %v583_v54, %v475_v53  ;;  %v12248_v52 = vmul.f32 %v12115_v9, %v487_v30  ;;  %v570_v31 = vmul.f32 %v12118_v17, %v487_v30 }
  0xe8   : > { %14381 = vst [vmem:[#allocation33_spill] sm:$0xff] %v12245_v0  ;;  %v12252_v1 = vmul.f32 %v12121_v18, %v487_v30  ;;  %v12255_v62 = vmul.f32 %v12124_v20, %v487_v30  ;;  %v349_v56 = vmul.f32 %v12109_v10, %v251_v34  ;;  %v350_v39 = vmul.f32 %v11998_v19, %v251_v34 }
  0xe9   : > { %14382 = vst [vmem:[#allocation34_spill] sm:$0xff] %v12248_v52  ;;  %v351_v0 = vmul.f32 %v12112_v11, %v251_v34  ;;  %v352_v41 = vmul.f32 %v12003_v21, %v251_v34  ;;  %v345_v51 = vmul.f32 %v12097_v5, %v251_v34  ;;  %v346_v53 = vmul.f32 %v12100_v7, %v251_v34 }
  0xea   : > { %14383 = vst [vmem:[#allocation35_spill] sm:$0xff] %v12252_v1  ;;  %v347_v54 = vmul.f32 %v12103_v6, %v251_v34  ;;  %v348_v24 = vmul.f32 %v12106_v8, %v251_v34  ;;  %v457_v1 = vmul.f32 %v12059_v49, %v363_v43  ;;  %v458_v30 = vmul.f32 %v11986_v13, %v363_v43 }
  0xeb   : > { %v459_v10 = vmul.f32 %v12094_v4, %v363_v43  ;;  %v460_v19 = vmul.f32 %v11989_v14, %v363_v43  ;;  %v453_v11 = vmul.f32 %v12047_v45, %v363_v43  ;;  %v454_v21 = vmul.f32 %v12050_v46, %v363_v43 }
  0xec   : > { %v455_v5 = vmul.f32 %v12053_v47, %v363_v43  ;;  %v456_v7 = vmul.f32 %v12056_v48, %v363_v43  ;;  %v12273_v28 = vpop.permute.xlu1 %618  ;;  %v495_v6 = vpop.permute.xlu0 %494  ;;  %v481_v8 = vadd.f32 %v457_v1, %v349_v56  ;;  %v482_v34 = vadd.f32 %v458_v30, %v350_v39 }
  0xed   : > { %v483_v49 = vadd.f32 %v459_v10, %v351_v0  ;;  %v484_v52 = vadd.f32 %v460_v19, %v352_v41  ;;  %v597_v13 = vadd.f32 %v573_v29, %v12175_v59  ;;  %v599_v4 = vadd.f32 %v575_v63, %v12177_v60 }
  0xee   : > { %v585_v14 = vmul.f32 %v12115_v9, %v495_v6  ;;  %v586_v45 = vmul.f32 %v12118_v17, %v495_v6  ;;  %v587_v46 = vmul.f32 %v12121_v18, %v495_v6  ;;  %v588_v47 = vmul.f32 %v12124_v20, %v495_v6 }
  0xef   : > { %v589_v43 = vmul.f32 %v12127_v22, %v495_v6  ;;  %v590_v48 = vmul.f32 %v12015_v26, %v495_v6  ;;  %v633_v1 = vadd.f32 %v12273_v28, %v597_v13  ;;  %v635_v39 = vadd.f32 %v12273_v28, %v599_v4  ;;  %v14390_v13 = vld [vmem:[#allocation32_spill] sm:$0xff] }
  0xf0   : > { %v591_v59 = vmul.f32 %v12130_v15, %v495_v6  ;;  %v592_v60 = vmul.f32 %v12018_v27, %v495_v6  ;;  %v12287_v29 = vpop.permute.xlu1 %622  ;;  %v477_v9 = vadd.f32 %v453_v11, %v345_v51  ;;  %v478_v17 = vadd.f32 %v454_v21, %v346_v53 }
  0xf1   : > { %v641_v18 = vadd.f32 %v12287_v29, %v605_v35  ;;  %v643_v20 = vadd.f32 %v12287_v29, %v607_v61  ;;  %v479_v56 = vadd.f32 %v455_v5, %v347_v54  ;;  %v480_v22 = vadd.f32 %v456_v7, %v348_v24 }
  0xf2   : > { %11449 = vtanh.f32 %v633_v1  ;;  %v12291_v26 = vadd.f32 %v589_v43, %v481_v8  ;;  %v609_v63 = vadd.f32 %v585_v14, %v477_v9  ;;  %v12293_v0 = vadd.f32 %v590_v48, %v482_v34  ;;  %v14393_v43 = vld [vmem:[#allocation22_spill] sm:$0xff]  ;;  %v14394_v1 = vld [vmem:[#allocation27_spill] sm:$0xff] }
  0xf3   : > { %v12295_v41 = vadd.f32 %v591_v59, %v483_v49  ;;  %v12297_v15 = vadd.f32 %v592_v60, %v484_v52  ;;  %11451 = vtanh.f32 %v641_v18  ;;  %v610_v51 = vadd.f32 %v586_v45, %v478_v17  ;;  %v14391_v45 = vld [vmem:[#allocation28_spill] sm:$0xff] }
  0xf4   : > { %v12299_v27 = vpop.permute.xlu1 %626  ;;  %v611_v53 = vadd.f32 %v587_v46, %v479_v56  ;;  %v612_v35 = vadd.f32 %v588_v47, %v480_v22  ;;  %11453 = vtanh.f32 %v635_v39  ;;  %v594_v61 = vadd.f32 %v570_v31, %v12215_v2  ;;  %v14392_v47 = vld [vmem:[#allocation23_spill] sm:$0xff]  ;;  %v14395_v39 = vld [vmem:[#allocation25_spill] sm:$0xff] }
  0xf5   : > { %v602_v24 = vadd.f32 %v12227_v12, %v12221_v50  ;;  %v464_v54 = vadd.f32 %v12155_v38, %v12173_v58  ;;  %11455 = vtanh.f32 %v643_v20  ;;  %v645_v30 = vadd.f32 %v12299_v27, %v609_v63  ;;  %v14396_v22 = vld [vmem:[#allocation33_spill] sm:$0xff] }
  0xf6   : > { %v646_v52 = vadd.f32 %v12299_v27, %v610_v51  ;;  %v647_v10 = vadd.f32 %v12299_v27, %v611_v53  ;;  %v648_v19 = vadd.f32 %v12299_v27, %v612_v35  ;;  %v630_v11 = vadd.f32 %v12273_v28, %v594_v61  ;;  %v14397_v51 = vld [vmem:[#allocation30_spill] sm:$0xff]  ;;  %v14398_v35 = vld [vmem:[#allocation21_spill] sm:$0xff] }
  0xf7   : > { %v638_v21 = vadd.f32 %v12287_v29, %v602_v24  ;;  %v472_v2 = vadd.f32 %v12200_v44, %v12213_v42  ;;  %v596_v50 = vadd.f32 %v12255_v62, %v464_v54  ;;  %v461_v38 = vadd.f32 %v12148_v23, %v12166_v55  ;;  %v14384_v44 = vld [vmem:[#allocation34_spill] sm:$0xff]  ;;  %v14385_v55 = vld [vmem:[#allocation29_spill] sm:$0xff] }
  0xf8   : > { %v469_v58 = vadd.f32 %v12190_v16, %v12203_v25  ;;  %v463_v12 = vadd.f32 %v12152_v37, %v12170_v57  ;;  %11457 = vtanh.f32 %v630_v11  ;;  %v471_v5 = vadd.f32 %v12193_v32, %v12210_v3  ;;  %v14386_v16 = vld [vmem:[#allocation35_spill] sm:$0xff]  ;;  %v14389_v32 = vld [vmem:[#allocation24_spill] sm:$0xff] }
  0xf9   : > { %v604_v31 = vadd.f32 %v12237_v36, %v472_v2  ;;  %v466_v42 = vadd.f32 %v12141_v33, %v12159_v40  ;;  %11459 = vtanh.f32 %v638_v21  ;;  %v632_v62 = vadd.f32 %v12273_v28, %v596_v50  ;;  %v14387_v57 = vld [vmem:[#allocation31_spill] sm:$0xff]  ;;  %v14388_v40 = vld [vmem:[#allocation26_spill] sm:$0xff] }
  0xfa   : > { %v593_v23 = vadd.f32 %v14384_v44, %v461_v38  ;;  %v601_v7 = vadd.f32 %v14385_v55, %v469_v58  ;;  %v595_v37 = vadd.f32 %v14386_v16, %v463_v12  ;;  %v603_v6 = vadd.f32 %v14387_v57, %v471_v5  ;;  %v14401_v5 = vld [vmem:[#allocation18_spill] sm:$0xff]  ;;  %v14403_v44 = vld [vmem:[#allocation17_spill] sm:$0xff] }
  0xfb   : > { %v640_v25 = vadd.f32 %v12287_v29, %v604_v31  ;;  %11461 = vtanh.f32 %v646_v52  ;;  %v474_v8 = vadd.f32 %v14389_v32, %v14388_v40  ;;  %v598_v4 = vadd.f32 %v14390_v13, %v466_v42  ;;  %v14400_v31 = vld [vmem:[#allocation16_spill] sm:$0xff] }
  0xfc   : > { %v11450_v36 = vpop.eup %11449  ;;  %11463 = vtanh.f32 %v632_v62  ;;  %v629_v3 = vadd.f32 %v12273_v28, %v593_v23  ;;  %v637_v33 = vadd.f32 %v12287_v29, %v601_v7  ;;  %v631_v34 = vadd.f32 %v12273_v28, %v595_v37  ;;  %v14404_v23 = vld [vmem:[#allocation19_spill] sm:$0xff] }
  0xfd   : > { %11465 = vtanh.f32 %v640_v25  ;;  %v639_v49 = vadd.f32 %v12287_v29, %v603_v6  ;;  %v11452_v14 = vpop.eup %11451  ;;  %v606_v46 = vadd.f32 %v14391_v45, %v474_v8  ;;  %v468_v48 = vadd.f32 %v14393_v43, %v14392_v47 }
  0xfe   : > { %11467 = vtanh.f32 %v629_v3  ;;  %v476_v59 = vadd.f32 %v14395_v39, %v14394_v1  ;;  %v12344_v60 = vpop.eup %11453  ;;  %v634_v9 = vadd.f32 %v12273_v28, %v598_v4  ;;  %v1959_v17 = vand.u32 4294901760, %v11450_v36 }
  0xff   : > { %11469 = vtanh.f32 %v637_v33  ;;  %v1963_v18 = vand.u32 4294901760, %v11452_v14  ;;  %v12347_v20 = vpop.eup %11455  ;;  %v642_v56 = vadd.f32 %v12287_v29, %v606_v46  ;;  %v600_v63 = vadd.f32 %v14396_v22, %v468_v48 }
 0x100   : > { %11471 = vtanh.f32 %v631_v34  ;;  %v608_v53 = vadd.f32 %v14397_v51, %v476_v59  ;;  %v12353_v61 = vand.u32 4294901760, %v14398_v35  ;;  %v12363_v21 = vsub.f32 %v11450_v36, %v1959_v17 }
 0x101   : > { %11473 = vtanh.f32 %v639_v49  ;;  %v12355_v24 = vpack.c.bf16 %v1963_v18, %v1959_v17  ;;  %v12357_v54 = vsub.f32 %v11452_v14, %v1963_v18  ;;  %v636_v52 = vadd.f32 %v12273_v28, %v600_v63 }
 0x102   : > { %11475 = vtanh.f32 %v648_v19  ;;  %v12361_v11 = vadd.f32 %v12287_v29, %v608_v53  ;;  %v11458_v2 = vpop.eup %11457  ;;  %v2574_v50 = vand.u32 4294901760, %v12344_v60  ;;  %v14339_v38 = vand.u32 4294901760, %v12347_v20 }
 0x103   : > { %14399 = vst [vmem:[#allocation34_spill] sm:$0xff] %v12357_v54  ;;  %11477 = vtanh.f32 %v645_v30  ;;  %v11460_v58 = vpop.eup %11459  ;;  %v727_v12 = vand.u32 4294901760, %v11458_v2  ;;  %v14402_v19 = vsub.f32 %v14400_v31, %v14401_v5  ;;  %v14405_v30 = vsub.f32 %v14403_v44, %v14404_v23 }
 0x104   : > { %11479 = vtanh.f32 %v647_v10  ;;  %v731_v62 = vand.u32 4294901760, %v11460_v58  ;;  %v12383_v10 = vpack.c.bf16 %v14339_v38, %v2574_v50  ;;  %v823_v37 = vsub.f32 %v14398_v35, %v12353_v61 }
 0x105   : > { %v12370_v42 = vand.u32 4294901760, %v14402_v19  ;;  %v11462_v29 = vpop.eup %11461  ;;  %v12377_v55 = vand.u32 4294901760, %v14405_v30  ;;  %11481 = vtanh.f32 %v634_v9  ;;  %v12385_v25 = vsub.f32 %v11458_v2, %v727_v12 }
 0x106   : > { %v11464_v7 = vpop.eup %11463  ;;  %v707_v16 = vsel %vm702_vm1, %v11462_v29, 0  ;;  %11483 = vtanh.f32 %v642_v56  ;;  %v12390_v6 = vpack.c.bf16 %v731_v62, %v727_v12  ;;  %v12392_v36 = vsub.f32 %v11460_v58, %v731_v62 }
 0x107   : > { %14406 = vst [vmem:[#allocation29_spill] sm:$0xff] %v12377_v55  ;;  %v11466_v57 = vpop.eup %11465  ;;  %v1342_v3 = vand.u32 4294901760, %v11464_v7  ;;  %v12394_v33 = vand.u32 4294901760, %v707_v16  ;;  %v14337_v8 = vand.u32 4294901760, %v12385_v25  ;;  %11485 = vtanh.f32 %v636_v52 }
 0x108   : > { %v11468_v40 = vpop.eup %11467  ;;  %v1346_v32 = vand.u32 4294901760, %v11466_v57  ;;  %10511 = vmatprep.subr.bf16.mxu0 %v12390_v6  ;;  %v14334_v14 = vand.u32 4294901760, %v12392_v36  ;;  %11487 = vtanh.f32 %v12361_v11 }
 0x109   : > { %v11470_v49 = vpop.eup %11469  ;;  %v12399_v13 = vsub.f32 %v11464_v7, %v1342_v3  ;;  %v729_v4 = vand.u32 4294901760, %v11468_v40  ;;  %v12403_v45 = vsub.f32 %v707_v16, %v12394_v33  ;;  %v834_v1 = vsub.f32 %v12385_v25, %v14337_v8 }
 0x10a   : > { %v11472_v46 = vpop.eup %11471  ;;  %v12405_v47 = vpack.c.bf16 %v1346_v32, %v1342_v3  ;;  %v12407_v43 = vsub.f32 %v11466_v57, %v1346_v32  ;;  %v733_v48 = vand.u32 4294901760, %v11470_v49  ;;  %v846_v17 = vsub.f32 %v12392_v36, %v14334_v14 }
 0x10b   : > { %v11474_v39 = vpop.eup %11473  ;;  %v12412_v59 = vsub.f32 %v11468_v40, %v729_v4  ;;  %v1344_v9 = vand.u32 4294901760, %v11472_v46  ;;  %v14333_v18 = vand.u32 4294901760, %v12399_v13  ;;  %v835_v53 = vand.u32 4294901760, %v834_v1 }
 0x10c   : > { %v11476_v56 = vpop.eup %11475  ;;  %10535 = vmatprep.subr.bf16.mxu1 %v12405_v47  ;;  %v12419_v22 = vpack.c.bf16 %v733_v48, %v729_v4  ;;  %v12421_v63 = vsub.f32 %v11470_v49, %v733_v48  ;;  %v1348_v51 = vand.u32 4294901760, %v11474_v39  ;;  %v847_v12 = vand.u32 4294901760, %v846_v17 }
 0x10d   : > { %v11478_v52 = vpop.eup %11477  ;;  %v12423_v2 = vsub.f32 %v11472_v46, %v1344_v9  ;;  %v713_v58 = vsel %vm702_vm1, %v11476_v56, 0  ;;  %v1449_v19 = vsub.f32 %v12399_v13, %v14333_v18  ;;  %v14332_v48 = vand.u32 4294901760, %v12407_v43 }
 0x10e   : > { %v11480_v29 = vpop.eup %11479  ;;  %10513 = vmatpush1.bf16.msra.mxu0 %v12419_v22  ;;  %v12430_v62 = vpack.c.bf16 %v1348_v51, %v1344_v9  ;;  %v12432_v30 = vsub.f32 %v11474_v39, %v1348_v51  ;;  %v12434_v7 = vand.u32 4294901760, %v713_v58  ;;  %v704_v16 = vsel %vm702_vm1, %v11478_v52, 0 }
 0x10f   : > { %v12437_v57 = vpop.eup %11481  ;;  %736 = vmatprep.subr.mxu0 %v12394_v33  ;;  %v12440_v3 = vand.u32 4294901760, %v704_v16  ;;  %v710_v40 = vsel %vm702_vm1, %v11480_v29, 0  ;;  %v10514_v32 = vpack.c.bf16 %v847_v12, %v835_v53  ;;  %v1450_v49 = vand.u32 4294901760, %v1449_v19 }
 0x110   : > { %v12443_v4 = vpop.eup %11483  ;;  %10537 = vmatpush1.bf16.msra.mxu1 %v12430_v62  ;;  %v12446_v46 = vand.u32 4294901760, %v710_v40  ;;  %v14330_v1 = vand.u32 4294901760, %v12412_v59  ;;  %v14331_v39 = vand.u32 4294901760, %v12421_v63  ;;  %v14335_v17 = vand.u32 4294901760, %v12423_v2 }
 0x111   : > { %1351 = vmatprep.subr.mxu1 %v12434_v7  ;;  %v12453_v9 = vsub.f32 %v704_v16, %v12440_v3  ;;  %v14336_v56 = vand.u32 4294901760, %v12432_v30  ;;  %v14338_v51 = vand.u32 4294901760, %v12403_v45  ;;  %v12458_v53 = vpop.eup %11485  ;;  %v1461_v12 = vsub.f32 %v12407_v43, %v14332_v48 }
 0x112   : > { %738 = vmatpush1.msra.mxu0 %v12440_v3  ;;  %v12462_v52 = vsub.f32 %v710_v40, %v12446_v46  ;;  %v840_v19 = vsub.f32 %v12412_v59, %v14330_v1  ;;  %v852_v29 = vsub.f32 %v12421_v63, %v14331_v39  ;;  %v1455_v16 = vsub.f32 %v12423_v2, %v14335_v17 }
 0x113   : > { %803 = vmatmul.mubr.f32.vlgmr.msra.gmra.mrb[0].mxu0 %v12370_v42  ;;  %10515 = vmatprep.subr.bf16.mxu0 %v10514_v32  ;;  %v1467_v40 = vsub.f32 %v12432_v30, %v14336_v56  ;;  %v858_v28 = vsub.f32 %v12403_v45, %v14338_v51  ;;  %v14341_v1 = vand.u32 4294901760, %v12453_v9  ;;  %v1462_v39 = vand.u32 4294901760, %v1461_v12 }
 0x114   : > { %1353 = vmatpush1.msra.mxu1 %v12446_v46  ;;  %v14407_v48 = vmov 0.0   ;;  %v841_v32 = vand.u32 4294901760, %v840_v19  ;;  %v853_v18 = vand.u32 4294901760, %v852_v29  ;;  %v12487_v14 = vsub.f32 %v713_v58, %v12434_v7 }
 0x115   : > { %808 = vmatprep.mubr.f32.mxu0 %v14407_v48  ;;  %1418 = vmatmul.mubr.f32.vlgmr.msra.gmra.mrb[0].mxu1 %v12370_v42  ;;  %v1456_v17 = vand.u32 4294901760, %v1455_v16  ;;  %v1468_v56 = vand.u32 4294901760, %v1467_v40  ;;  %v859_v8 = vand.u32 4294901760, %v858_v28  ;;  %v864_v51 = vsub.f32 %v12453_v9, %v14341_v1 }
 0x116   : > { %v10538_v34 = vpack.c.bf16 %v1462_v39, %v1450_v49  ;;  %v10516_v38 = vpack.c.bf16 %v853_v18, %v841_v32  ;;  %1423 = vmatprep.mubr.f32.mxu1 %v14407_v48  ;;  %v14342_v12 = vand.u32 4294901760, %v12487_v14  ;;  %v14340_v19 = vand.u32 4294901760, %v12462_v52 }
 0x117   : > { %v10540_v29 = vpack.c.bf16 %v1468_v56, %v1456_v17  ;;  %814 = vmatmul.mubr.f32.gmra.mrb[2].mxu0 %v12377_v55  ;;  %v12500_v58 = vand.u32 4294901760, %v823_v37  ;;  %v2081_v28 = vand.u32 4294901760, %v12357_v54  ;;  %v1957_v39 = vand.u32 4294901760, %v12437_v57 }
 0x118   : > { %10539 = vmatprep.subr.bf16.mxu1 %v10538_v34  ;;  %10517 = vmatpush1.bf16.msra.mxu0 %v10516_v38  ;;  %v1473_v18 = vsub.f32 %v12487_v14, %v14342_v12  ;;  %v1479_v49 = vsub.f32 %v12462_v52, %v14340_v19  ;;  %v12513_v17 = vsub.f32 %v12344_v60, %v2574_v50  ;;  %v1961_v37 = vand.u32 4294901760, %v12443_v4 }
 0x119   : > { %14408 = vst [vmem:[#allocation35_spill] sm:$0xff] %v12500_v58  ;;  %10541 = vmatpush1.bf16.msra.mxu1 %v10540_v29  ;;  %860 = vmatprep.subr.mxu0 %v859_v8  ;;  %v14409_v38 = vand.u32 4294901760, %v12347_v20  ;;  %v14410_v56 = vand.u32 4294901760, %v12363_v21  ;;  %v865_v60 = vand.u32 4294901760, %v864_v51  ;;  %v10518_v8 = vpack.c.bf16 %v12392_v36, %v12385_v25 }
 0x11a   : > { %1429 = vmatmul.mubr.f32.gmra.mrb[2].mxu1 %v12377_v55  ;;  %v1474_v40 = vand.u32 4294901760, %v1473_v18  ;;  %819 = vmatprep.mubr.f32.mxu0 %v14407_v48  ;;  %v1480_v50 = vand.u32 4294901760, %v1479_v49  ;;  %v12533_v32 = vsub.f32 %v12437_v57, %v1957_v39  ;;  %v12536_v29 = vsub.f32 %v12443_v4, %v1961_v37  ;;  %v14413_v55 = vld [vmem:[#allocation14_spill] sm:$0xff] }
 0x11b   : > { %v12519_v34 = vsub.f32 %v12347_v20, %v14409_v38  ;;  %v2070_v16 = vsub.f32 %v12363_v21, %v14410_v56  ;;  %1434 = vmatprep.mubr.f32.mxu1 %v14407_v48  ;;  %825 = vmatmul.mubr.f32.gmra.mrb[4].mxu0 %v12500_v58  ;;  %v12530_v20 = vpack.c.bf16 %v1961_v37, %v1957_v39  ;;  %v2684_v49 = vand.u32 4294901760, %v12513_v17 }
 0x11c   : > { %1475 = vmatprep.subr.mxu1 %v1474_v40  ;;  %866 = vmatpush1.msra.mxu0 %v865_v60  ;;  %v10542_v51 = vpack.c.bf16 %v12407_v43, %v12399_v13  ;;  %v2082_v18 = vsub.f32 %v12357_v54, %v2081_v28  ;;  %v2063_v38 = vand.u32 4294901760, %v12533_v32  ;;  %v2075_v57 = vand.u32 4294901760, %v12536_v29 }
 0x11d   : > { %1481 = vmatpush1.msra.mxu1 %v1480_v50  ;;  %10519 = vmatprep.subr.bf16.mxu0 %v10518_v8  ;;  %v2071_v39 = vand.u32 4294901760, %v2070_v16  ;;  %v2696_v4 = vand.u32 4294901760, %v12519_v34  ;;  %v10520_v11 = vpack.c.bf16 %v12421_v63, %v12412_v59  ;;  %v2572_v37 = vand.u32 4294901760, %v12458_v53  ;;  %v14411_v8 = vld [vmem:[#allocation13_spill] sm:$0xff] }
 0x11e   : > { %1440 = vmatmul.mubr.f32.gmra.mrb[4].mxu1 %v12500_v58  ;;  %10543 = vmatprep.subr.bf16.mxu1 %v10542_v51  ;;  %v2083_v56 = vand.u32 4294901760, %v2082_v18  ;;  %v2685_v40 = vsub.f32 %v12513_v17, %v2684_v49  ;;  %v2064_v60 = vsub.f32 %v12533_v32, %v2063_v38  ;;  %v2076_v16 = vsub.f32 %v12536_v29, %v2075_v57 }
 0x11f   : > { %925 = vmatprep.mubr.f32.mxu0 %v14407_v48  ;;  %1540 = vmatprep.mubr.f32.mxu1 %v14407_v48  ;;  %v2697_v50 = vsub.f32 %v12519_v34, %v2696_v4  ;;  %v10544_v51 = vpack.c.bf16 %v12432_v30, %v12423_v2  ;;  %v10566_v1 = vpack.c.bf16 %v12536_v29, %v12533_v32 }
 0x120   : > { %927 = vmatmul.mubr.f32.vlgmr.msra.gmra.mrb[0].mxu0 %v14411_v8  ;;  %v12559_v19 = vpack.c.bf16 %v2083_v56, %v2071_v39  ;;  %v2686_v18 = vand.u32 4294901760, %v2685_v40  ;;  %v2065_v12 = vand.u32 4294901760, %v2064_v60  ;;  %v2077_v54 = vand.u32 4294901760, %v2076_v16 }
 0x121   : > { %10521 = vmatpush1.bf16.msra.mxu0 %v10520_v11  ;;  %932 = vmatprep.mubr.f32.mxu0 %v14407_v48  ;;  %v2698_v58 = vand.u32 4294901760, %v2697_v50  ;;  %v12569_v39 = vsub.f32 %v12458_v53, %v2572_v37  ;;  %v12571_v56 = vpack.c.bf16 %v2075_v57, %v2063_v38  ;;  %v14412_v40 = vand.u32 4294901760, %v12363_v21  ;;  %v11488_v53 = vpop.eup %11487 }
 0x122   : > { %1542 = vmatmul.mubr.f32.vlgmr.msra.gmra.mrb[0].mxu1 %v14411_v8  ;;  %961 = vmatprep.subr.mxu0 %v12403_v45  ;;  %v12578_v60 = vpack.c.bf16 %v2077_v54, %v2065_v12  ;;  %v12582_v50 = vpack.c.bf16 %v2696_v4, %v2684_v49  ;;  %v14414_v12 = vld [vmem:[#allocation20_spill] sm:$0xff]  ;;  %v11784_v38 = vmov 20   ;;  %v14435_v29 = vpack.c.bf16 %v12519_v34, %v12513_v17 }
 0x123   : > { %v12575_v11 = vpack.c.bf16 %v2081_v28, %v14412_v40  ;;  %10545 = vmatpush1.bf16.msra.mxu1 %v10544_v51  ;;  %1547 = vmatprep.mubr.f32.mxu1 %v14407_v48  ;;  %v12580_v16 = vpack.c.bf16 %v2698_v58, %v2686_v18  ;;  %v2576_v28 = vand.u32 4294901760, %v11488_v53  ;;  %v2678_v54 = vand.u32 4294901760, %v12569_v39  ;;  %v14415_v51 = vld [vmem:[#allocation11_spill] sm:$0xff] }
 0x124   : > { %1576 = vmatprep.subr.mxu1 %v12487_v14  ;;  %934 = vmatmul.mubr.f32.gmra.mrb[2].mxu0 %v14413_v55 }
 0x125   : > { %964 = vmatpush1.msra.mxu0 %v12453_v9  ;;  %939 = vmatprep.mubr.f32.mxu0 %v14407_v48  ;;  %v12595_v58 = vpack.c.bf16 %v2576_v28, %v2572_v37  ;;  %v12597_v49 = vsub.f32 %v11488_v53, %v2576_v28  ;;  %v2679_v57 = vsub.f32 %v12569_v39, %v2678_v54  ;;  %v14416_v53 = vld [vmem:[#allocation12_spill] sm:$0xff] }
 0x126   : > { %1549 = vmatmul.mubr.f32.gmra.mrb[2].mxu1 %v14413_v55  ;;  %10523 = vmatprep.subr.bf16.mxu0 %v12390_v6 }
 0x127   : > { %1579 = vmatpush1.msra.mxu1 %v12462_v52  ;;  %1554 = vmatprep.mubr.f32.mxu1 %v14407_v48  ;;  %v2690_v4 = vand.u32 4294901760, %v12597_v49  ;;  %v2680_v28 = vand.u32 4294901760, %v2679_v57  ;;  %v14419_v57 = vand.u32 4294901760, %v12399_v13  ;;  %v14422_v13 = vand.u32 4294901760, %v12412_v59 }
 0x128   : > { %10547 = vmatprep.subr.bf16.mxu1 %v12405_v47  ;;  %941 = vmatmul.mubr.f32.gmra.mrb[4].mxu0 %v14414_v12  ;;  %v14426_v59 = vand.u32 4294901760, %v12403_v45  ;;  %v5745_v45 = vld [vmem:[#allocation5 + $0x30] sm:$0xff] }
 0x129   : > { %1023 = vmatprep.mubr.f32.mxu0 %v14407_v48  ;;  %11447 = vset.pattern.permute.xlu1 %v11784_v38  ;;  %v2691_v18 = vsub.f32 %v12597_v49, %v2690_v4  ;;  %v12609_v40 = vpack.c.bf16 %v2690_v4, %v2678_v54  ;;  %v14417_v54 = vand.u32 4294901760, %v12385_v25  ;;  %v12635_v25 = vld [vmem:[#allocation5 + $0x20] sm:$0xff] }
 0x12a   : > { %1556 = vmatmul.mubr.f32.gmra.mrb[4].mxu1 %v14414_v12  ;;  %682 = vperm.xlu1 %11447, %v14415_v51  }
 0x12b   : > { %1638 = vmatprep.mubr.f32.mxu1 %v14407_v48  ;;  %11448 = vset.pattern.permute.xlu0 %v11784_v38  ;;  %v2692_v51 = vand.u32 4294901760, %v2691_v18  ;;  %v14418_v38 = vand.u32 4294901760, %v12392_v36  ;;  %v14420_v18 = vand.u32 4294901760, %v12407_v43  ;;  %v14421_v36 = vld [vmem:[#allocation15_spill] sm:$0xff]  ;;  %v14423_v43 = vand.u32 4294901760, %v12421_v63 }
 0x12c   : > { %1026 = vmatmul.mubr.f32.vlgmr.msra.gmra.mrb[0].mxu0 %v14400_v31  ;;  %687 = vperm.xlu0 %11448, %v14416_v53   ;;  %v14427_v63 = vand.u32 4294901760, %v12487_v14  ;;  %v14429_v14 = vand.u32 4294901760, %v12462_v52 }
 0x12d   : > { %10525 = vmatpush1.bf16.msra.mxu0 %v12419_v22  ;;  %1031 = vmatprep.mubr.f32.mxu0 %v14407_v48  ;;  %v10526_v4 = vpack.c.bf16 %v14418_v38, %v14417_v54  ;;  %v12624_v53 = vpack.c.bf16 %v2692_v51, %v2680_v28  ;;  %v10550_v37 = vpack.c.bf16 %v14420_v18, %v14419_v57  ;;  %v14424_v51 = vand.u32 4294901760, %v12423_v2 }
 0x12e   : > { %1641 = vmatmul.mubr.f32.vlgmr.msra.gmra.mrb[0].mxu1 %v14400_v31  ;;  %1057 = vmatprep.subr.mxu0 %v12394_v33  ;;  %v10528_v28 = vpack.c.bf16 %v14423_v43, %v14422_v13  ;;  %v14425_v54 = vand.u32 4294901760, %v12432_v30  ;;  %v14428_v2 = vand.u32 4294901760, %v12453_v9  ;;  %v5747_v30 = vld [vmem:[#allocation5 + $0x40] sm:$0xf] }
 0x12f   : > { %10549 = vmatpush1.bf16.msra.mxu1 %v12430_v62  ;;  %1646 = vmatprep.mubr.f32.mxu1 %v14407_v48 }
 0x130   : > { %1672 = vmatprep.subr.mxu1 %v12434_v7  ;;  %1034 = vmatmul.mubr.f32.gmra.mrb[2].mxu0 %v14403_v44  ;;  %v10552_v38 = vpack.c.bf16 %v14425_v54, %v14424_v51  ;;  %v5746_v51 = vld [vmem:[#allocation5 + $0x38] sm:$0xff] }
 0x131   : > { %1059 = vmatpush1.msra.mxu0 %v12440_v3  ;;  %1039 = vmatprep.mubr.f32.mxu0 %v14407_v48 }
 0x132   : > { %1649 = vmatmul.mubr.f32.gmra.mrb[2].mxu1 %v14403_v44  ;;  %10527 = vmatprep.subr.bf16.mxu0 %v10526_v4  ;;  %v652_v4 = vadd.f32 %v12299_v27, %v12297_v15  ;;  %v651_v15 = vadd.f32 %v12299_v27, %v12295_v41 }
 0x133   : > { %1674 = vmatpush1.msra.mxu1 %v12446_v46  ;;  %1654 = vmatprep.mubr.f32.mxu1 %v14407_v48 }
 0x134   : > { %10551 = vmatprep.subr.bf16.mxu1 %v10550_v37  ;;  %1042 = vmatmul.mubr.f32.gmra.mrb[4].mxu0 %v14398_v35  ;;  %v650_v37 = vadd.f32 %v12299_v27, %v12293_v0  ;;  %v649_v0 = vadd.f32 %v12299_v27, %v12291_v26  ;;  %v12673_v26 = vld [vmem:[#allocation5 + $0x18] sm:$0xff] }
 0x135   : > { %1118 = vmatprep.mubr.f32.mxu0 %v14407_v48  ;;  %692 = vperm.xlu1 %11447, %v14421_v36  }
 0x136   : > { %1657 = vmatmul.mubr.f32.gmra.mrb[4].mxu1 %v14398_v35  ;;  %3222 = vperm.xlu0 %11448, %v12635_v25   ;;  %11489 = vtanh.f32 %v650_v37 }
 0x137   : > { %1733 = vmatprep.mubr.f32.mxu1 %v14407_v48  ;;  %11491 = vtanh.f32 %v652_v4 }
 0x138   : > { %1122 = vmatmul.mubr.f32.vlgmr.msra.gmra.mrb[0].mxu0 %v14401_v5  ;;  %11493 = vtanh.f32 %v649_v0 }
 0x139   : > { %10529 = vmatpush1.bf16.msra.mxu0 %v10528_v28  ;;  %1127 = vmatprep.mubr.f32.mxu0 %v14407_v48  ;;  %11495 = vtanh.f32 %v651_v15 }
 0x13a   : > { %1737 = vmatmul.mubr.f32.vlgmr.msra.gmra.mrb[0].mxu1 %v14401_v5  ;;  %1165 = vmatprep.subr.mxu0 %v14426_v59 }
 0x13b   : > { %10553 = vmatpush1.bf16.msra.mxu1 %v10552_v38  ;;  %1742 = vmatprep.mubr.f32.mxu1 %v14407_v48 }
 0x13c   : > { %1780 = vmatprep.subr.mxu1 %v14427_v63  ;;  %1131 = vmatmul.mubr.f32.gmra.mrb[2].mxu0 %v14404_v23 }
 0x13d   : > { %1169 = vmatpush1.msra.mxu0 %v14428_v2  ;;  %1136 = vmatprep.mubr.f32.mxu0 %v14407_v48  ;;  %v14430_v2 = vld [vmem:[#allocation29_spill] sm:$0xff] }
 0x13e   : > { %1746 = vmatmul.mubr.f32.gmra.mrb[2].mxu1 %v14404_v23  ;;  %10531 = vmatprep.subr.bf16.mxu0 %v12390_v6 }
 0x13f   : > { %1784 = vmatpush1.msra.mxu1 %v14429_v14  ;;  %1751 = vmatprep.mubr.f32.mxu1 %v14407_v48  ;;  %v14432_v14 = vld [vmem:[#allocation35_spill] sm:$0xff] }
 0x140   : > { %10555 = vmatprep.subr.bf16.mxu1 %v12405_v47  ;;  %1140 = vmatmul.mubr.f32.gmra.mrb[4].mxu0 %v12353_v61  ;;  %v11490_v41 = vpop.eup %11489 }
 0x141   : > { %1228 = vmatprep.mubr.f32.mxu0 %v14407_v48  ;;  %3217 = vperm.xlu1 %11447, %v12673_v26   ;;  %v11492_v27 = vpop.eup %11491  ;;  %v719_v47 = vsel %vm702_vm1, %v11490_v41, 0 }
 0x142   : > { %1755 = vmatmul.mubr.f32.gmra.mrb[4].mxu1 %v12353_v61  ;;  %5750 = vperm.xlu0 %11448, %v5745_v45   ;;  %v11494_v6 = vpop.eup %11493 }
 0x143   : > { %1843 = vmatprep.mubr.f32.mxu1 %v14407_v48 }
 0x144   : > { %1230 = vmatmul.mubr.f32.vlgmr.msra.gmra.mrb[0].mxu0 %v14411_v8 }
 0x145   : > { %10533 = vmatpush1.bf16.msra.mxu0 %v12419_v22  ;;  %1235 = vmatprep.mubr.f32.mxu0 %v14407_v48  ;;  %v11496_v22 = vpop.eup %11495 }
 0x146   : > { %1845 = vmatmul.mubr.f32.vlgmr.msra.gmra.mrb[0].mxu1 %v14411_v8  ;;  %1259 = vmatprep.subr.mxu0 %v12394_v33  ;;  %v12698_v33 = vld [vmem:[#allocation5 + $0x28] sm:$0xf]  ;;  %v722_v9 = vsel %vm702_vm1, %v11496_v22, 0 }
 0x147   : > { %10557 = vmatpush1.bf16.msra.mxu1 %v12430_v62  ;;  %1850 = vmatprep.mubr.f32.mxu1 %v14407_v48  ;;  %v725_v62 = vsel %vm702_vm1, %v11492_v27, 0  ;;  %v12723_v18 = vand.u32 4294901760, %v722_v9 }
 0x148   : > { %1874 = vmatprep.subr.mxu1 %v12434_v7  ;;  %1237 = vmatmul.mubr.f32.gmra.mrb[2].mxu0 %v14413_v55  ;;  %v12705_v7 = vand.u32 4294901760, %v719_v47 }
 0x149   : > { %1261 = vmatpush1.msra.mxu0 %v12440_v3  ;;  %1242 = vmatprep.mubr.f32.mxu0 %v14407_v48  ;;  %v716_v3 = vsel %vm702_vm1, %v11494_v6, 0  ;;  %v12740_v28 = vsub.f32 %v722_v9, %v12723_v18 }
 0x14a   : > { %1852 = vmatmul.mubr.f32.gmra.mrb[2].mxu1 %v14413_v55  ;;  %10559 = vmatprep.subr.bf16.mxu0 %v12530_v20  ;;  %v12715_v52 = vand.u32 4294901760, %v716_v3  ;;  %v12719_v57 = vsub.f32 %v719_v47, %v12705_v7 }
 0x14b   : > { %1876 = vmatpush1.msra.mxu1 %v12446_v46  ;;  %1857 = vmatprep.mubr.f32.mxu1 %v14407_v48  ;;  %v12711_v46 = vand.u32 4294901760, %v725_v62 }
 0x14c   : > { %10583 = vmatprep.subr.bf16.mxu1 %v12595_v58  ;;  %1244 = vmatmul.mubr.f32.gmra.mrb[4].mxu0 %v14414_v12  ;;  %v12733_v13 = vsub.f32 %v716_v3, %v12715_v52  ;;  %v2087_v43 = vand.u32 4294901760, %v12719_v57 }
 0x14d   : > { %1320 = vmatprep.mubr.f32.mxu0 %v14407_v48  ;;  %3227 = vperm.xlu1 %11447, %v12698_v33   ;;  %v12728_v36 = vsub.f32 %v725_v62, %v12711_v46 }
 0x14e   : > { %1859 = vmatmul.mubr.f32.gmra.mrb[4].mxu1 %v14414_v12  ;;  %5760 = vperm.xlu0 %11448, %v5747_v30   ;;  %v2093_v54 = vand.u32 4294901760, %v12733_v13  ;;  %v2088_v38 = vsub.f32 %v12719_v57, %v2087_v43 }
 0x14f   : > { %1935 = vmatprep.mubr.f32.mxu1 %v14407_v48  ;;  %v2702_v37 = vand.u32 4294901760, %v12728_v36 }
 0x150   : > { %1322 = vmatmul.mubr.f32.vlgmr.msra.gmra.mrb[0].mxu0 %v14411_v8  ;;  %v2089_v59 = vand.u32 4294901760, %v2088_v38 }
 0x151   : > { %10561 = vmatpush1.bf16.msra.mxu0 %v12355_v24  ;;  %1327 = vmatprep.mubr.f32.mxu0 %v14407_v48  ;;  %v2703_v4 = vsub.f32 %v12728_v36, %v2702_v37 }
 0x152   : > { %1937 = vmatmul.mubr.f32.vlgmr.msra.gmra.mrb[0].mxu1 %v14411_v8  ;;  %1966 = vmatprep.subr.mxu0 %v12705_v7 }
 0x153   : > { %10585 = vmatpush1.bf16.msra.mxu1 %v12383_v10  ;;  %1942 = vmatprep.mubr.f32.mxu1 %v14407_v48  ;;  %v2704_v63 = vand.u32 4294901760, %v2703_v4 }
 0x154   : > { %2581 = vmatprep.subr.mxu1 %v12711_v46  ;;  %1329 = vmatmul.mubr.f32.gmra.mrb[2].mxu0 %v14413_v55 }
 0x155   : > { %1968 = vmatpush1.msra.mxu0 %v12715_v52  ;;  %1334 = vmatprep.mubr.f32.mxu0 %v14407_v48 }
 0x156   : > { %1944 = vmatmul.mubr.f32.gmra.mrb[2].mxu1 %v14413_v55  ;;  %10563 = vmatprep.subr.bf16.mxu0 %v12578_v60  ;;  %v2708_v60 = vand.u32 4294901760, %v12740_v28 }
 0x157   : > { %2583 = vmatpush1.msra.mxu1 %v12723_v18  ;;  %1949 = vmatprep.mubr.f32.mxu1 %v14407_v48 }
 0x158   : > { %10587 = vmatprep.subr.bf16.mxu1 %v12624_v53  ;;  %1336 = vmatmul.mubr.f32.gmra.mrb[4].mxu0 %v14414_v12  ;;  %v2094_v53 = vsub.f32 %v12733_v13, %v2093_v54  ;;  %v2709_v0 = vsub.f32 %v12740_v28, %v2708_v60 }
 0x159   : > { %2027 = vmatprep.mubr.f32.mxu0 %v14407_v48  ;;  %5755 = vperm.xlu1 %11447, %v5746_v51  }
 0x15a   : > { %1951 = vmatmul.mubr.f32.gmra.mrb[4].mxu1 %v14414_v12  ;;  %v2095_v15 = vand.u32 4294901760, %v2094_v53 }
 0x15b   : > { %2642 = vmatprep.mubr.f32.mxu1 %v14407_v48 }
 0x15c   : > { %2033 = vmatmul.mubr.f32.vlgmr.msra.gmra.mrb[6].mxu0 %v12370_v42 }
 0x15d   : > { %10565 = vmatpush1.bf16.msra.mxu0 %v12559_v19  ;;  %2038 = vmatprep.mubr.f32.mxu0 %v14407_v48  ;;  %v2710_v19 = vand.u32 4294901760, %v2709_v0 }
 0x15e   : > { %2648 = vmatmul.mubr.f32.vlgmr.msra.gmra.mrb[6].mxu1 %v12370_v42  ;;  %2090 = vmatprep.subr.mxu0 %v2089_v59  ;;  %v8277_v42 = vld [vmem:[%s14305_s3] sm:$0x7] }
 0x15f   : > { %10589 = vmatpush1.bf16.msra.mxu1 %v12580_v16  ;;  %2653 = vmatprep.mubr.f32.mxu1 %v14407_v48  ;;  %v14431_v16 = vpack.c.bf16 %v12597_v49, %v12569_v39 }
 0x160   : > { %2705 = vmatprep.subr.mxu1 %v2704_v63  ;;  %2044 = vmatmul.mubr.f32.gmra.mrb[8].mxu0 %v14430_v2 }
 0x161   : > { %2096 = vmatpush1.msra.mxu0 %v2095_v15  ;;  %2049 = vmatprep.mubr.f32.mxu0 %v14407_v48 }
 0x162   : > { %2659 = vmatmul.mubr.f32.gmra.mrb[8].mxu1 %v14430_v2  ;;  %10567 = vmatprep.subr.bf16.mxu0 %v10566_v1  ;;  %v14433_v1 = vld [vmem:[#allocation34_spill] sm:$0xff] }
 0x163   : > { %2711 = vmatpush1.msra.mxu1 %v2710_v19  ;;  %2664 = vmatprep.mubr.f32.mxu1 %v14407_v48  ;;  %v14434_v32 = vpack.c.bf16 %v14433_v1, %v12363_v21 }
 0x164   : > { %10591 = vmatprep.subr.bf16.mxu1 %v14431_v16  ;;  %2055 = vmatmul.mubr.f32.gmra.mrb[10].mxu0 %v14432_v14 }
 0x165   : > { %2155 = vmatprep.mubr.f32.mxu0 %v14407_v48  ;;  %8280 = vperm.xlu1 %11447, %v8277_v42  }
 0x166   : > { %2670 = vmatmul.mubr.f32.gmra.mrb[10].mxu1 %v14432_v14 }
 0x167   : > { %2770 = vmatprep.mubr.f32.mxu1 %v14407_v48 }
 0x168   : > { %2157 = vmatmul.mubr.f32.vlgmr.msra.gmra.mrb[6].mxu0 %v14411_v8 }
 0x169   : > { %10569 = vmatpush1.bf16.msra.mxu0 %v14434_v32  ;;  %2162 = vmatprep.mubr.f32.mxu0 %v14407_v48 }
 0x16a   : > { %2772 = vmatmul.mubr.f32.vlgmr.msra.gmra.mrb[6].mxu1 %v14411_v8  ;;  %2191 = vmatprep.subr.mxu0 %v12719_v57 }
 0x16b   : > { %10593 = vmatpush1.bf16.msra.mxu1 %v14435_v29  ;;  %2777 = vmatprep.mubr.f32.mxu1 %v14407_v48 }
 0x16c   : > { %2806 = vmatprep.subr.mxu1 %v12728_v36  ;;  %2164 = vmatmul.mubr.f32.gmra.mrb[8].mxu0 %v14413_v55 }
 0x16d   : > { %2194 = vmatpush1.msra.mxu0 %v12733_v13  ;;  %2169 = vmatprep.mubr.f32.mxu0 %v14407_v48 }
 0x16e   : > { %2779 = vmatmul.mubr.f32.gmra.mrb[8].mxu1 %v14413_v55  ;;  %10571 = vmatprep.subr.bf16.mxu0 %v12530_v20 }
 0x16f   : > { %2809 = vmatpush1.msra.mxu1 %v12740_v28  ;;  %2784 = vmatprep.mubr.f32.mxu1 %v14407_v48 }
 0x170   : > { %10595 = vmatprep.subr.bf16.mxu1 %v12595_v58  ;;  %2171 = vmatmul.mubr.f32.gmra.mrb[10].mxu0 %v14414_v12 }
 0x171   : > { %2253 = vmatprep.mubr.f32.mxu0 %v14407_v48 }
 0x172   : > { %2786 = vmatmul.mubr.f32.gmra.mrb[10].mxu1 %v14414_v12 }
 0x173   : > { %2868 = vmatprep.mubr.f32.mxu1 %v14407_v48 }
 0x174   : > { %2256 = vmatmul.mubr.f32.vlgmr.msra.gmra.mrb[6].mxu0 %v14400_v31 }
 0x175   : > { %10573 = vmatpush1.bf16.msra.mxu0 %v12355_v24  ;;  %2261 = vmatprep.mubr.f32.mxu0 %v14407_v48 }
 0x176   : > { %2871 = vmatmul.mubr.f32.vlgmr.msra.gmra.mrb[6].mxu1 %v14400_v31  ;;  %2287 = vmatprep.subr.mxu0 %v12705_v7 }
 0x177   : > { %10597 = vmatpush1.bf16.msra.mxu1 %v12383_v10  ;;  %2876 = vmatprep.mubr.f32.mxu1 %v14407_v48 }
 0x178   : > { %2902 = vmatprep.subr.mxu1 %v12711_v46  ;;  %2264 = vmatmul.mubr.f32.gmra.mrb[8].mxu0 %v14403_v44 }
 0x179   : > { %2289 = vmatpush1.msra.mxu0 %v12715_v52  ;;  %2269 = vmatprep.mubr.f32.mxu0 %v14407_v48 }
 0x17a   : > { %2879 = vmatmul.mubr.f32.gmra.mrb[8].mxu1 %v14403_v44  ;;  %10575 = vmatprep.subr.bf16.mxu0 %v12571_v56 }
 0x17b   : > { %2904 = vmatpush1.msra.mxu1 %v12723_v18  ;;  %2884 = vmatprep.mubr.f32.mxu1 %v14407_v48 }
 0x17c   : > { %10599 = vmatprep.subr.bf16.mxu1 %v12609_v40  ;;  %2272 = vmatmul.mubr.f32.gmra.mrb[10].mxu0 %v14398_v35 }
 0x17d   : > { %2348 = vmatprep.mubr.f32.mxu0 %v14407_v48 }
 0x17e   : > { %2887 = vmatmul.mubr.f32.gmra.mrb[10].mxu1 %v14398_v35  ;;  %v3230_v35 = vsel %vm695_vm0, %v12673_v26, 0 }
 0x17f   : > { %2963 = vmatprep.mubr.f32.mxu1 %v14407_v48 }
 0x180   : > { %2352 = vmatmul.mubr.f32.vlgmr.msra.gmra.mrb[6].mxu0 %v14401_v5 }
 0x181   : > { %10577 = vmatpush1.bf16.msra.mxu0 %v12575_v11  ;;  %2357 = vmatprep.mubr.f32.mxu0 %v14407_v48 }
 0x182   : > { %2967 = vmatmul.mubr.f32.vlgmr.msra.gmra.mrb[6].mxu1 %v14401_v5  ;;  %2395 = vmatprep.subr.mxu0 %v2087_v43 }
 0x183   : > { %10601 = vmatpush1.bf16.msra.mxu1 %v12582_v50  ;;  %2972 = vmatprep.mubr.f32.mxu1 %v14407_v48 }
 0x184   : > { %3010 = vmatprep.subr.mxu1 %v2702_v37  ;;  %2361 = vmatmul.mubr.f32.gmra.mrb[8].mxu0 %v14404_v23 }
 0x185   : > { %2399 = vmatpush1.msra.mxu0 %v2093_v54  ;;  %2366 = vmatprep.mubr.f32.mxu0 %v14407_v48 }
 0x186   : > { %2976 = vmatmul.mubr.f32.gmra.mrb[8].mxu1 %v14404_v23  ;;  %10579 = vmatprep.subr.bf16.mxu0 %v12530_v20  ;;  %v12897_v23 = vand.u32 4294901760, %v3230_v35 }
 0x187   : > { %3014 = vmatpush1.msra.mxu1 %v2708_v60  ;;  %2981 = vmatprep.mubr.f32.mxu1 %v14407_v48 }
 0x188   : > { %10603 = vmatprep.subr.bf16.mxu1 %v12595_v58  ;;  %2370 = vmatmul.mubr.f32.gmra.mrb[10].mxu0 %v12353_v61  ;;  %v12910_v58 = vsub.f32 %v3230_v35, %v12897_v23 }
 0x189   : > { %2458 = vmatprep.mubr.f32.mxu0 %v14407_v48 }
 0x18a   : > { %2985 = vmatmul.mubr.f32.gmra.mrb[10].mxu1 %v12353_v61  ;;  %v3232_v61 = vsel %vm695_vm0, %v12635_v25, 0  ;;  %v12925_v62 = vand.u32 4294901760, %v12910_v58 }
 0x18b   : > { %3073 = vmatprep.mubr.f32.mxu1 %v14407_v48 }
 0x18c   : > { %2460 = vmatmul.mubr.f32.vlgmr.msra.gmra.mrb[6].mxu0 %v14411_v8  ;;  %v3334_v43 = vsub.f32 %v12910_v58, %v12925_v62 }
 0x18d   : > { %10581 = vmatpush1.bf16.msra.mxu0 %v12355_v24  ;;  %2465 = vmatprep.mubr.f32.mxu0 %v14407_v48  ;;  %v3234_v24 = vsel %vm695_vm0, %v12698_v33, 0 }
 0x18e   : > { %3075 = vmatmul.mubr.f32.vlgmr.msra.gmra.mrb[6].mxu1 %v14411_v8  ;;  %2489 = vmatprep.subr.mxu0 %v12705_v7  ;;  %v12902_v34 = vand.u32 4294901760, %v3234_v24  ;;  %v12946_v2 = vand.u32 4294901760, %v3334_v43 }
 0x18f   : > { %10605 = vmatpush1.bf16.msra.mxu1 %v12383_v10  ;;  %3080 = vmatprep.mubr.f32.mxu1 %v14407_v48 }
 0x190   : > { %3104 = vmatprep.subr.mxu1 %v12711_v46  ;;  %2467 = vmatmul.mubr.f32.gmra.mrb[8].mxu0 %v14413_v55  ;;  %v12917_v26 = vsub.f32 %v3234_v24, %v12902_v34 }
 0x191   : > { %2491 = vmatpush1.msra.mxu0 %v12715_v52  ;;  %2472 = vmatprep.mubr.f32.mxu0 %v14407_v48 }
 0x192   : > { %3082 = vmatmul.mubr.f32.gmra.mrb[8].mxu1 %v14413_v55  ;;  %v12933_v52 = vand.u32 4294901760, %v12917_v26 }
 0x193   : > { %3106 = vmatpush1.msra.mxu1 %v12723_v18  ;;  %3087 = vmatprep.mubr.f32.mxu1 %v14407_v48 }
 0x194   : > { %2474 = vmatmul.mubr.f32.gmra.mrb[10].mxu0 %v14414_v12  ;;  %v3356_v54 = vsub.f32 %v12917_v26, %v12933_v52 }
 0x195   : > { %2550 = vmatprep.mubr.f32.mxu0 %v14407_v48 }
 0x196   : > { %3089 = vmatmul.mubr.f32.gmra.mrb[10].mxu1 %v14414_v12  ;;  %v12954_v29 = vand.u32 4294901760, %v3356_v54 }
 0x197   : > { %3165 = vmatprep.mubr.f32.mxu1 %v14407_v48 }
 0x198   : > { %2552 = vmatmul.mubr.f32.vlgmr.msra.gmra.mrb[6].mxu0 %v14411_v8 }
 0x199   : > { %2557 = vmatprep.mubr.f32.mxu0 %v14407_v48 }
 0x19a   : > { %3167 = vmatmul.mubr.f32.vlgmr.msra.gmra.mrb[6].mxu1 %v14411_v8 }
 0x19b   : > { %3172 = vmatprep.mubr.f32.mxu1 %v14407_v48 }
 0x19c   : > { %2559 = vmatmul.mubr.f32.gmra.mrb[8].mxu0 %v14413_v55 }
 0x19d   : > { %2564 = vmatprep.mubr.f32.mxu0 %v14407_v48 }
 0x19e   : > { %3174 = vmatmul.mubr.f32.gmra.mrb[8].mxu1 %v14413_v55  ;;  %v12899_v55 = vand.u32 4294901760, %v3232_v61 }
 0x19f   : > { %3179 = vmatprep.mubr.f32.mxu1 %v14407_v48 }
 0x1a0   : > { %2566 = vmatmul.mubr.f32.gmra.mrb[10].mxu0 %v14414_v12  ;;  %v12913_v49 = vsub.f32 %v3232_v61, %v12899_v55 }
 0x1a1   : > { %3330 = vmatprep.mubr.f32.mxu0 %v14407_v48 }
 0x1a2   : > { %3181 = vmatmul.mubr.f32.gmra.mrb[10].mxu1 %v14414_v12  ;;  %v12929_v3 = vand.u32 4294901760, %v12913_v49 }
 0x1a3   : > { %3945 = vmatprep.mubr.f32.mxu1 %v14407_v48 }
 0x1a4   : > { %v3345_v28 = vsub.f32 %v12913_v49, %v12929_v3 }
 0x1a6   : > { %v12949_v42 = vand.u32 4294901760, %v3345_v28 }
 0x1a9   : > { %v12894_v21 = vpop.permute.xlu1 %682 }
 0x1ab   : > { %v12905_v39 = vpop.permute.xlu0 %687 }
 0x1b4   : > { %v12920_v27 = vpop.permute.xlu1 %692 }
 0x223   : > { %v1323_v31 = vpop.f32.mrb[0].mxu0 }
 0x224   : > { %v10894_v5 = vadd.f32 %v1323_v31, %v12894_v21  ;;  %v1325_v44 = vpop.f32.mrb[1].mxu0 }
 0x225   : > { %v1938_v10 = vpop.f32.mrb[0].mxu1  ;;  %v10895_v17 = vadd.f32 %v1325_v44, %v12894_v21 }
 0x226   : > { %11497 = vtanh.f32 %v10894_v5  ;;  %v10900_v20 = vadd.f32 %v1938_v10, %v12894_v21  ;;  %v1940_v8 = vpop.f32.mrb[1].mxu1 }
 0x227   : > { %11499 = vtanh.f32 %v10895_v17  ;;  %v10901_v56 = vadd.f32 %v1940_v8, %v12894_v21  ;;  %v1330_v11 = vpop.f32.mrb[2].mxu0 }
 0x228   : > { %11501 = vtanh.f32 %v10900_v20  ;;  %v10896_v50 = vadd.f32 %v1330_v11, %v12905_v39  ;;  %v1332_v12 = vpop.f32.mrb[3].mxu0 }
 0x229   : > { %11503 = vtanh.f32 %v10901_v56  ;;  %v1945_v40 = vpop.f32.mrb[2].mxu1  ;;  %v10897_v25 = vadd.f32 %v1332_v12, %v12905_v39 }
 0x22a   : > { %11505 = vtanh.f32 %v10896_v50  ;;  %v10902_v45 = vadd.f32 %v1945_v40, %v12905_v39  ;;  %v1947_v41 = vpop.f32.mrb[3].mxu1 }
 0x22b   : > { %11507 = vtanh.f32 %v10897_v25  ;;  %v10903_v6 = vadd.f32 %v1947_v41, %v12905_v39  ;;  %v1337_v47 = vpop.f32.mrb[4].mxu0 }
 0x22c   : > { %11509 = vtanh.f32 %v10902_v45  ;;  %v10898_v33 = vadd.f32 %v1337_v47, %v12920_v27  ;;  %v1339_v22 = vpop.f32.mrb[5].mxu0 }
 0x22d   : > { %11511 = vtanh.f32 %v10903_v6  ;;  %v1952_v30 = vpop.f32.mrb[4].mxu1  ;;  %v10899_v7 = vadd.f32 %v1339_v22, %v12920_v27 }
 0x22e   : > { %11513 = vtanh.f32 %v10898_v33  ;;  %v10904_v46 = vadd.f32 %v1952_v30, %v12920_v27  ;;  %v1954_v9 = vpop.f32.mrb[5].mxu1 }
 0x22f   : > { %11515 = vtanh.f32 %v10899_v7  ;;  %v10905_v57 = vadd.f32 %v1954_v9, %v12920_v27 }
 0x230   : > { %v11498_v18 = vpop.eup %11497  ;;  %11517 = vtanh.f32 %v10904_v46 }
 0x231   : > { %v11500_v36 = vpop.eup %11499  ;;  %11519 = vtanh.f32 %v10905_v57  ;;  %v3262_v13 = vand.u32 4294901760, %v11498_v18 }
 0x232   : > { %v11502_v37 = vpop.eup %11501  ;;  %v3260_v51 = vand.u32 4294901760, %v11500_v36 }
 0x233   : > { %v11504_v38 = vpop.eup %11503  ;;  %v12942_v60 = vsub.f32 %v11498_v18, %v3262_v13  ;;  %v3877_v4 = vand.u32 4294901760, %v11502_v37 }
 0x234   : > { %v11506_v53 = vpop.eup %11505  ;;  %v12944_v59 = vsub.f32 %v11500_v36, %v3260_v51  ;;  %v3875_v0 = vand.u32 4294901760, %v11504_v38 }
 0x235   : > { %v11508_v63 = vpop.eup %11507  ;;  %v3266_v15 = vand.u32 4294901760, %v11506_v53  ;;  %v3372_v19 = vand.u32 4294901760, %v12942_v60  ;;  %v12960_v5 = vsub.f32 %v11502_v37, %v3877_v4 }
 0x236   : > { %v11510_v16 = vpop.eup %11509  ;;  %v3264_v14 = vand.u32 4294901760, %v11508_v63  ;;  %v12951_v1 = vsub.f32 %v11504_v38, %v3875_v0  ;;  %v3366_v32 = vand.u32 4294901760, %v12944_v59 }
 0x237   : > { %v11512_v35 = vpop.eup %11511  ;;  %v12956_v61 = vpack.c.bf16 %v3266_v15, %v3262_v13  ;;  %v12958_v24 = vsub.f32 %v11506_v53, %v3266_v15  ;;  %v3881_v31 = vand.u32 4294901760, %v11510_v16  ;;  %v3373_v8 = vsub.f32 %v12942_v60, %v3372_v19 }
 0x238   : > { %v11514_v44 = vpop.eup %11513  ;;  %v12962_v10 = vpack.c.bf16 %v3264_v14, %v3260_v51  ;;  %v12964_v17 = vsub.f32 %v11508_v63, %v3264_v14  ;;  %v3879_v20 = vand.u32 4294901760, %v11512_v35  ;;  %v3367_v12 = vsub.f32 %v12944_v59, %v3366_v32 }
 0x239   : > { %v11516_v56 = vpop.eup %11515  ;;  %v12969_v11 = vpack.c.bf16 %v3881_v31, %v3877_v4  ;;  %v3237_v50 = vsel %vm702_vm1, %v11514_v44, 0  ;;  %v3981_v40 = vand.u32 4294901760, %v12951_v1  ;;  %v12985_v22 = vsub.f32 %v11510_v16, %v3881_v31 }
 0x23a   : > { %v11518_v25 = vpop.eup %11517  ;;  %10607 = vmatprep.subr.bf16.mxu0 %v12962_v10  ;;  %v12977_v45 = vpack.c.bf16 %v3879_v20, %v3875_v0  ;;  %v12979_v41 = vsub.f32 %v11512_v35, %v3879_v20  ;;  %v3240_v6 = vsel %vm702_vm1, %v11516_v56, 0  ;;  %v12982_v47 = vand.u32 4294901760, %v3237_v50 }
 0x23b   : > { %v11520_v33 = vpop.eup %11519  ;;  %10609 = vmatpush1.bf16.msra.mxu0 %v12956_v61  ;;  %v12987_v30 = vand.u32 4294901760, %v3240_v6  ;;  %v3243_v7 = vsel %vm702_vm1, %v11518_v25, 0  ;;  %v3378_v46 = vand.u32 4294901760, %v12964_v17  ;;  %v3982_v36 = vsub.f32 %v12951_v1, %v3981_v40 }
 0x23c   : > { %10631 = vmatprep.subr.bf16.mxu1 %v12977_v45  ;;  %v3246_v9 = vsel %vm702_vm1, %v11520_v33, 0  ;;  %v12994_v57 = vsub.f32 %v3237_v50, %v12982_v47  ;;  %v12996_v18 = vand.u32 4294901760, %v3243_v7  ;;  %v3368_v43 = vand.u32 4294901760, %v3367_v12 }
 0x23d   : > { %10633 = vmatpush1.bf16.msra.mxu1 %v12969_v11  ;;  %3269 = vmatprep.subr.mxu0 %v12987_v30  ;;  %v13003_v13 = vand.u32 4294901760, %v3246_v9  ;;  %v3379_v28 = vsub.f32 %v12964_v17, %v3378_v46  ;;  %v3993_v37 = vand.u32 4294901760, %v12979_v41  ;;  %v3983_v54 = vand.u32 4294901760, %v3982_v36 }
 0x23e   : > { %v13008_v51 = vsub.f32 %v3243_v7, %v12996_v18  ;;  %v3384_v38 = vand.u32 4294901760, %v12958_v24  ;;  %v3987_v4 = vand.u32 4294901760, %v12960_v5  ;;  %v3999_v63 = vand.u32 4294901760, %v12985_v22 }
 0x23f   : > { %3884 = vmatprep.subr.mxu1 %v13003_v13  ;;  %3271 = vmatpush1.msra.mxu0 %v12982_v47  ;;  %v3380_v53 = vand.u32 4294901760, %v3379_v28  ;;  %v3994_v0 = vsub.f32 %v12979_v41, %v3993_v37  ;;  %v13017_v15 = vsub.f32 %v3240_v6, %v12987_v30  ;;  %v13023_v35 = vsub.f32 %v3246_v9, %v13003_v13 }
 0x240   : > { %3336 = vmatmul.mubr.f32.vlgmr.msra.gmra.mrb[12].mxu0 %v12946_v2  ;;  %v3385_v16 = vsub.f32 %v12958_v24, %v3384_v38  ;;  %v3988_v14 = vsub.f32 %v12960_v5, %v3987_v4  ;;  %v3396_v31 = vand.u32 4294901760, %v12994_v57  ;;  %v4000_v56 = vsub.f32 %v12985_v22, %v3999_v63 }
 0x241   : > { %3886 = vmatpush1.msra.mxu1 %v12996_v18  ;;  %v10610_v44 = vpack.c.bf16 %v3380_v53, %v3368_v43  ;;  %v3995_v20 = vand.u32 4294901760, %v3994_v0  ;;  %3341 = vmatprep.mubr.f32.mxu0 %v14407_v48  ;;  %v3390_v50 = vand.u32 4294901760, %v13017_v15  ;;  %v3374_v12 = vand.u32 4294901760, %v3373_v8 }
 0x242   : > { %3951 = vmatmul.mubr.f32.vlgmr.msra.gmra.mrb[12].mxu1 %v12946_v2  ;;  %v3386_v25 = vand.u32 4294901760, %v3385_v16  ;;  %v3989_v6 = vand.u32 4294901760, %v3988_v14  ;;  %v4005_v33 = vand.u32 4294901760, %v13023_v35  ;;  %v4001_v9 = vand.u32 4294901760, %v4000_v56 }
 0x243   : > { %10611 = vmatprep.subr.bf16.mxu0 %v10610_v44  ;;  %v10634_v7 = vpack.c.bf16 %v3995_v20, %v3983_v54  ;;  %3956 = vmatprep.mubr.f32.mxu1 %v14407_v48  ;;  %v3391_v36 = vsub.f32 %v13017_v15, %v3390_v50  ;;  %v4011_v43 = vand.u32 4294901760, %v13008_v51  ;;  %v3397_v54 = vsub.f32 %v12994_v57, %v3396_v31 }
 0x244   : > { %v10612_v28 = vpack.c.bf16 %v3386_v25, %v3374_v12  ;;  %3347 = vmatmul.mubr.f32.gmra.mrb[14].mxu0 %v12949_v42  ;;  %v4006_v8 = vsub.f32 %v13023_v35, %v4005_v33  ;;  %v10614_v53 = vpack.c.bf16 %v12964_v17, %v12944_v59  ;;  %v10636_v0 = vpack.c.bf16 %v4001_v9, %v3989_v6 }
 0x245   : > { %10635 = vmatprep.subr.bf16.mxu1 %v10634_v7  ;;  %v3392_v16 = vand.u32 4294901760, %v3391_v36  ;;  %3352 = vmatprep.mubr.f32.mxu0 %v14407_v48  ;;  %v4012_v14 = vsub.f32 %v13008_v51, %v4011_v43  ;;  %v10638_v44 = vpack.c.bf16 %v12979_v41, %v12951_v1  ;;  %v10616_v56 = vpack.c.bf16 %v12958_v24, %v12942_v60 }
 0x246   : > { %10613 = vmatpush1.bf16.msra.mxu0 %v10612_v28  ;;  %3962 = vmatmul.mubr.f32.gmra.mrb[14].mxu1 %v12949_v42  ;;  %v4007_v20 = vand.u32 4294901760, %v4006_v8  ;;  %v10640_v17 = vpack.c.bf16 %v12985_v22, %v12960_v5  ;;  %v10622_v12 = vpack.c.bf16 %v3378_v46, %v3366_v32  ;;  %v10646_v25 = vpack.c.bf16 %v3993_v37, %v3981_v40 }
 0x247   : > { %10637 = vmatpush1.bf16.msra.mxu1 %v10636_v0  ;;  %3393 = vmatprep.subr.mxu0 %v3392_v16  ;;  %v10624_v41 = vpack.c.bf16 %v3384_v38, %v3372_v19  ;;  %v10648_v6 = vpack.c.bf16 %v3999_v63, %v3987_v4  ;;  %v3398_v7 = vand.u32 4294901760, %v3397_v54  ;;  %v4013_v24 = vand.u32 4294901760, %v4012_v14 }
 0x248   : > { %4008 = vmatprep.subr.mxu1 %v4007_v20  ;;  %3967 = vmatprep.mubr.f32.mxu1 %v14407_v48 }
 0x249   : > { %3358 = vmatmul.mubr.f32.gmra.mrb[16].mxu0 %v12954_v29 }
 0x24a   : > { %3399 = vmatpush1.msra.mxu0 %v3398_v7  ;;  %3973 = vmatmul.mubr.f32.gmra.mrb[16].mxu1 %v12954_v29 }
 0x24b   : > { %4014 = vmatpush1.msra.mxu1 %v4013_v24  ;;  %10615 = vmatprep.subr.bf16.mxu0 %v10614_v53 }
 0x24c   : > { %10639 = vmatprep.subr.bf16.mxu1 %v10638_v44  ;;  %3458 = vmatprep.mubr.f32.mxu0 %v14407_v48 }
 0x24d   : > { %4073 = vmatprep.mubr.f32.mxu1 %v14407_v48  ;;  %3460 = vmatmul.mubr.f32.vlgmr.msra.gmra.mrb[12].mxu0 %v12897_v23 }
 0x24e   : > { %10617 = vmatpush1.bf16.msra.mxu0 %v10616_v56  ;;  %4075 = vmatmul.mubr.f32.vlgmr.msra.gmra.mrb[12].mxu1 %v12897_v23 }
 0x24f   : > { %10641 = vmatpush1.bf16.msra.mxu1 %v10640_v17  ;;  %3494 = vmatprep.subr.mxu0 %v13017_v15 }
 0x250   : > { %4109 = vmatprep.subr.mxu1 %v13023_v35  ;;  %3465 = vmatprep.mubr.f32.mxu0 %v14407_v48 }
 0x251   : > { %4080 = vmatprep.mubr.f32.mxu1 %v14407_v48  ;;  %3467 = vmatmul.mubr.f32.gmra.mrb[14].mxu0 %v12899_v55 }
 0x252   : > { %3497 = vmatpush1.msra.mxu0 %v12994_v57  ;;  %4082 = vmatmul.mubr.f32.gmra.mrb[14].mxu1 %v12899_v55 }
 0x253   : > { %4112 = vmatpush1.msra.mxu1 %v13008_v51  ;;  %10619 = vmatprep.subr.bf16.mxu0 %v12962_v10 }
 0x254   : > { %10643 = vmatprep.subr.bf16.mxu1 %v12977_v45  ;;  %3472 = vmatprep.mubr.f32.mxu0 %v14407_v48 }
 0x255   : > { %4087 = vmatprep.mubr.f32.mxu1 %v14407_v48  ;;  %3474 = vmatmul.mubr.f32.gmra.mrb[16].mxu0 %v12902_v34 }
 0x256   : > { %4089 = vmatmul.mubr.f32.gmra.mrb[16].mxu1 %v12902_v34  ;;  %3556 = vmatprep.mubr.f32.mxu0 %v14407_v48 }
 0x257   : > { %4171 = vmatprep.mubr.f32.mxu1 %v14407_v48 }
 0x259   : > { %3559 = vmatmul.mubr.f32.vlgmr.msra.gmra.mrb[12].mxu0 %v12910_v58 }
 0x25a   : > { %10621 = vmatpush1.bf16.msra.mxu0 %v12956_v61  ;;  %4174 = vmatmul.mubr.f32.vlgmr.msra.gmra.mrb[12].mxu1 %v12910_v58 }
 0x25b   : > { %10645 = vmatpush1.bf16.msra.mxu1 %v12969_v11  ;;  %3590 = vmatprep.subr.mxu0 %v12987_v30 }
 0x25c   : > { %4205 = vmatprep.subr.mxu1 %v13003_v13  ;;  %3564 = vmatprep.mubr.f32.mxu0 %v14407_v48 }
 0x25d   : > { %4179 = vmatprep.mubr.f32.mxu1 %v14407_v48  ;;  %3567 = vmatmul.mubr.f32.gmra.mrb[14].mxu0 %v12913_v49 }
 0x25e   : > { %3592 = vmatpush1.msra.mxu0 %v12982_v47  ;;  %4182 = vmatmul.mubr.f32.gmra.mrb[14].mxu1 %v12913_v49 }
 0x25f   : > { %4207 = vmatpush1.msra.mxu1 %v12996_v18  ;;  %10623 = vmatprep.subr.bf16.mxu0 %v10622_v12 }
 0x260   : > { %10647 = vmatprep.subr.bf16.mxu1 %v10646_v25  ;;  %3572 = vmatprep.mubr.f32.mxu0 %v14407_v48 }
 0x261   : > { %4187 = vmatprep.mubr.f32.mxu1 %v14407_v48  ;;  %3575 = vmatmul.mubr.f32.gmra.mrb[16].mxu0 %v12917_v26 }
 0x262   : > { %4190 = vmatmul.mubr.f32.gmra.mrb[16].mxu1 %v12917_v26  ;;  %3651 = vmatprep.mubr.f32.mxu0 %v14407_v48 }
 0x263   : > { %4266 = vmatprep.mubr.f32.mxu1 %v14407_v48 }
 0x265   : > { %3655 = vmatmul.mubr.f32.vlgmr.msra.gmra.mrb[12].mxu0 %v12925_v62 }
 0x266   : > { %10625 = vmatpush1.bf16.msra.mxu0 %v10624_v41  ;;  %4270 = vmatmul.mubr.f32.vlgmr.msra.gmra.mrb[12].mxu1 %v12925_v62 }
 0x267   : > { %10649 = vmatpush1.bf16.msra.mxu1 %v10648_v6  ;;  %3698 = vmatprep.subr.mxu0 %v3390_v50 }
 0x268   : > { %4313 = vmatprep.subr.mxu1 %v4005_v33  ;;  %3660 = vmatprep.mubr.f32.mxu0 %v14407_v48 }
 0x269   : > { %4275 = vmatprep.mubr.f32.mxu1 %v14407_v48  ;;  %3664 = vmatmul.mubr.f32.gmra.mrb[14].mxu0 %v12929_v3 }
 0x26a   : > { %3702 = vmatpush1.msra.mxu0 %v3396_v31  ;;  %4279 = vmatmul.mubr.f32.gmra.mrb[14].mxu1 %v12929_v3 }
 0x26b   : > { %4317 = vmatpush1.msra.mxu1 %v4011_v43  ;;  %10627 = vmatprep.subr.bf16.mxu0 %v12962_v10  ;;  %v2553_v60 = vpop.f32.mrb[6].mxu0 }
 0x26c   : > { %10651 = vmatprep.subr.bf16.mxu1 %v12977_v45  ;;  %v10906_v59 = vadd.f32 %v2553_v60, %v12894_v21  ;;  %3669 = vmatprep.mubr.f32.mxu0 %v14407_v48  ;;  %v2555_v19 = vpop.f32.mrb[7].mxu0 }
 0x26d   : > { %v3168_v1 = vpop.f32.mrb[6].mxu1  ;;  %4284 = vmatprep.mubr.f32.mxu1 %v14407_v48  ;;  %v10907_v32 = vadd.f32 %v2555_v19, %v12894_v21  ;;  %3673 = vmatmul.mubr.f32.gmra.mrb[16].mxu0 %v12933_v52 }
 0x26e   : > { %11521 = vtanh.f32 %v10906_v59  ;;  %v10912_v5 = vadd.f32 %v3168_v1, %v12894_v21  ;;  %v3170_v40 = vpop.f32.mrb[7].mxu1  ;;  %4288 = vmatmul.mubr.f32.gmra.mrb[16].mxu1 %v12933_v52  ;;  %3761 = vmatprep.mubr.f32.mxu0 %v14407_v48 }
 0x26f   : > { %11523 = vtanh.f32 %v10907_v32  ;;  %v10913_v10 = vadd.f32 %v3170_v40, %v12894_v21  ;;  %v2560_v45 = vpop.f32.mrb[8].mxu0  ;;  %4376 = vmatprep.mubr.f32.mxu1 %v14407_v48 }
 0x270   : > { %11525 = vtanh.f32 %v10912_v5  ;;  %v10908_v22 = vadd.f32 %v2560_v45, %v12905_v39  ;;  %v2562_v46 = vpop.f32.mrb[9].mxu0 }
 0x271   : > { %11527 = vtanh.f32 %v10913_v10  ;;  %v3175_v57 = vpop.f32.mrb[8].mxu1  ;;  %v10909_v37 = vadd.f32 %v2562_v46, %v12905_v39  ;;  %3763 = vmatmul.mubr.f32.vlgmr.msra.gmra.mrb[12].mxu0 %v12897_v23 }
 0x272   : > { %11529 = vtanh.f32 %v10908_v22  ;;  %v10914_v51 = vadd.f32 %v3175_v57, %v12905_v39  ;;  %v3177_v38 = vpop.f32.mrb[9].mxu1  ;;  %10629 = vmatpush1.bf16.msra.mxu0 %v12956_v61  ;;  %4378 = vmatmul.mubr.f32.vlgmr.msra.gmra.mrb[12].mxu1 %v12897_v23 }
 0x273   : > { %11531 = vtanh.f32 %v10909_v37  ;;  %v10915_v21 = vadd.f32 %v3177_v38, %v12905_v39  ;;  %10653 = vmatpush1.bf16.msra.mxu1 %v12969_v11  ;;  %3792 = vmatprep.subr.mxu0 %v12987_v30  ;;  %v2567_v4 = vpop.f32.mrb[10].mxu0 }
 0x274   : > { %11533 = vtanh.f32 %v10914_v51  ;;  %4407 = vmatprep.subr.mxu1 %v13003_v13  ;;  %v10910_v63 = vadd.f32 %v2567_v4, %v12920_v27  ;;  %3768 = vmatprep.mubr.f32.mxu0 %v14407_v48  ;;  %v2569_v15 = vpop.f32.mrb[11].mxu0 }
 0x275   : > { %11535 = vtanh.f32 %v10915_v21  ;;  %v3182_v61 = vpop.f32.mrb[10].mxu1  ;;  %4383 = vmatprep.mubr.f32.mxu1 %v14407_v48  ;;  %v10911_v35 = vadd.f32 %v2569_v15, %v12920_v27  ;;  %3770 = vmatmul.mubr.f32.gmra.mrb[14].mxu0 %v12899_v55 }
 0x276   : > { %11537 = vtanh.f32 %v10910_v63  ;;  %v10916_v39 = vadd.f32 %v3182_v61, %v12920_v27  ;;  %v3184_v11 = vpop.f32.mrb[11].mxu1  ;;  %3794 = vmatpush1.msra.mxu0 %v12982_v47  ;;  %4385 = vmatmul.mubr.f32.gmra.mrb[14].mxu1 %v12899_v55 }
 0x277   : > { %11539 = vtanh.f32 %v10911_v35  ;;  %v10917_v30 = vadd.f32 %v3184_v11, %v12920_v27  ;;  %4409 = vmatpush1.msra.mxu1 %v12996_v18  ;;  %3775 = vmatprep.mubr.f32.mxu0 %v14407_v48 }
 0x278   : > { %v11522_v13 = vpop.eup %11521  ;;  %11541 = vtanh.f32 %v10916_v39  ;;  %4390 = vmatprep.mubr.f32.mxu1 %v14407_v48 }
 0x279   : > { %v11524_v31 = vpop.eup %11523  ;;  %11543 = vtanh.f32 %v10917_v30  ;;  %3777 = vmatmul.mubr.f32.gmra.mrb[16].mxu0 %v12902_v34  ;;  %v4492_v50 = vand.u32 4294901760, %v11522_v13 }
 0x27a   : > { %v11526_v33 = vpop.eup %11525  ;;  %4392 = vmatmul.mubr.f32.gmra.mrb[16].mxu1 %v12902_v34  ;;  %3853 = vmatprep.mubr.f32.mxu0 %v14407_v48  ;;  %v4490_v47 = vand.u32 4294901760, %v11524_v31 }
 0x27b   : > { %v11528_v27 = vpop.eup %11527  ;;  %4468 = vmatprep.mubr.f32.mxu1 %v14407_v48  ;;  %v13156_v18 = vsub.f32 %v11522_v13, %v4492_v50  ;;  %v5107_v9 = vand.u32 4294901760, %v11526_v33 }
 0x27c   : > { %v11530_v36 = vpop.eup %11529  ;;  %v13158_v43 = vsub.f32 %v11524_v31, %v4490_v47  ;;  %v5105_v28 = vand.u32 4294901760, %v11528_v27 }
 0x27d   : > { %v11532_v8 = vpop.eup %11531  ;;  %3855 = vmatmul.mubr.f32.vlgmr.msra.gmra.mrb[12].mxu0 %v12897_v23  ;;  %v4496_v54 = vand.u32 4294901760, %v11530_v36  ;;  %v4602_v53 = vand.u32 4294901760, %v13156_v18  ;;  %v13172_v25 = vsub.f32 %v11526_v33, %v5107_v9 }
 0x27e   : > { %v11534_v0 = vpop.eup %11533  ;;  %4470 = vmatmul.mubr.f32.vlgmr.msra.gmra.mrb[12].mxu1 %v12897_v23  ;;  %3860 = vmatprep.mubr.f32.mxu0 %v14407_v48  ;;  %v4494_v16 = vand.u32 4294901760, %v11532_v8  ;;  %v13164_v14 = vsub.f32 %v11528_v27, %v5105_v28  ;;  %v4596_v44 = vand.u32 4294901760, %v13158_v43 }
 0x27f   : > { %v11536_v20 = vpop.eup %11535  ;;  %4475 = vmatprep.mubr.f32.mxu1 %v14407_v48  ;;  %v13168_v56 = vpack.c.bf16 %v4496_v54, %v4492_v50  ;;  %v13170_v17 = vsub.f32 %v11530_v36, %v4496_v54  ;;  %v5111_v12 = vand.u32 4294901760, %v11534_v0  ;;  %v13181_v60 = vsub.f32 %v13156_v18, %v4602_v53 }
 0x280   : > { %v11538_v41 = vpop.eup %11537  ;;  %v13174_v6 = vpack.c.bf16 %v4494_v16, %v4490_v47  ;;  %v13176_v7 = vsub.f32 %v11532_v8, %v4494_v16  ;;  %v5109_v24 = vand.u32 4294901760, %v11536_v20  ;;  %v4597_v32 = vsub.f32 %v13158_v43, %v4596_v44 }
 0x281   : > { %v11540_v59 = vpop.eup %11539  ;;  %3862 = vmatmul.mubr.f32.gmra.mrb[14].mxu0 %v12899_v55  ;;  %v13184_v19 = vpack.c.bf16 %v5111_v12, %v5107_v9  ;;  %v3249_v1 = vsel %vm702_vm1, %v11538_v41, 0  ;;  %v5211_v5 = vand.u32 4294901760, %v13164_v14  ;;  %v13202_v37 = vsub.f32 %v11534_v0, %v5111_v12 }
 0x282   : > { %v11542_v40 = vpop.eup %11541  ;;  %4477 = vmatmul.mubr.f32.gmra.mrb[14].mxu1 %v12899_v55  ;;  %10655 = vmatprep.subr.bf16.mxu0 %v13174_v6  ;;  %v13193_v10 = vpack.c.bf16 %v5109_v24, %v5105_v28  ;;  %v13195_v45 = vsub.f32 %v11536_v20, %v5109_v24  ;;  %v3252_v22 = vsel %vm702_vm1, %v11540_v59, 0  ;;  %v13198_v46 = vand.u32 4294901760, %v3249_v1 }
 0x283   : > { %v11544_v57 = vpop.eup %11543  ;;  %3867 = vmatprep.mubr.f32.mxu0 %v14407_v48  ;;  %4482 = vmatprep.mubr.f32.mxu1 %v14407_v48  ;;  %v13204_v51 = vand.u32 4294901760, %v3252_v22  ;;  %v3255_v38 = vsel %vm702_vm1, %v11542_v40, 0  ;;  %v4608_v21 = vand.u32 4294901760, %v13176_v7  ;;  %v5212_v61 = vsub.f32 %v13164_v14, %v5211_v5 }
 0x284   : > { %10679 = vmatprep.subr.bf16.mxu1 %v13193_v10  ;;  %10657 = vmatpush1.bf16.msra.mxu0 %v13168_v56  ;;  %v3258_v4 = vsel %vm702_vm1, %v11544_v57, 0  ;;  %v13212_v63 = vsub.f32 %v3249_v1, %v13198_v46  ;;  %v13214_v15 = vand.u32 4294901760, %v3255_v38  ;;  %v4598_v39 = vand.u32 4294901760, %v4597_v32 }
 0x285   : > { %10681 = vmatpush1.bf16.msra.mxu1 %v13184_v19  ;;  %3869 = vmatmul.mubr.f32.gmra.mrb[16].mxu0 %v12902_v34  ;;  %v13221_v35 = vand.u32 4294901760, %v3258_v4  ;;  %v4609_v11 = vsub.f32 %v13176_v7, %v4608_v21  ;;  %v5223_v30 = vand.u32 4294901760, %v13195_v45  ;;  %v5213_v31 = vand.u32 4294901760, %v5212_v61 }
 0x286   : > { %4484 = vmatmul.mubr.f32.gmra.mrb[16].mxu1 %v12902_v34  ;;  %4499 = vmatprep.subr.mxu0 %v13204_v51  ;;  %v13230_v13 = vsub.f32 %v3255_v38, %v13214_v15  ;;  %v4614_v50 = vand.u32 4294901760, %v13170_v17  ;;  %v5217_v33 = vand.u32 4294901760, %v13172_v25  ;;  %v5229_v9 = vand.u32 4294901760, %v13202_v37 }
 0x287   : > { %5114 = vmatprep.subr.mxu1 %v13221_v35  ;;  %4560 = vmatprep.mubr.f32.mxu0 %v14407_v48  ;;  %v4610_v47 = vand.u32 4294901760, %v4609_v11  ;;  %v5224_v27 = vsub.f32 %v13195_v45, %v5223_v30  ;;  %v13239_v36 = vsub.f32 %v3252_v22, %v13204_v51  ;;  %v13246_v54 = vsub.f32 %v3258_v4, %v13221_v35 }
 0x288   : > { %4501 = vmatpush1.msra.mxu0 %v13198_v46  ;;  %5175 = vmatprep.mubr.f32.mxu1 %v14407_v48  ;;  %v4615_v28 = vsub.f32 %v13170_v17, %v4614_v50  ;;  %v5218_v8 = vsub.f32 %v13172_v25, %v5217_v33  ;;  %v4626_v0 = vand.u32 4294901760, %v13212_v63  ;;  %v5230_v12 = vsub.f32 %v13202_v37, %v5229_v9 }
 0x289   : > { %5116 = vmatpush1.msra.mxu1 %v13214_v15  ;;  %4566 = vmatmul.mubr.f32.vlgmr.msra.gmra.mrb[18].mxu0 %v12946_v2  ;;  %v10658_v16 = vpack.c.bf16 %v4610_v47, %v4598_v39  ;;  %v5225_v20 = vand.u32 4294901760, %v5224_v27  ;;  %v4620_v41 = vand.u32 4294901760, %v13239_v36  ;;  %v4604_v24 = vand.u32 4294901760, %v13181_v60 }
 0x28a   : > { %5181 = vmatmul.mubr.f32.vlgmr.msra.gmra.mrb[18].mxu1 %v12946_v2  ;;  %4571 = vmatprep.mubr.f32.mxu0 %v14407_v48  ;;  %v4616_v59 = vand.u32 4294901760, %v4615_v28  ;;  %v5219_v1 = vand.u32 4294901760, %v5218_v8  ;;  %v5235_v32 = vand.u32 4294901760, %v13246_v54  ;;  %v5231_v22 = vand.u32 4294901760, %v5230_v12 }
 0x28b   : > { %10659 = vmatprep.subr.bf16.mxu0 %v10658_v16  ;;  %v10682_v40 = vpack.c.bf16 %v5225_v20, %v5213_v31  ;;  %5186 = vmatprep.mubr.f32.mxu1 %v14407_v48  ;;  %v4621_v57 = vsub.f32 %v13239_v36, %v4620_v41  ;;  %v5241_v38 = vand.u32 4294901760, %v13230_v13  ;;  %v4627_v4 = vsub.f32 %v13212_v63, %v4626_v0 }
 0x28c   : > { %v10660_v2 = vpack.c.bf16 %v4616_v59, %v4604_v24  ;;  %v5236_v60 = vsub.f32 %v13246_v54, %v5235_v32  ;;  %v10662_v61 = vpack.c.bf16 %v13176_v7, %v13158_v43  ;;  %v10684_v39 = vpack.c.bf16 %v5231_v22, %v5219_v1 }
 0x28d   : > { %10683 = vmatprep.subr.bf16.mxu1 %v10682_v40  ;;  %4577 = vmatmul.mubr.f32.gmra.mrb[20].mxu0 %v12949_v42  ;;  %v4622_v11 = vand.u32 4294901760, %v4621_v57  ;;  %v5242_v31 = vsub.f32 %v13230_v13, %v5241_v38  ;;  %v10686_v47 = vpack.c.bf16 %v13195_v45, %v13164_v14  ;;  %v10664_v28 = vpack.c.bf16 %v13170_v17, %v13156_v18 }
 0x28e   : > { %10661 = vmatpush1.bf16.msra.mxu0 %v10660_v2  ;;  %5192 = vmatmul.mubr.f32.gmra.mrb[20].mxu1 %v12949_v42  ;;  %v5237_v27 = vand.u32 4294901760, %v5236_v60  ;;  %v10688_v8 = vpack.c.bf16 %v13202_v37, %v13172_v25  ;;  %v10670_v16 = vpack.c.bf16 %v4608_v21, %v4596_v44  ;;  %v10694_v45 = vpack.c.bf16 %v5223_v30, %v5211_v5 }
 0x28f   : > { %10685 = vmatpush1.bf16.msra.mxu1 %v10684_v39  ;;  %4623 = vmatprep.subr.mxu0 %v4622_v11  ;;  %v10672_v42 = vpack.c.bf16 %v4614_v50, %v4602_v53  ;;  %v10696_v20 = vpack.c.bf16 %v5229_v9, %v5217_v33  ;;  %v4628_v17 = vand.u32 4294901760, %v4627_v4  ;;  %v5243_v25 = vand.u32 4294901760, %v5242_v31 }
 0x290   : > { %5238 = vmatprep.subr.mxu1 %v5237_v27  ;;  %4582 = vmatprep.mubr.f32.mxu0 %v14407_v48 }
 0x291   : > { %5197 = vmatprep.mubr.f32.mxu1 %v14407_v48  ;;  %4588 = vmatmul.mubr.f32.gmra.mrb[22].mxu0 %v12954_v29 }
 0x292   : > { %4629 = vmatpush1.msra.mxu0 %v4628_v17  ;;  %5203 = vmatmul.mubr.f32.gmra.mrb[22].mxu1 %v12954_v29 }
 0x293   : > { %5244 = vmatpush1.msra.mxu1 %v5243_v25  ;;  %10663 = vmatprep.subr.bf16.mxu0 %v10662_v61 }
 0x294   : > { %10687 = vmatprep.subr.bf16.mxu1 %v10686_v47  ;;  %4688 = vmatprep.mubr.f32.mxu0 %v14407_v48 }
 0x295   : > { %5303 = vmatprep.mubr.f32.mxu1 %v14407_v48  ;;  %4690 = vmatmul.mubr.f32.vlgmr.msra.gmra.mrb[18].mxu0 %v12897_v23 }
 0x296   : > { %10665 = vmatpush1.bf16.msra.mxu0 %v10664_v28  ;;  %5305 = vmatmul.mubr.f32.vlgmr.msra.gmra.mrb[18].mxu1 %v12897_v23 }
 0x297   : > { %10689 = vmatpush1.bf16.msra.mxu1 %v10688_v8  ;;  %4724 = vmatprep.subr.mxu0 %v13239_v36 }
 0x298   : > { %5339 = vmatprep.subr.mxu1 %v13246_v54  ;;  %4695 = vmatprep.mubr.f32.mxu0 %v14407_v48 }
 0x299   : > { %5310 = vmatprep.mubr.f32.mxu1 %v14407_v48  ;;  %4697 = vmatmul.mubr.f32.gmra.mrb[20].mxu0 %v12899_v55 }
 0x29a   : > { %4727 = vmatpush1.msra.mxu0 %v13212_v63  ;;  %5312 = vmatmul.mubr.f32.gmra.mrb[20].mxu1 %v12899_v55 }
 0x29b   : > { %5342 = vmatpush1.msra.mxu1 %v13230_v13  ;;  %10667 = vmatprep.subr.bf16.mxu0 %v13174_v6 }
 0x29c   : > { %10691 = vmatprep.subr.bf16.mxu1 %v13193_v10  ;;  %4702 = vmatprep.mubr.f32.mxu0 %v14407_v48 }
 0x29d   : > { %5317 = vmatprep.mubr.f32.mxu1 %v14407_v48  ;;  %4704 = vmatmul.mubr.f32.gmra.mrb[22].mxu0 %v12902_v34 }
 0x29e   : > { %5319 = vmatmul.mubr.f32.gmra.mrb[22].mxu1 %v12902_v34  ;;  %4786 = vmatprep.mubr.f32.mxu0 %v14407_v48 }
 0x29f   : > { %5401 = vmatprep.mubr.f32.mxu1 %v14407_v48 }
 0x2a1   : > { %4789 = vmatmul.mubr.f32.vlgmr.msra.gmra.mrb[18].mxu0 %v12910_v58 }
 0x2a2   : > { %10669 = vmatpush1.bf16.msra.mxu0 %v13168_v56  ;;  %5404 = vmatmul.mubr.f32.vlgmr.msra.gmra.mrb[18].mxu1 %v12910_v58 }
 0x2a3   : > { %10693 = vmatpush1.bf16.msra.mxu1 %v13184_v19  ;;  %4820 = vmatprep.subr.mxu0 %v13204_v51 }
 0x2a4   : > { %5435 = vmatprep.subr.mxu1 %v13221_v35  ;;  %4794 = vmatprep.mubr.f32.mxu0 %v14407_v48 }
 0x2a5   : > { %5409 = vmatprep.mubr.f32.mxu1 %v14407_v48  ;;  %4797 = vmatmul.mubr.f32.gmra.mrb[20].mxu0 %v12913_v49 }
 0x2a6   : > { %4822 = vmatpush1.msra.mxu0 %v13198_v46  ;;  %5412 = vmatmul.mubr.f32.gmra.mrb[20].mxu1 %v12913_v49  ;;  %v11642_v49 = vld [vmem:[#allocation5 + $0x30] sm:$0xff] }
 0x2a7   : > { %5437 = vmatpush1.msra.mxu1 %v13214_v15  ;;  %10671 = vmatprep.subr.bf16.mxu0 %v10670_v16 }
 0x2a8   : > { %10695 = vmatprep.subr.bf16.mxu1 %v10694_v45  ;;  %4802 = vmatprep.mubr.f32.mxu0 %v14407_v48 }
 0x2a9   : > { %5417 = vmatprep.mubr.f32.mxu1 %v14407_v48  ;;  %4805 = vmatmul.mubr.f32.gmra.mrb[22].mxu0 %v12917_v26 }
 0x2aa   : > { %5420 = vmatmul.mubr.f32.gmra.mrb[22].mxu1 %v12917_v26  ;;  %4881 = vmatprep.mubr.f32.mxu0 %v14407_v48  ;;  %v5763_v26 = vsel %vm695_vm0, %v11642_v49, 0 }
 0x2ab   : > { %5496 = vmatprep.mubr.f32.mxu1 %v14407_v48  ;;  %v13390_v18 = vand.u32 4294901760, %v5763_v26 }
 0x2ad   : > { %4885 = vmatmul.mubr.f32.vlgmr.msra.gmra.mrb[18].mxu0 %v12925_v62 }
 0x2ae   : > { %10673 = vmatpush1.bf16.msra.mxu0 %v10672_v42  ;;  %5500 = vmatmul.mubr.f32.vlgmr.msra.gmra.mrb[18].mxu1 %v12925_v62  ;;  %v11643_v62 = vld [vmem:[#allocation5 + $0x40] sm:$0xf] }
 0x2af   : > { %10697 = vmatpush1.bf16.msra.mxu1 %v10696_v20  ;;  %4928 = vmatprep.subr.mxu0 %v4620_v41 }
 0x2b0   : > { %5543 = vmatprep.subr.mxu1 %v5235_v32  ;;  %4890 = vmatprep.mubr.f32.mxu0 %v14407_v48 }
 0x2b1   : > { %5505 = vmatprep.mubr.f32.mxu1 %v14407_v48  ;;  %4894 = vmatmul.mubr.f32.gmra.mrb[20].mxu0 %v12929_v3 }
 0x2b2   : > { %4932 = vmatpush1.msra.mxu0 %v4626_v0  ;;  %5509 = vmatmul.mubr.f32.gmra.mrb[20].mxu1 %v12929_v3  ;;  %v13386_v3 = vpop.permute.xlu1 %3217 }
 0x2b3   : > { %5547 = vmatpush1.msra.mxu1 %v5241_v38  ;;  %10675 = vmatprep.subr.bf16.mxu0 %v13174_v6 }
 0x2b4   : > { %10699 = vmatprep.subr.bf16.mxu1 %v13193_v10  ;;  %4899 = vmatprep.mubr.f32.mxu0 %v14407_v48 }
 0x2b5   : > { %5514 = vmatprep.mubr.f32.mxu1 %v14407_v48  ;;  %4903 = vmatmul.mubr.f32.gmra.mrb[22].mxu0 %v12933_v52 }
 0x2b6   : > { %5518 = vmatmul.mubr.f32.gmra.mrb[22].mxu1 %v12933_v52  ;;  %4991 = vmatprep.mubr.f32.mxu0 %v14407_v48  ;;  %v13413_v50 = vpop.permute.xlu1 %3227 }
 0x2b7   : > { %5606 = vmatprep.mubr.f32.mxu1 %v14407_v48 }
 0x2b9   : > { %4993 = vmatmul.mubr.f32.vlgmr.msra.gmra.mrb[18].mxu0 %v12897_v23 }
 0x2ba   : > { %10677 = vmatpush1.bf16.msra.mxu0 %v13168_v56  ;;  %5608 = vmatmul.mubr.f32.vlgmr.msra.gmra.mrb[18].mxu1 %v12897_v23 }
 0x2bb   : > { %10701 = vmatpush1.bf16.msra.mxu1 %v13184_v19  ;;  %5022 = vmatprep.subr.mxu0 %v13204_v51  ;;  %v13398_v19 = vpop.permute.xlu0 %3222 }
 0x2bc   : > { %5637 = vmatprep.subr.mxu1 %v13221_v35  ;;  %4998 = vmatprep.mubr.f32.mxu0 %v14407_v48 }
 0x2bd   : > { %5613 = vmatprep.mubr.f32.mxu1 %v14407_v48  ;;  %5000 = vmatmul.mubr.f32.gmra.mrb[20].mxu0 %v12899_v55 }
 0x2be   : > { %5024 = vmatpush1.msra.mxu0 %v13198_v46  ;;  %5615 = vmatmul.mubr.f32.gmra.mrb[20].mxu1 %v12899_v55  ;;  %v13404_v46 = vsub.f32 %v5763_v26, %v13390_v18 }
 0x2bf   : > { %5639 = vmatpush1.msra.mxu1 %v13214_v15  ;;  %5005 = vmatprep.mubr.f32.mxu0 %v14407_v48 }
 0x2c0   : > { %5620 = vmatprep.mubr.f32.mxu1 %v14407_v48  ;;  %v13416_v9 = vand.u32 4294901760, %v13404_v46 }
 0x2c1   : > { %5007 = vmatmul.mubr.f32.gmra.mrb[22].mxu0 %v12902_v34 }
 0x2c2   : > { %5622 = vmatmul.mubr.f32.gmra.mrb[22].mxu1 %v12902_v34  ;;  %5083 = vmatprep.mubr.f32.mxu0 %v14407_v48  ;;  %v5867_v22 = vsub.f32 %v13404_v46, %v13416_v9 }
 0x2c3   : > { %5698 = vmatprep.mubr.f32.mxu1 %v14407_v48 }
 0x2c4   : > { %v13438_v8 = vand.u32 4294901760, %v5867_v22 }
 0x2c5   : > { %5085 = vmatmul.mubr.f32.vlgmr.msra.gmra.mrb[18].mxu0 %v12897_v23 }
 0x2c6   : > { %5700 = vmatmul.mubr.f32.vlgmr.msra.gmra.mrb[18].mxu1 %v12897_v23  ;;  %5090 = vmatprep.mubr.f32.mxu0 %v14407_v48  ;;  %v11641_v23 = vld [vmem:[#allocation5 + $0x38] sm:$0xff] }
 0x2c7   : > { %5705 = vmatprep.mubr.f32.mxu1 %v14407_v48  ;;  %v5765_v58 = vsel %vm695_vm0, %v11641_v23, 0 }
 0x2c8   : > { %v13388_v29 = vand.u32 4294901760, %v5765_v58 }
 0x2c9   : > { %5092 = vmatmul.mubr.f32.gmra.mrb[20].mxu0 %v12899_v55 }
 0x2ca   : > { %5707 = vmatmul.mubr.f32.gmra.mrb[20].mxu1 %v12899_v55  ;;  %5097 = vmatprep.mubr.f32.mxu0 %v14407_v48  ;;  %v5767_v55 = vsel %vm695_vm0, %v11643_v62, 0  ;;  %v13401_v10 = vsub.f32 %v5765_v58, %v13388_v29 }
 0x2cb   : > { %5712 = vmatprep.mubr.f32.mxu1 %v14407_v48  ;;  %v13393_v14 = vand.u32 4294901760, %v5767_v55 }
 0x2cc   : > { %v13420_v12 = vand.u32 4294901760, %v13401_v10 }
 0x2cd   : > { %5099 = vmatmul.mubr.f32.gmra.mrb[22].mxu0 %v12902_v34  ;;  %v13408_v63 = vsub.f32 %v5767_v55, %v13393_v14 }
 0x2ce   : > { %5714 = vmatmul.mubr.f32.gmra.mrb[22].mxu1 %v12902_v34  ;;  %5863 = vmatprep.mubr.f32.mxu0 %v14407_v48  ;;  %v5878_v2 = vsub.f32 %v13401_v10, %v13420_v12 }
 0x2cf   : > { %6478 = vmatprep.mubr.f32.mxu1 %v14407_v48  ;;  %v13425_v1 = vand.u32 4294901760, %v13408_v63 }
 0x2d0   : > { %v13442_v20 = vand.u32 4294901760, %v5878_v2 }
 0x2d1   : > { %v5889_v60 = vsub.f32 %v13408_v63, %v13425_v1 }
 0x2d3   : > { %v13444_v17 = vand.u32 4294901760, %v5889_v60 }
 0x350   : > { %v3856_v52 = vpop.f32.mrb[12].mxu0 }
 0x351   : > { %v10918_v34 = vadd.f32 %v3856_v52, %v13386_v3  ;;  %v4471_v43 = vpop.f32.mrb[12].mxu1  ;;  %v3858_v53 = vpop.f32.mrb[13].mxu0 }
 0x352   : > { %v10924_v44 = vadd.f32 %v4471_v43, %v13386_v3  ;;  %v10919_v56 = vadd.f32 %v3858_v53, %v13386_v3  ;;  %v4473_v6 = vpop.f32.mrb[13].mxu1 }
 0x353   : > { %11545 = vtanh.f32 %v10918_v34  ;;  %v10925_v7 = vadd.f32 %v4473_v6, %v13386_v3 }
 0x354   : > { %11547 = vtanh.f32 %v10924_v44  ;;  %v3863_v5 = vpop.f32.mrb[14].mxu0 }
 0x355   : > { %11549 = vtanh.f32 %v10919_v56  ;;  %v10920_v37 = vadd.f32 %v3863_v5, %v13398_v19  ;;  %v4478_v51 = vpop.f32.mrb[14].mxu1  ;;  %v3865_v21 = vpop.f32.mrb[15].mxu0 }
 0x356   : > { %11551 = vtanh.f32 %v10925_v7  ;;  %v10926_v15 = vadd.f32 %v4478_v51, %v13398_v19  ;;  %v10921_v35 = vadd.f32 %v3865_v21, %v13398_v19  ;;  %v4480_v30 = vpop.f32.mrb[15].mxu1 }
 0x357   : > { %11553 = vtanh.f32 %v10920_v37  ;;  %v10927_v13 = vadd.f32 %v4480_v30, %v13398_v19 }
 0x358   : > { %11555 = vtanh.f32 %v10926_v15  ;;  %v3870_v33 = vpop.f32.mrb[16].mxu0 }
 0x359   : > { %11557 = vtanh.f32 %v10921_v35  ;;  %v10922_v36 = vadd.f32 %v3870_v33, %v13413_v50  ;;  %v4485_v54 = vpop.f32.mrb[16].mxu1  ;;  %v3872_v0 = vpop.f32.mrb[17].mxu0 }
 0x35a   : > { %11559 = vtanh.f32 %v10927_v13  ;;  %v10928_v41 = vadd.f32 %v4485_v54, %v13413_v50  ;;  %v10923_v24 = vadd.f32 %v3872_v0, %v13413_v50  ;;  %v4487_v59 = vpop.f32.mrb[17].mxu1 }
 0x35b   : > { %11561 = vtanh.f32 %v10922_v36  ;;  %v10929_v32 = vadd.f32 %v4487_v59, %v13413_v50 }
 0x35c   : > { %11563 = vtanh.f32 %v10928_v41 }
 0x35d   : > { %v11546_v40 = vpop.eup %11545  ;;  %11565 = vtanh.f32 %v10923_v24 }
 0x35e   : > { %v11548_v57 = vpop.eup %11547  ;;  %11567 = vtanh.f32 %v10929_v32  ;;  %v5795_v38 = vand.u32 4294901760, %v11546_v40 }
 0x35f   : > { %v11550_v4 = vpop.eup %11549  ;;  %v6410_v61 = vand.u32 4294901760, %v11548_v57 }
 0x360   : > { %v11552_v39 = vpop.eup %11551  ;;  %v5793_v11 = vand.u32 4294901760, %v11550_v4  ;;  %v13434_v31 = vsub.f32 %v11546_v40, %v5795_v38 }
 0x361   : > { %v11554_v47 = vpop.eup %11553  ;;  %v6408_v27 = vand.u32 4294901760, %v11552_v39  ;;  %v13436_v28 = vsub.f32 %v11548_v57, %v6410_v61 }
 0x362   : > { %v11556_v16 = vpop.eup %11555  ;;  %v13440_v45 = vsub.f32 %v11550_v4, %v5793_v11  ;;  %v5799_v42 = vand.u32 4294901760, %v11554_v47  ;;  %v5905_v49 = vand.u32 4294901760, %v13434_v31 }
 0x363   : > { %v11558_v25 = vpop.eup %11557  ;;  %v13446_v23 = vsub.f32 %v11552_v39, %v6408_v27  ;;  %v6414_v58 = vand.u32 4294901760, %v11556_v16  ;;  %v6520_v26 = vand.u32 4294901760, %v13436_v28 }
 0x364   : > { %v11560_v62 = vpop.eup %11559  ;;  %v5797_v55 = vand.u32 4294901760, %v11558_v25  ;;  %v13450_v52 = vpack.c.bf16 %v5799_v42, %v5795_v38  ;;  %v13452_v34 = vsub.f32 %v11554_v47, %v5799_v42  ;;  %v5899_v43 = vand.u32 4294901760, %v13440_v45 }
 0x365   : > { %v11562_v53 = vpop.eup %11561  ;;  %v6412_v44 = vand.u32 4294901760, %v11560_v62  ;;  %v13455_v56 = vpack.c.bf16 %v6414_v58, %v6410_v61  ;;  %v13457_v6 = vsub.f32 %v11556_v16, %v6414_v58  ;;  %v6514_v7 = vand.u32 4294901760, %v13446_v23 }
 0x366   : > { %v11564_v5 = vpop.eup %11563  ;;  %v13460_v37 = vpack.c.bf16 %v5797_v55, %v5793_v11  ;;  %v13462_v51 = vsub.f32 %v11558_v25, %v5797_v55  ;;  %v5770_v21 = vsel %vm702_vm1, %v11562_v53, 0  ;;  %v5900_v15 = vsub.f32 %v13440_v45, %v5899_v43 }
 0x367   : > { %v11566_v35 = vpop.eup %11565  ;;  %v13468_v30 = vpack.c.bf16 %v6412_v44, %v6408_v27  ;;  %v13470_v13 = vsub.f32 %v11560_v62, %v6412_v44  ;;  %v13472_v33 = vand.u32 4294901760, %v5770_v21  ;;  %v5776_v36 = vsel %vm702_vm1, %v11564_v5, 0 }
 0x368   : > { %v11568_v54 = vpop.eup %11567  ;;  %10703 = vmatprep.subr.bf16.mxu0 %v13460_v37  ;;  %v5773_v0 = vsel %vm702_vm1, %v11566_v35, 0  ;;  %v13477_v41 = vand.u32 4294901760, %v5776_v36  ;;  %v5901_v24 = vand.u32 4294901760, %v5900_v15  ;;  %v5911_v59 = vand.u32 4294901760, %v13462_v51 }
 0x369   : > { %10727 = vmatprep.subr.bf16.mxu1 %v13468_v30  ;;  %10705 = vmatpush1.bf16.msra.mxu0 %v13450_v52  ;;  %v13482_v32 = vand.u32 4294901760, %v5773_v0  ;;  %v5779_v40 = vsel %vm702_vm1, %v11568_v54, 0  ;;  %v13486_v22 = vsub.f32 %v5770_v21, %v13472_v33  ;;  %v6515_v57 = vsub.f32 %v13446_v23, %v6514_v7 }
 0x36a   : > { %10729 = vmatpush1.bf16.msra.mxu1 %v13455_v56  ;;  %v13492_v38 = vand.u32 4294901760, %v5779_v40  ;;  %v13495_v2 = vsub.f32 %v5776_v36, %v13477_v41  ;;  %v5912_v60 = vsub.f32 %v13462_v51, %v5911_v59  ;;  %v6526_v4 = vand.u32 4294901760, %v13470_v13 }
 0x36b   : > { %5802 = vmatprep.subr.mxu0 %v13482_v32  ;;  %v6516_v61 = vand.u32 4294901760, %v6515_v57  ;;  %v5906_v39 = vsub.f32 %v13434_v31, %v5905_v49  ;;  %v5917_v11 = vand.u32 4294901760, %v13452_v34  ;;  %v6521_v47 = vsub.f32 %v13436_v28, %v6520_v26 }
 0x36c   : > { %6417 = vmatprep.subr.mxu1 %v13492_v38  ;;  %v5913_v27 = vand.u32 4294901760, %v5912_v60  ;;  %v6527_v16 = vsub.f32 %v13470_v13, %v6526_v4  ;;  %v6532_v42 = vand.u32 4294901760, %v13457_v6  ;;  %v13511_v25 = vsub.f32 %v5773_v0, %v13482_v32 }
 0x36d   : > { %5804 = vmatpush1.msra.mxu0 %v13472_v33  ;;  %v5907_v58 = vand.u32 4294901760, %v5906_v39  ;;  %v5918_v62 = vsub.f32 %v13452_v34, %v5917_v11  ;;  %v6522_v55 = vand.u32 4294901760, %v6521_v47  ;;  %v13516_v53 = vsub.f32 %v5779_v40, %v13492_v38 }
 0x36e   : > { %6419 = vmatpush1.msra.mxu1 %v13477_v41  ;;  %5869 = vmatmul.mubr.f32.vlgmr.msra.gmra.mrb[24].mxu0 %v13438_v8  ;;  %v10706_v44 = vpack.c.bf16 %v5913_v27, %v5901_v24  ;;  %v6528_v5 = vand.u32 4294901760, %v6527_v16  ;;  %v6533_v21 = vsub.f32 %v13457_v6, %v6532_v42  ;;  %v5923_v15 = vand.u32 4294901760, %v13511_v25 }
 0x36f   : > { %6484 = vmatmul.mubr.f32.vlgmr.msra.gmra.mrb[24].mxu1 %v13438_v8  ;;  %5874 = vmatprep.mubr.f32.mxu0 %v14407_v48  ;;  %v5919_v35 = vand.u32 4294901760, %v5918_v62  ;;  %v6538_v36 = vand.u32 4294901760, %v13516_v53  ;;  %v5929_v54 = vand.u32 4294901760, %v13486_v22  ;;  %v6544_v0 = vand.u32 4294901760, %v13495_v2 }
 0x370   : > { %10707 = vmatprep.subr.bf16.mxu0 %v10706_v44  ;;  %v10730_v40 = vpack.c.bf16 %v6528_v5, %v6516_v61  ;;  %6489 = vmatprep.mubr.f32.mxu1 %v14407_v48  ;;  %v6534_v24 = vand.u32 4294901760, %v6533_v21  ;;  %v5924_v57 = vsub.f32 %v13511_v25, %v5923_v15  ;;  %v10710_v60 = vpack.c.bf16 %v13462_v51, %v13440_v45 }
 0x371   : > { %v10708_v39 = vpack.c.bf16 %v5919_v35, %v5907_v58  ;;  %v6539_v47 = vsub.f32 %v13516_v53, %v6538_v36  ;;  %v5930_v27 = vsub.f32 %v13486_v22, %v5929_v54  ;;  %v6545_v61 = vsub.f32 %v13495_v2, %v6544_v0 }
 0x372   : > { %10731 = vmatprep.subr.bf16.mxu1 %v10730_v40  ;;  %v10732_v16 = vpack.c.bf16 %v6534_v24, %v6522_v55  ;;  %5880 = vmatmul.mubr.f32.gmra.mrb[26].mxu0 %v13442_v20  ;;  %v5925_v62 = vand.u32 4294901760, %v5924_v57  ;;  %v10734_v51 = vpack.c.bf16 %v13470_v13, %v13446_v23  ;;  %v10712_v58 = vpack.c.bf16 %v13452_v34, %v13434_v31 }
 0x373   : > { %10709 = vmatpush1.bf16.msra.mxu0 %v10708_v39  ;;  %6495 = vmatmul.mubr.f32.gmra.mrb[26].mxu1 %v13442_v20  ;;  %v6540_v44 = vand.u32 4294901760, %v6539_v47  ;;  %v10736_v5 = vpack.c.bf16 %v13457_v6, %v13436_v28  ;;  %v10718_v55 = vpack.c.bf16 %v5911_v59, %v5899_v43  ;;  %v10742_v21 = vpack.c.bf16 %v6526_v4, %v6514_v7 }
 0x374   : > { %10733 = vmatpush1.bf16.msra.mxu1 %v10732_v16  ;;  %5926 = vmatprep.subr.mxu0 %v5925_v62  ;;  %v10720_v13 = vpack.c.bf16 %v5917_v11, %v5905_v49  ;;  %v5931_v34 = vand.u32 4294901760, %v5930_v27  ;;  %v10744_v35 = vpack.c.bf16 %v6532_v42, %v6520_v26  ;;  %v6546_v6 = vand.u32 4294901760, %v6545_v61 }
 0x375   : > { %6541 = vmatprep.subr.mxu1 %v6540_v44  ;;  %5885 = vmatprep.mubr.f32.mxu0 %v14407_v48 }
 0x376   : > { %6500 = vmatprep.mubr.f32.mxu1 %v14407_v48  ;;  %5891 = vmatmul.mubr.f32.gmra.mrb[28].mxu0 %v13444_v17 }
 0x377   : > { %5932 = vmatpush1.msra.mxu0 %v5931_v34  ;;  %6506 = vmatmul.mubr.f32.gmra.mrb[28].mxu1 %v13444_v17 }
 0x378   : > { %6547 = vmatpush1.msra.mxu1 %v6546_v6  ;;  %10711 = vmatprep.subr.bf16.mxu0 %v10710_v60 }
 0x379   : > { %10735 = vmatprep.subr.bf16.mxu1 %v10734_v51  ;;  %5991 = vmatprep.mubr.f32.mxu0 %v14407_v48 }
 0x37a   : > { %6606 = vmatprep.mubr.f32.mxu1 %v14407_v48  ;;  %5993 = vmatmul.mubr.f32.vlgmr.msra.gmra.mrb[24].mxu0 %v13390_v18 }
 0x37b   : > { %10713 = vmatpush1.bf16.msra.mxu0 %v10712_v58  ;;  %6608 = vmatmul.mubr.f32.vlgmr.msra.gmra.mrb[24].mxu1 %v13390_v18 }
 0x37c   : > { %10737 = vmatpush1.bf16.msra.mxu1 %v10736_v5  ;;  %6027 = vmatprep.subr.mxu0 %v13511_v25 }
 0x37d   : > { %6642 = vmatprep.subr.mxu1 %v13516_v53  ;;  %5998 = vmatprep.mubr.f32.mxu0 %v14407_v48 }
 0x37e   : > { %6613 = vmatprep.mubr.f32.mxu1 %v14407_v48  ;;  %6000 = vmatmul.mubr.f32.gmra.mrb[26].mxu0 %v13388_v29 }
 0x37f   : > { %6030 = vmatpush1.msra.mxu0 %v13486_v22  ;;  %6615 = vmatmul.mubr.f32.gmra.mrb[26].mxu1 %v13388_v29 }
 0x380   : > { %6645 = vmatpush1.msra.mxu1 %v13495_v2  ;;  %10715 = vmatprep.subr.bf16.mxu0 %v13460_v37 }
 0x381   : > { %10739 = vmatprep.subr.bf16.mxu1 %v13468_v30  ;;  %6005 = vmatprep.mubr.f32.mxu0 %v14407_v48 }
 0x382   : > { %6620 = vmatprep.mubr.f32.mxu1 %v14407_v48  ;;  %6007 = vmatmul.mubr.f32.gmra.mrb[28].mxu0 %v13393_v14 }
 0x383   : > { %6622 = vmatmul.mubr.f32.gmra.mrb[28].mxu1 %v13393_v14  ;;  %6089 = vmatprep.mubr.f32.mxu0 %v14407_v48 }
 0x384   : > { %6704 = vmatprep.mubr.f32.mxu1 %v14407_v48 }
 0x386   : > { %6092 = vmatmul.mubr.f32.vlgmr.msra.gmra.mrb[24].mxu0 %v13404_v46 }
 0x387   : > { %10717 = vmatpush1.bf16.msra.mxu0 %v13450_v52  ;;  %6707 = vmatmul.mubr.f32.vlgmr.msra.gmra.mrb[24].mxu1 %v13404_v46 }
 0x388   : > { %10741 = vmatpush1.bf16.msra.mxu1 %v13455_v56  ;;  %6123 = vmatprep.subr.mxu0 %v13482_v32 }
 0x389   : > { %6738 = vmatprep.subr.mxu1 %v13492_v38  ;;  %6097 = vmatprep.mubr.f32.mxu0 %v14407_v48 }
 0x38a   : > { %6712 = vmatprep.mubr.f32.mxu1 %v14407_v48  ;;  %6100 = vmatmul.mubr.f32.gmra.mrb[26].mxu0 %v13401_v10 }
 0x38b   : > { %6125 = vmatpush1.msra.mxu0 %v13472_v33  ;;  %6715 = vmatmul.mubr.f32.gmra.mrb[26].mxu1 %v13401_v10 }
 0x38c   : > { %6740 = vmatpush1.msra.mxu1 %v13477_v41  ;;  %10719 = vmatprep.subr.bf16.mxu0 %v10718_v55 }
 0x38d   : > { %10743 = vmatprep.subr.bf16.mxu1 %v10742_v21  ;;  %6105 = vmatprep.mubr.f32.mxu0 %v14407_v48 }
 0x38e   : > { %6720 = vmatprep.mubr.f32.mxu1 %v14407_v48  ;;  %6108 = vmatmul.mubr.f32.gmra.mrb[28].mxu0 %v13408_v63 }
 0x38f   : > { %6723 = vmatmul.mubr.f32.gmra.mrb[28].mxu1 %v13408_v63  ;;  %6184 = vmatprep.mubr.f32.mxu0 %v14407_v48 }
 0x390   : > { %6799 = vmatprep.mubr.f32.mxu1 %v14407_v48 }
 0x392   : > { %6188 = vmatmul.mubr.f32.vlgmr.msra.gmra.mrb[24].mxu0 %v13416_v9 }
 0x393   : > { %10721 = vmatpush1.bf16.msra.mxu0 %v10720_v13  ;;  %6803 = vmatmul.mubr.f32.vlgmr.msra.gmra.mrb[24].mxu1 %v13416_v9 }
 0x394   : > { %10745 = vmatpush1.bf16.msra.mxu1 %v10744_v35  ;;  %6231 = vmatprep.subr.mxu0 %v5923_v15 }
 0x395   : > { %6846 = vmatprep.subr.mxu1 %v6538_v36  ;;  %6193 = vmatprep.mubr.f32.mxu0 %v14407_v48 }
 0x396   : > { %6808 = vmatprep.mubr.f32.mxu1 %v14407_v48  ;;  %6197 = vmatmul.mubr.f32.gmra.mrb[26].mxu0 %v13420_v12 }
 0x397   : > { %6235 = vmatpush1.msra.mxu0 %v5929_v54  ;;  %6812 = vmatmul.mubr.f32.gmra.mrb[26].mxu1 %v13420_v12 }
 0x398   : > { %6850 = vmatpush1.msra.mxu1 %v6544_v0  ;;  %10723 = vmatprep.subr.bf16.mxu0 %v13460_v37  ;;  %v5086_v31 = vpop.f32.mrb[18].mxu0 }
 0x399   : > { %10747 = vmatprep.subr.bf16.mxu1 %v13468_v30  ;;  %v10930_v28 = vadd.f32 %v5086_v31, %v13386_v3  ;;  %v5701_v45 = vpop.f32.mrb[18].mxu1  ;;  %6202 = vmatprep.mubr.f32.mxu0 %v14407_v48  ;;  %v5088_v23 = vpop.f32.mrb[19].mxu0 }
 0x39a   : > { %v10936_v49 = vadd.f32 %v5701_v45, %v13386_v3  ;;  %6817 = vmatprep.mubr.f32.mxu1 %v14407_v48  ;;  %v10931_v26 = vadd.f32 %v5088_v23, %v13386_v3  ;;  %v5703_v43 = vpop.f32.mrb[19].mxu1  ;;  %6206 = vmatmul.mubr.f32.gmra.mrb[28].mxu0 %v13425_v1 }
 0x39b   : > { %11569 = vtanh.f32 %v10930_v28  ;;  %v10937_v7 = vadd.f32 %v5703_v43, %v13386_v3  ;;  %6821 = vmatmul.mubr.f32.gmra.mrb[28].mxu1 %v13425_v1  ;;  %6294 = vmatprep.mubr.f32.mxu0 %v14407_v48 }
 0x39c   : > { %11571 = vtanh.f32 %v10936_v49  ;;  %v5093_v37 = vpop.f32.mrb[20].mxu0  ;;  %6909 = vmatprep.mubr.f32.mxu1 %v14407_v48 }
 0x39d   : > { %11573 = vtanh.f32 %v10931_v26  ;;  %v10932_v30 = vadd.f32 %v5093_v37, %v13398_v19  ;;  %v5708_v59 = vpop.f32.mrb[20].mxu1  ;;  %v5095_v22 = vpop.f32.mrb[21].mxu0 }
 0x39e   : > { %11575 = vtanh.f32 %v10937_v7  ;;  %v10938_v2 = vadd.f32 %v5708_v59, %v13398_v19  ;;  %v10933_v4 = vadd.f32 %v5095_v22, %v13398_v19  ;;  %v5710_v11 = vpop.f32.mrb[21].mxu1  ;;  %6296 = vmatmul.mubr.f32.vlgmr.msra.gmra.mrb[24].mxu0 %v13390_v18 }
 0x39f   : > { %11577 = vtanh.f32 %v10932_v30  ;;  %v10939_v3 = vadd.f32 %v5710_v11, %v13398_v19  ;;  %10725 = vmatpush1.bf16.msra.mxu0 %v13450_v52  ;;  %6911 = vmatmul.mubr.f32.vlgmr.msra.gmra.mrb[24].mxu1 %v13390_v18 }
 0x3a0   : > { %11579 = vtanh.f32 %v10938_v2  ;;  %10749 = vmatpush1.bf16.msra.mxu1 %v13455_v56  ;;  %6325 = vmatprep.subr.mxu0 %v13482_v32  ;;  %v5100_v42 = vpop.f32.mrb[22].mxu0 }
 0x3a1   : > { %11581 = vtanh.f32 %v10933_v4  ;;  %6940 = vmatprep.subr.mxu1 %v13492_v38  ;;  %v10934_v25 = vadd.f32 %v5100_v42, %v13413_v50  ;;  %v5715_v53 = vpop.f32.mrb[22].mxu1  ;;  %6301 = vmatprep.mubr.f32.mxu0 %v14407_v48  ;;  %v5102_v15 = vpop.f32.mrb[23].mxu0 }
 0x3a2   : > { %11583 = vtanh.f32 %v10939_v3  ;;  %v10940_v19 = vadd.f32 %v5715_v53, %v13413_v50  ;;  %6916 = vmatprep.mubr.f32.mxu1 %v14407_v48  ;;  %v10935_v52 = vadd.f32 %v5102_v15, %v13413_v50  ;;  %v5717_v56 = vpop.f32.mrb[23].mxu1  ;;  %6303 = vmatmul.mubr.f32.gmra.mrb[26].mxu0 %v13388_v29 }
 0x3a3   : > { %11585 = vtanh.f32 %v10934_v25  ;;  %v10941_v32 = vadd.f32 %v5717_v56, %v13413_v50  ;;  %6327 = vmatpush1.msra.mxu0 %v13472_v33  ;;  %6918 = vmatmul.mubr.f32.gmra.mrb[26].mxu1 %v13388_v29 }
 0x3a4   : > { %11587 = vtanh.f32 %v10940_v19  ;;  %6942 = vmatpush1.msra.mxu1 %v13477_v41  ;;  %6308 = vmatprep.mubr.f32.mxu0 %v14407_v48 }
 0x3a5   : > { %v11570_v38 = vpop.eup %11569  ;;  %11589 = vtanh.f32 %v10935_v52  ;;  %6923 = vmatprep.mubr.f32.mxu1 %v14407_v48 }
 0x3a6   : > { %v11572_v36 = vpop.eup %11571  ;;  %11591 = vtanh.f32 %v10941_v32  ;;  %6310 = vmatmul.mubr.f32.gmra.mrb[28].mxu0 %v13393_v14  ;;  %v7025_v54 = vand.u32 4294901760, %v11570_v38 }
 0x3a7   : > { %v11574_v0 = vpop.eup %11573  ;;  %6925 = vmatmul.mubr.f32.gmra.mrb[28].mxu1 %v13393_v14  ;;  %6386 = vmatprep.mubr.f32.mxu0 %v14407_v48  ;;  %v7640_v50 = vand.u32 4294901760, %v11572_v36 }
 0x3a8   : > { %v11576_v33 = vpop.eup %11575  ;;  %7001 = vmatprep.mubr.f32.mxu1 %v14407_v48  ;;  %v7023_v41 = vand.u32 4294901760, %v11574_v0  ;;  %v13652_v40 = vsub.f32 %v11570_v38, %v7025_v54 }
 0x3a9   : > { %v11578_v24 = vpop.eup %11577  ;;  %v7638_v57 = vand.u32 4294901760, %v11576_v33  ;;  %v13654_v60 = vsub.f32 %v11572_v36, %v7640_v50 }
 0x3aa   : > { %v11580_v39 = vpop.eup %11579  ;;  %6388 = vmatmul.mubr.f32.vlgmr.msra.gmra.mrb[24].mxu0 %v13390_v18  ;;  %v13657_v47 = vsub.f32 %v11574_v0, %v7023_v41  ;;  %v7029_v27 = vand.u32 4294901760, %v11578_v24  ;;  %v7135_v51 = vand.u32 4294901760, %v13652_v40 }
 0x3ab   : > { %v11582_v61 = vpop.eup %11581  ;;  %7003 = vmatmul.mubr.f32.vlgmr.msra.gmra.mrb[24].mxu1 %v13390_v18  ;;  %6393 = vmatprep.mubr.f32.mxu0 %v14407_v48  ;;  %v13661_v16 = vsub.f32 %v11576_v33, %v7638_v57  ;;  %v7644_v62 = vand.u32 4294901760, %v11580_v39  ;;  %v7750_v58 = vand.u32 4294901760, %v13654_v60 }
 0x3ac   : > { %v11584_v44 = vpop.eup %11583  ;;  %7008 = vmatprep.mubr.f32.mxu1 %v14407_v48  ;;  %v7027_v5 = vand.u32 4294901760, %v11582_v61  ;;  %v13666_v55 = vpack.c.bf16 %v7029_v27, %v7025_v54  ;;  %v13668_v21 = vsub.f32 %v11578_v24, %v7029_v27  ;;  %v7129_v13 = vand.u32 4294901760, %v13657_v47 }
 0x3ad   : > { %v11586_v34 = vpop.eup %11585  ;;  %v7642_v35 = vand.u32 4294901760, %v11584_v44  ;;  %v13671_v6 = vpack.c.bf16 %v7644_v62, %v7640_v50  ;;  %v13673_v31 = vsub.f32 %v11580_v39, %v7644_v62  ;;  %v7744_v28 = vand.u32 4294901760, %v13661_v16 }
 0x3ae   : > { %v11588_v45 = vpop.eup %11587  ;;  %6395 = vmatmul.mubr.f32.gmra.mrb[26].mxu0 %v13388_v29  ;;  %v13677_v23 = vpack.c.bf16 %v7027_v5, %v7023_v41  ;;  %v13679_v49 = vsub.f32 %v11582_v61, %v7027_v5  ;;  %v5782_v26 = vsel %vm702_vm1, %v11586_v34, 0  ;;  %v7130_v43 = vsub.f32 %v13657_v47, %v7129_v13 }
 0x3af   : > { %v11590_v7 = vpop.eup %11589  ;;  %7010 = vmatmul.mubr.f32.gmra.mrb[26].mxu1 %v13388_v29  ;;  %v13686_v37 = vpack.c.bf16 %v7642_v35, %v7638_v57  ;;  %v13688_v30 = vsub.f32 %v11584_v44, %v7642_v35  ;;  %6400 = vmatprep.mubr.f32.mxu0 %v14407_v48  ;;  %v13691_v59 = vand.u32 4294901760, %v5782_v26  ;;  %v5788_v22 = vsel %vm702_vm1, %v11588_v45, 0 }
 0x3b0   : > { %v11592_v2 = vpop.eup %11591  ;;  %10751 = vmatprep.subr.bf16.mxu0 %v13677_v23  ;;  %7015 = vmatprep.mubr.f32.mxu1 %v14407_v48  ;;  %v5785_v4 = vsel %vm702_vm1, %v11590_v7, 0  ;;  %v13697_v11 = vand.u32 4294901760, %v5788_v22  ;;  %v7131_v3 = vand.u32 4294901760, %v7130_v43  ;;  %v7141_v42 = vand.u32 4294901760, %v13679_v49 }
 0x3b1   : > { %10775 = vmatprep.subr.bf16.mxu1 %v13686_v37  ;;  %10753 = vmatpush1.bf16.msra.mxu0 %v13666_v55  ;;  %v13702_v25 = vand.u32 4294901760, %v5785_v4  ;;  %v5791_v53 = vsel %vm702_vm1, %v11592_v2, 0  ;;  %v13706_v15 = vsub.f32 %v5782_v26, %v13691_v59  ;;  %v7745_v19 = vsub.f32 %v13661_v16, %v7744_v28 }
 0x3b2   : > { %10777 = vmatpush1.bf16.msra.mxu1 %v13671_v6  ;;  %6402 = vmatmul.mubr.f32.gmra.mrb[28].mxu0 %v13393_v14  ;;  %v13713_v52 = vand.u32 4294901760, %v5791_v53  ;;  %v13716_v56 = vsub.f32 %v5788_v22, %v13697_v11  ;;  %v7142_v32 = vsub.f32 %v13679_v49, %v7141_v42  ;;  %v7756_v38 = vand.u32 4294901760, %v13688_v30 }
 0x3b3   : > { %7017 = vmatmul.mubr.f32.gmra.mrb[28].mxu1 %v13393_v14  ;;  %7032 = vmatprep.subr.mxu0 %v13702_v25  ;;  %v7746_v36 = vand.u32 4294901760, %v7745_v19  ;;  %v7136_v54 = vsub.f32 %v13652_v40, %v7135_v51  ;;  %v7147_v0 = vand.u32 4294901760, %v13668_v21  ;;  %v7751_v50 = vsub.f32 %v13654_v60, %v7750_v58 }
 0x3b4   : > { %7647 = vmatprep.subr.mxu1 %v13713_v52  ;;  %7093 = vmatprep.mubr.f32.mxu0 %v14407_v48  ;;  %v7143_v33 = vand.u32 4294901760, %v7142_v32  ;;  %v7757_v41 = vsub.f32 %v13688_v30, %v7756_v38  ;;  %v7762_v24 = vand.u32 4294901760, %v13673_v31  ;;  %v13736_v57 = vsub.f32 %v5785_v4, %v13702_v25 }
 0x3b5   : > { %7034 = vmatpush1.msra.mxu0 %v13691_v59  ;;  %7708 = vmatprep.mubr.f32.mxu1 %v14407_v48  ;;  %v7137_v39 = vand.u32 4294901760, %v7136_v54  ;;  %v7148_v27 = vsub.f32 %v13668_v21, %v7147_v0  ;;  %v7752_v61 = vand.u32 4294901760, %v7751_v50  ;;  %v13742_v62 = vsub.f32 %v5791_v53, %v13713_v52 }
 0x3b6   : > { %7649 = vmatpush1.msra.mxu1 %v13697_v11  ;;  %7099 = vmatmul.mubr.f32.vlgmr.msra.gmra.mrb[30].mxu0 %v13438_v8  ;;  %v10754_v44 = vpack.c.bf16 %v7143_v33, %v7131_v3  ;;  %v7758_v5 = vand.u32 4294901760, %v7757_v41  ;;  %v7763_v34 = vsub.f32 %v13673_v31, %v7762_v24  ;;  %v7153_v35 = vand.u32 4294901760, %v13736_v57 }
 0x3b7   : > { %7714 = vmatmul.mubr.f32.vlgmr.msra.gmra.mrb[30].mxu1 %v13438_v8  ;;  %7104 = vmatprep.mubr.f32.mxu0 %v14407_v48  ;;  %v7149_v45 = vand.u32 4294901760, %v7148_v27  ;;  %v7768_v26 = vand.u32 4294901760, %v13742_v62  ;;  %v7159_v43 = vand.u32 4294901760, %v13706_v15  ;;  %v7774_v7 = vand.u32 4294901760, %v13716_v56 }
 0x3b8   : > { %10755 = vmatprep.subr.bf16.mxu0 %v10754_v44  ;;  %v10778_v22 = vpack.c.bf16 %v7758_v5, %v7746_v36  ;;  %7719 = vmatprep.mubr.f32.mxu1 %v14407_v48  ;;  %v7764_v2 = vand.u32 4294901760, %v7763_v34  ;;  %v7154_v4 = vsub.f32 %v13736_v57, %v7153_v35  ;;  %v10758_v8 = vpack.c.bf16 %v13679_v49, %v13657_v47  ;;  %v13892_v47 = vpop.permute.xlu1 %5755 }
 0x3b9   : > { %v10756_v3 = vpack.c.bf16 %v7149_v45, %v7137_v39  ;;  %v7769_v53 = vsub.f32 %v13742_v62, %v7768_v26  ;;  %v7160_v19 = vsub.f32 %v13706_v15, %v7159_v43  ;;  %v7775_v32 = vsub.f32 %v13716_v56, %v7774_v7 }
 0x3ba   : > { %10779 = vmatprep.subr.bf16.mxu1 %v10778_v22  ;;  %v10780_v36 = vpack.c.bf16 %v7764_v2, %v7752_v61  ;;  %7110 = vmatmul.mubr.f32.gmra.mrb[32].mxu0 %v13442_v20  ;;  %v7155_v54 = vand.u32 4294901760, %v7154_v4  ;;  %v10782_v50 = vpack.c.bf16 %v13688_v30, %v13661_v16  ;;  %v10760_v33 = vpack.c.bf16 %v13668_v21, %v13652_v40 }
 0x3bb   : > { %10757 = vmatpush1.bf16.msra.mxu0 %v10756_v3  ;;  %7725 = vmatmul.mubr.f32.gmra.mrb[32].mxu1 %v13442_v20  ;;  %v7770_v41 = vand.u32 4294901760, %v7769_v53  ;;  %v10784_v39 = vpack.c.bf16 %v13673_v31, %v13654_v60  ;;  %v10766_v27 = vpack.c.bf16 %v7141_v42, %v7129_v13  ;;  %v10790_v30 = vpack.c.bf16 %v7756_v38, %v7744_v28 }
 0x3bc   : > { %10781 = vmatpush1.bf16.msra.mxu1 %v10780_v36  ;;  %7156 = vmatprep.subr.mxu0 %v7155_v54  ;;  %v10768_v21 = vpack.c.bf16 %v7147_v0, %v7135_v51  ;;  %v7161_v20 = vand.u32 4294901760, %v7160_v19  ;;  %v10792_v31 = vpack.c.bf16 %v7762_v24, %v7750_v58  ;;  %v7776_v61 = vand.u32 4294901760, %v7775_v32 }
 0x3bd   : > { %7771 = vmatprep.subr.mxu1 %v7770_v41  ;;  %7115 = vmatprep.mubr.f32.mxu0 %v14407_v48 }
 0x3be   : > { %7730 = vmatprep.mubr.f32.mxu1 %v14407_v48  ;;  %7121 = vmatmul.mubr.f32.gmra.mrb[34].mxu0 %v13444_v17 }
 0x3bf   : > { %7162 = vmatpush1.msra.mxu0 %v7161_v20  ;;  %7736 = vmatmul.mubr.f32.gmra.mrb[34].mxu1 %v13444_v17 }
 0x3c0   : > { %7777 = vmatpush1.msra.mxu1 %v7776_v61  ;;  %10759 = vmatprep.subr.bf16.mxu0 %v10758_v8 }
 0x3c1   : > { %10783 = vmatprep.subr.bf16.mxu1 %v10782_v50  ;;  %7221 = vmatprep.mubr.f32.mxu0 %v14407_v48 }
 0x3c2   : > { %7836 = vmatprep.mubr.f32.mxu1 %v14407_v48  ;;  %7223 = vmatmul.mubr.f32.vlgmr.msra.gmra.mrb[30].mxu0 %v13390_v18 }
 0x3c3   : > { %10761 = vmatpush1.bf16.msra.mxu0 %v10760_v33  ;;  %7838 = vmatmul.mubr.f32.vlgmr.msra.gmra.mrb[30].mxu1 %v13390_v18 }
 0x3c4   : > { %10785 = vmatpush1.bf16.msra.mxu1 %v10784_v39  ;;  %7257 = vmatprep.subr.mxu0 %v13736_v57 }
 0x3c5   : > { %7872 = vmatprep.subr.mxu1 %v13742_v62  ;;  %7228 = vmatprep.mubr.f32.mxu0 %v14407_v48 }
 0x3c6   : > { %7843 = vmatprep.mubr.f32.mxu1 %v14407_v48  ;;  %7230 = vmatmul.mubr.f32.gmra.mrb[32].mxu0 %v13388_v29 }
 0x3c7   : > { %7260 = vmatpush1.msra.mxu0 %v13706_v15  ;;  %7845 = vmatmul.mubr.f32.gmra.mrb[32].mxu1 %v13388_v29 }
 0x3c8   : > { %7875 = vmatpush1.msra.mxu1 %v13716_v56  ;;  %10763 = vmatprep.subr.bf16.mxu0 %v13677_v23 }
 0x3c9   : > { %10787 = vmatprep.subr.bf16.mxu1 %v13686_v37  ;;  %7235 = vmatprep.mubr.f32.mxu0 %v14407_v48 }
 0x3ca   : > { %7850 = vmatprep.mubr.f32.mxu1 %v14407_v48  ;;  %7237 = vmatmul.mubr.f32.gmra.mrb[34].mxu0 %v13393_v14 }
 0x3cb   : > { %7852 = vmatmul.mubr.f32.gmra.mrb[34].mxu1 %v13393_v14  ;;  %7319 = vmatprep.mubr.f32.mxu0 %v14407_v48 }
 0x3cc   : > { %7934 = vmatprep.mubr.f32.mxu1 %v14407_v48 }
 0x3ce   : > { %7322 = vmatmul.mubr.f32.vlgmr.msra.gmra.mrb[30].mxu0 %v13404_v46 }
 0x3cf   : > { %10765 = vmatpush1.bf16.msra.mxu0 %v13666_v55  ;;  %7937 = vmatmul.mubr.f32.vlgmr.msra.gmra.mrb[30].mxu1 %v13404_v46  ;;  %v13884_v46 = vpop.permute.xlu0 %5750 }
 0x3d0   : > { %10789 = vmatpush1.bf16.msra.mxu1 %v13671_v6  ;;  %7353 = vmatprep.subr.mxu0 %v13702_v25 }
 0x3d1   : > { %7968 = vmatprep.subr.mxu1 %v13713_v52  ;;  %7327 = vmatprep.mubr.f32.mxu0 %v14407_v48 }
 0x3d2   : > { %7942 = vmatprep.mubr.f32.mxu1 %v14407_v48  ;;  %7330 = vmatmul.mubr.f32.gmra.mrb[32].mxu0 %v13401_v10 }
 0x3d3   : > { %7355 = vmatpush1.msra.mxu0 %v13691_v59  ;;  %7945 = vmatmul.mubr.f32.gmra.mrb[32].mxu1 %v13401_v10 }
 0x3d4   : > { %7970 = vmatpush1.msra.mxu1 %v13697_v11  ;;  %10767 = vmatprep.subr.bf16.mxu0 %v10766_v27 }
 0x3d5   : > { %10791 = vmatprep.subr.bf16.mxu1 %v10790_v30  ;;  %7335 = vmatprep.mubr.f32.mxu0 %v14407_v48 }
 0x3d6   : > { %7950 = vmatprep.mubr.f32.mxu1 %v14407_v48  ;;  %7338 = vmatmul.mubr.f32.gmra.mrb[34].mxu0 %v13408_v63 }
 0x3d7   : > { %7953 = vmatmul.mubr.f32.gmra.mrb[34].mxu1 %v13408_v63  ;;  %7414 = vmatprep.mubr.f32.mxu0 %v14407_v48 }
 0x3d8   : > { %8029 = vmatprep.mubr.f32.mxu1 %v14407_v48 }
 0x3da   : > { %7418 = vmatmul.mubr.f32.vlgmr.msra.gmra.mrb[30].mxu0 %v13416_v9 }
 0x3db   : > { %10769 = vmatpush1.bf16.msra.mxu0 %v10768_v21  ;;  %8033 = vmatmul.mubr.f32.vlgmr.msra.gmra.mrb[30].mxu1 %v13416_v9 }
 0x3dc   : > { %10793 = vmatpush1.bf16.msra.mxu1 %v10792_v31  ;;  %7461 = vmatprep.subr.mxu0 %v7153_v35 }
 0x3dd   : > { %8076 = vmatprep.subr.mxu1 %v7768_v26  ;;  %7423 = vmatprep.mubr.f32.mxu0 %v14407_v48 }
 0x3de   : > { %8038 = vmatprep.mubr.f32.mxu1 %v14407_v48  ;;  %7427 = vmatmul.mubr.f32.gmra.mrb[32].mxu0 %v13420_v12 }
 0x3df   : > { %7465 = vmatpush1.msra.mxu0 %v7159_v43  ;;  %8042 = vmatmul.mubr.f32.gmra.mrb[32].mxu1 %v13420_v12 }
 0x3e0   : > { %8080 = vmatpush1.msra.mxu1 %v7774_v7  ;;  %10771 = vmatprep.subr.bf16.mxu0 %v13677_v23 }
 0x3e1   : > { %10795 = vmatprep.subr.bf16.mxu1 %v13686_v37  ;;  %7432 = vmatprep.mubr.f32.mxu0 %v14407_v48  ;;  %v13901_v37 = vpop.permute.xlu0 %5760 }
 0x3e2   : > { %8047 = vmatprep.mubr.f32.mxu1 %v14407_v48  ;;  %7436 = vmatmul.mubr.f32.gmra.mrb[34].mxu0 %v13425_v1 }
 0x3e3   : > { %8051 = vmatmul.mubr.f32.gmra.mrb[34].mxu1 %v13425_v1  ;;  %7524 = vmatprep.mubr.f32.mxu0 %v14407_v48 }
 0x3e4   : > { %8139 = vmatprep.mubr.f32.mxu1 %v14407_v48 }
 0x3e6   : > { %7526 = vmatmul.mubr.f32.vlgmr.msra.gmra.mrb[30].mxu0 %v13390_v18 }
 0x3e7   : > { %10773 = vmatpush1.bf16.msra.mxu0 %v13666_v55  ;;  %8141 = vmatmul.mubr.f32.vlgmr.msra.gmra.mrb[30].mxu1 %v13390_v18 }
 0x3e8   : > { %10797 = vmatpush1.bf16.msra.mxu1 %v13671_v6  ;;  %7555 = vmatprep.subr.mxu0 %v13702_v25 }
 0x3e9   : > { %8170 = vmatprep.subr.mxu1 %v13713_v52  ;;  %7531 = vmatprep.mubr.f32.mxu0 %v14407_v48 }
 0x3ea   : > { %8146 = vmatprep.mubr.f32.mxu1 %v14407_v48  ;;  %7533 = vmatmul.mubr.f32.gmra.mrb[32].mxu0 %v13388_v29 }
 0x3eb   : > { %7557 = vmatpush1.msra.mxu0 %v13691_v59  ;;  %8148 = vmatmul.mubr.f32.gmra.mrb[32].mxu1 %v13388_v29 }
 0x3ec   : > { %8172 = vmatpush1.msra.mxu1 %v13697_v11  ;;  %7538 = vmatprep.mubr.f32.mxu0 %v14407_v48 }
 0x3ed   : > { %8153 = vmatprep.mubr.f32.mxu1 %v14407_v48 }
 0x3ee   : > { %7540 = vmatmul.mubr.f32.gmra.mrb[34].mxu0 %v13393_v14 }
 0x3ef   : > { %8155 = vmatmul.mubr.f32.gmra.mrb[34].mxu1 %v13393_v14  ;;  %7616 = vmatprep.mubr.f32.mxu0 %v14407_v48 }
 0x3f0   : > { %8231 = vmatprep.mubr.f32.mxu1 %v14407_v48 }
 0x3f2   : > { %7618 = vmatmul.mubr.f32.vlgmr.msra.gmra.mrb[30].mxu0 %v13390_v18 }
 0x3f3   : > { %8233 = vmatmul.mubr.f32.vlgmr.msra.gmra.mrb[30].mxu1 %v13390_v18  ;;  %7623 = vmatprep.mubr.f32.mxu0 %v14407_v48  ;;  %v11644_v18 = vld [vmem:[%s14305_s3] sm:$0x7] }
 0x3f4   : > { %8238 = vmatprep.mubr.f32.mxu1 %v14407_v48  ;;  %v8283_v10 = vsel %vm695_vm0, %v11644_v18, 0 }
 0x3f5   : > { %v13887_v1 = vand.u32 4294901760, %v8283_v10 }
 0x3f6   : > { %7625 = vmatmul.mubr.f32.gmra.mrb[32].mxu0 %v13388_v29 }
 0x3f7   : > { %8240 = vmatmul.mubr.f32.gmra.mrb[32].mxu1 %v13388_v29  ;;  %7630 = vmatprep.mubr.f32.mxu0 %v14407_v48  ;;  %v13896_v13 = vsub.f32 %v8283_v10, %v13887_v1 }
 0x3f8   : > { %8245 = vmatprep.mubr.f32.mxu1 %v14407_v48 }
 0x3f9   : > { %v13905_v15 = vand.u32 4294901760, %v13896_v13 }
 0x3fa   : > { %7632 = vmatmul.mubr.f32.gmra.mrb[34].mxu0 %v13393_v14 }
 0x3fb   : > { %8247 = vmatmul.mubr.f32.gmra.mrb[34].mxu1 %v13393_v14  ;;  %8379 = vmatprep.mubr.f32.mxu0 %v14407_v48  ;;  %v8383_v44 = vsub.f32 %v13896_v13, %v13905_v15 }
 0x3fc   : > { %8896 = vmatprep.mubr.f32.mxu1 %v14407_v48 }
 0x3fd   : > { %v13918_v3 = vand.u32 4294901760, %v8383_v44 }
 0x47d   : > { %v6389_v29 = vpop.f32.mrb[24].mxu0 }
 0x47e   : > { %v10942_v63 = vadd.f32 %v6389_v29, %v13884_v46  ;;  %v7004_v9 = vpop.f32.mrb[24].mxu1  ;;  %v6391_v12 = vpop.f32.mrb[25].mxu0 }
 0x47f   : > { %v10948_v14 = vadd.f32 %v7004_v9, %v13884_v46  ;;  %v10943_v17 = vadd.f32 %v6391_v12, %v13884_v46  ;;  %v7006_v40 = vpop.f32.mrb[25].mxu1 }
 0x480   : > { %11593 = vtanh.f32 %v10942_v63  ;;  %v10949_v60 = vadd.f32 %v7006_v40, %v13884_v46 }
 0x481   : > { %11595 = vtanh.f32 %v10948_v14  ;;  %v6396_v16 = vpop.f32.mrb[26].mxu0 }
 0x482   : > { %11597 = vtanh.f32 %v10943_v17  ;;  %v10944_v51 = vadd.f32 %v6396_v16, %v13892_v47  ;;  %v7011_v58 = vpop.f32.mrb[26].mxu1  ;;  %v6398_v55 = vpop.f32.mrb[27].mxu0 }
 0x483   : > { %11599 = vtanh.f32 %v10949_v60  ;;  %v10950_v6 = vadd.f32 %v7011_v58, %v13892_v47  ;;  %v10945_v28 = vadd.f32 %v6398_v55, %v13892_v47  ;;  %v7013_v23 = vpop.f32.mrb[27].mxu1 }
 0x484   : > { %11601 = vtanh.f32 %v10944_v51  ;;  %v10951_v49 = vadd.f32 %v7013_v23, %v13892_v47 }
 0x485   : > { %11603 = vtanh.f32 %v10950_v6  ;;  %v6403_v59 = vpop.f32.mrb[28].mxu0 }
 0x486   : > { %11605 = vtanh.f32 %v10945_v28  ;;  %v10946_v11 = vadd.f32 %v6403_v59, %v13901_v37  ;;  %v7018_v42 = vpop.f32.mrb[28].mxu1  ;;  %v6405_v25 = vpop.f32.mrb[29].mxu0 }
 0x487   : > { %11607 = vtanh.f32 %v10951_v49  ;;  %v10952_v52 = vadd.f32 %v7018_v42, %v13901_v37  ;;  %v10947_v56 = vadd.f32 %v6405_v25, %v13901_v37  ;;  %v7020_v38 = vpop.f32.mrb[29].mxu1 }
 0x488   : > { %11609 = vtanh.f32 %v10946_v11  ;;  %v10953_v0 = vadd.f32 %v7020_v38, %v13901_v37 }
 0x489   : > { %11611 = vtanh.f32 %v10952_v52 }
 0x48a   : > { %v11594_v24 = vpop.eup %11593  ;;  %11613 = vtanh.f32 %v10947_v56 }
 0x48b   : > { %v11596_v57 = vpop.eup %11595  ;;  %11615 = vtanh.f32 %v10953_v0  ;;  %v8311_v62 = vand.u32 4294901760, %v11594_v24 }
 0x48c   : > { %v11598_v5 = vpop.eup %11597  ;;  %v8828_v34 = vand.u32 4294901760, %v11596_v57 }
 0x48d   : > { %v11600_v35 = vpop.eup %11599  ;;  %v8309_v45 = vand.u32 4294901760, %v11598_v5  ;;  %v13912_v26 = vsub.f32 %v11594_v24, %v8311_v62 }
 0x48e   : > { %v11602_v43 = vpop.eup %11601  ;;  %v8826_v7 = vand.u32 4294901760, %v11600_v35  ;;  %v13914_v22 = vsub.f32 %v11596_v57, %v8828_v34 }
 0x48f   : > { %v11604_v2 = vpop.eup %11603  ;;  %v13916_v4 = vsub.f32 %v11598_v5, %v8309_v45  ;;  %v8315_v8 = vand.u32 4294901760, %v11602_v43  ;;  %v8399_v36 = vand.u32 4294901760, %v13912_v26 }
 0x490   : > { %v11606_v53 = vpop.eup %11605  ;;  %v13920_v19 = vsub.f32 %v11600_v35, %v8826_v7  ;;  %v8832_v32 = vand.u32 4294901760, %v11604_v2  ;;  %v8916_v54 = vand.u32 4294901760, %v13914_v22 }
 0x491   : > { %v11608_v50 = vpop.eup %11607  ;;  %v8313_v33 = vand.u32 4294901760, %v11606_v53  ;;  %v13924_v41 = vpack.c.bf16 %v8315_v8, %v8311_v62  ;;  %v13926_v39 = vsub.f32 %v11602_v43, %v8315_v8  ;;  %v8393_v27 = vand.u32 4294901760, %v13916_v4 }
 0x492   : > { %v11610_v30 = vpop.eup %11609  ;;  %v8830_v21 = vand.u32 4294901760, %v11608_v50  ;;  %v13929_v20 = vpack.c.bf16 %v8832_v32, %v8828_v34  ;;  %v13931_v31 = vsub.f32 %v11604_v2, %v8832_v32  ;;  %v8910_v61 = vand.u32 4294901760, %v13920_v19 }
 0x493   : > { %v11612_v18 = vpop.eup %11611  ;;  %v13934_v10 = vpack.c.bf16 %v8313_v33, %v8309_v45  ;;  %v13936_v29 = vsub.f32 %v11606_v53, %v8313_v33  ;;  %v8286_v63 = vsel %vm702_vm1, %v11610_v30, 0  ;;  %v8394_v9 = vsub.f32 %v13916_v4, %v8393_v27 }
 0x494   : > { %v11614_v12 = vpop.eup %11613  ;;  %v13942_v14 = vpack.c.bf16 %v8830_v21, %v8826_v7  ;;  %v13944_v17 = vsub.f32 %v11608_v50, %v8830_v21  ;;  %v13946_v40 = vand.u32 4294901760, %v8286_v63  ;;  %v8292_v60 = vsel %vm702_vm1, %v11612_v18, 0 }
 0x495   : > { %v11616_v16 = vpop.eup %11615  ;;  %10799 = vmatprep.subr.bf16.mxu0 %v13934_v10  ;;  %v8289_v51 = vsel %vm702_vm1, %v11614_v12, 0  ;;  %v13951_v58 = vand.u32 4294901760, %v8292_v60  ;;  %v8395_v55 = vand.u32 4294901760, %v8394_v9  ;;  %v8405_v6 = vand.u32 4294901760, %v13936_v29 }
 0x496   : > { %10823 = vmatprep.subr.bf16.mxu1 %v13942_v14  ;;  %10801 = vmatpush1.bf16.msra.mxu0 %v13924_v41  ;;  %v13956_v28 = vand.u32 4294901760, %v8289_v51  ;;  %v8295_v23 = vsel %vm702_vm1, %v11616_v16, 0  ;;  %v13960_v49 = vsub.f32 %v8286_v63, %v13946_v40  ;;  %v8911_v59 = vsub.f32 %v13920_v19, %v8910_v61 }
 0x497   : > { %10825 = vmatpush1.bf16.msra.mxu1 %v13929_v20  ;;  %v13966_v11 = vand.u32 4294901760, %v8295_v23  ;;  %v13969_v42 = vsub.f32 %v8292_v60, %v13951_v58  ;;  %v8406_v25 = vsub.f32 %v13936_v29, %v8405_v6  ;;  %v8922_v52 = vand.u32 4294901760, %v13944_v17 }
 0x498   : > { %8318 = vmatprep.subr.mxu0 %v13956_v28  ;;  %v8912_v56 = vand.u32 4294901760, %v8911_v59  ;;  %v8400_v38 = vsub.f32 %v13912_v26, %v8399_v36  ;;  %v8411_v0 = vand.u32 4294901760, %v13926_v39  ;;  %v8917_v24 = vsub.f32 %v13914_v22, %v8916_v54 }
 0x499   : > { %8835 = vmatprep.subr.mxu1 %v13966_v11  ;;  %v8407_v57 = vand.u32 4294901760, %v8406_v25  ;;  %v8923_v62 = vsub.f32 %v13944_v17, %v8922_v52  ;;  %v8928_v44 = vand.u32 4294901760, %v13931_v31  ;;  %v13985_v5 = vsub.f32 %v8289_v51, %v13956_v28 }
 0x49a   : > { %8320 = vmatpush1.msra.mxu0 %v13946_v40  ;;  %v8401_v34 = vand.u32 4294901760, %v8400_v38  ;;  %v8412_v35 = vsub.f32 %v13926_v39, %v8411_v0  ;;  %v8918_v45 = vand.u32 4294901760, %v8917_v24  ;;  %v13990_v43 = vsub.f32 %v8295_v23, %v13966_v11 }
 0x49b   : > { %8837 = vmatpush1.msra.mxu1 %v13951_v58  ;;  %8385 = vmatmul.mubr.f32.vlgmr.msra.gmra.mrb[36].mxu0 %v13918_v3  ;;  %v10802_v7 = vpack.c.bf16 %v8407_v57, %v8395_v55  ;;  %v8924_v2 = vand.u32 4294901760, %v8923_v62  ;;  %v8929_v8 = vsub.f32 %v13931_v31, %v8928_v44  ;;  %v8417_v53 = vand.u32 4294901760, %v13985_v5 }
 0x49c   : > { %8902 = vmatmul.mubr.f32.vlgmr.msra.gmra.mrb[36].mxu1 %v13918_v3  ;;  %v8413_v32 = vand.u32 4294901760, %v8412_v35  ;;  %v8934_v50 = vand.u32 4294901760, %v13990_v43  ;;  %v8423_v33 = vand.u32 4294901760, %v13960_v49  ;;  %8485 = vmatprep.mubr.f32.mxu0 %v14407_v48  ;;  %v8940_v30 = vand.u32 4294901760, %v13969_v42 }
 0x49d   : > { %10803 = vmatprep.subr.bf16.mxu0 %v10802_v7  ;;  %v10826_v21 = vpack.c.bf16 %v8924_v2, %v8912_v56  ;;  %v8930_v18 = vand.u32 4294901760, %v8929_v8  ;;  %v8418_v63 = vsub.f32 %v13985_v5, %v8417_v53  ;;  %9002 = vmatprep.mubr.f32.mxu1 %v14407_v48  ;;  %v10806_v9 = vpack.c.bf16 %v13936_v29, %v13916_v4 }
 0x49e   : > { %v10804_v12 = vpack.c.bf16 %v8413_v32, %v8401_v34  ;;  %v8935_v60 = vsub.f32 %v13990_v43, %v8934_v50  ;;  %v8424_v16 = vsub.f32 %v13960_v49, %v8423_v33  ;;  %v8941_v51 = vsub.f32 %v13969_v42, %v8940_v30 }
 0x49f   : > { %10827 = vmatprep.subr.bf16.mxu1 %v10826_v21  ;;  %v10828_v55 = vpack.c.bf16 %v8930_v18, %v8918_v45  ;;  %v8419_v23 = vand.u32 4294901760, %v8418_v63  ;;  %v10830_v59 = vpack.c.bf16 %v13944_v17, %v13920_v19  ;;  %v10808_v29 = vpack.c.bf16 %v13926_v39, %v13912_v26 }
 0x4a0   : > { %10805 = vmatpush1.bf16.msra.mxu0 %v10804_v12  ;;  %v8936_v25 = vand.u32 4294901760, %v8935_v60  ;;  %v10832_v56 = vpack.c.bf16 %v13931_v31, %v13914_v22  ;;  %v10814_v38 = vpack.c.bf16 %v8405_v6, %v8393_v27  ;;  %v10838_v24 = vpack.c.bf16 %v8922_v52, %v8910_v61 }
 0x4a1   : > { %10829 = vmatpush1.bf16.msra.mxu1 %v10828_v55  ;;  %8420 = vmatprep.subr.mxu0 %v8419_v23  ;;  %v10816_v57 = vpack.c.bf16 %v8411_v0, %v8399_v36  ;;  %v8425_v17 = vand.u32 4294901760, %v8424_v16  ;;  %v10840_v39 = vpack.c.bf16 %v8928_v44, %v8916_v54  ;;  %v8942_v62 = vand.u32 4294901760, %v8941_v51 }
 0x4a2   : > { %8937 = vmatprep.subr.mxu1 %v8936_v25 }
 0x4a4   : > { %8426 = vmatpush1.msra.mxu0 %v8425_v17 }
 0x4a5   : > { %8943 = vmatpush1.msra.mxu1 %v8942_v62  ;;  %8487 = vmatmul.mubr.f32.vlgmr.msra.gmra.mrb[36].mxu0 %v13887_v1 }
 0x4a6   : > { %10807 = vmatprep.subr.bf16.mxu0 %v10806_v9  ;;  %9004 = vmatmul.mubr.f32.vlgmr.msra.gmra.mrb[36].mxu1 %v13887_v1 }
 0x4a7   : > { %10831 = vmatprep.subr.bf16.mxu1 %v10830_v59  ;;  %10809 = vmatpush1.bf16.msra.mxu0 %v10808_v29 }
 0x4a8   : > { %10833 = vmatpush1.bf16.msra.mxu1 %v10832_v56  ;;  %8507 = vmatprep.subr.mxu0 %v13985_v5 }
 0x4a9   : > { %9024 = vmatprep.subr.mxu1 %v13990_v43  ;;  %8569 = vmatprep.mubr.f32.mxu0 %v14407_v48 }
 0x4aa   : > { %9086 = vmatprep.mubr.f32.mxu1 %v14407_v48 }
 0x4ab   : > { %8510 = vmatpush1.msra.mxu0 %v13960_v49 }
 0x4ac   : > { %9027 = vmatpush1.msra.mxu1 %v13969_v42  ;;  %10811 = vmatprep.subr.bf16.mxu0 %v13934_v10 }
 0x4ad   : > { %10835 = vmatprep.subr.bf16.mxu1 %v13942_v14  ;;  %8572 = vmatmul.mubr.f32.vlgmr.msra.gmra.mrb[36].mxu0 %v13896_v13 }
 0x4ae   : > { %10813 = vmatpush1.bf16.msra.mxu0 %v13924_v41  ;;  %9089 = vmatmul.mubr.f32.vlgmr.msra.gmra.mrb[36].mxu1 %v13896_v13 }
 0x4af   : > { %10837 = vmatpush1.bf16.msra.mxu1 %v13929_v20  ;;  %8587 = vmatprep.subr.mxu0 %v13956_v28 }
 0x4b0   : > { %9104 = vmatprep.subr.mxu1 %v13966_v11  ;;  %8648 = vmatprep.mubr.f32.mxu0 %v14407_v48 }
 0x4b1   : > { %9165 = vmatprep.mubr.f32.mxu1 %v14407_v48 }
 0x4b2   : > { %8589 = vmatpush1.msra.mxu0 %v13946_v40 }
 0x4b3   : > { %9106 = vmatpush1.msra.mxu1 %v13951_v58  ;;  %10815 = vmatprep.subr.bf16.mxu0 %v10814_v38 }
 0x4b4   : > { %10839 = vmatprep.subr.bf16.mxu1 %v10838_v24 }
 0x4b5   : > { %8652 = vmatmul.mubr.f32.vlgmr.msra.gmra.mrb[36].mxu0 %v13905_v15 }
 0x4b6   : > { %10817 = vmatpush1.bf16.msra.mxu0 %v10816_v57  ;;  %9169 = vmatmul.mubr.f32.vlgmr.msra.gmra.mrb[36].mxu1 %v13905_v15 }
 0x4b7   : > { %10841 = vmatpush1.bf16.msra.mxu1 %v10840_v39  ;;  %8677 = vmatprep.subr.mxu0 %v8417_v53 }
 0x4b8   : > { %9194 = vmatprep.subr.mxu1 %v8934_v50  ;;  %8740 = vmatprep.mubr.f32.mxu0 %v14407_v48 }
 0x4b9   : > { %9257 = vmatprep.mubr.f32.mxu1 %v14407_v48 }
 0x4ba   : > { %8681 = vmatpush1.msra.mxu0 %v8423_v33 }
 0x4bb   : > { %9198 = vmatpush1.msra.mxu1 %v8940_v30  ;;  %10819 = vmatprep.subr.bf16.mxu0 %v13934_v10 }
 0x4bc   : > { %10843 = vmatprep.subr.bf16.mxu1 %v13942_v14 }
 0x4bd   : > { %8742 = vmatmul.mubr.f32.vlgmr.msra.gmra.mrb[36].mxu0 %v13887_v1 }
 0x4be   : > { %10821 = vmatpush1.bf16.msra.mxu0 %v13924_v41  ;;  %9259 = vmatmul.mubr.f32.vlgmr.msra.gmra.mrb[36].mxu1 %v13887_v1 }
 0x4bf   : > { %10845 = vmatpush1.bf16.msra.mxu1 %v13929_v20  ;;  %8757 = vmatprep.subr.mxu0 %v13956_v28 }
 0x4c0   : > { %9274 = vmatprep.subr.mxu1 %v13966_v11  ;;  %8818 = vmatprep.mubr.f32.mxu0 %v14407_v48 }
 0x4c1   : > { %9335 = vmatprep.mubr.f32.mxu1 %v14407_v48 }
 0x4c2   : > { %8759 = vmatpush1.msra.mxu0 %v13946_v40 }
 0x4c3   : > { %9276 = vmatpush1.msra.mxu1 %v13951_v58 }
 0x4c5   : > { %8820 = vmatmul.mubr.f32.vlgmr.msra.gmra.mrb[36].mxu0 %v13887_v1  ;;  %v7619_v26 = vpop.f32.mrb[30].mxu0 }
 0x4c6   : > { %9337 = vmatmul.mubr.f32.vlgmr.msra.gmra.mrb[36].mxu1 %v13887_v1  ;;  %v10954_v22 = vadd.f32 %v7619_v26, %v13884_v46  ;;  %v8234_v4 = vpop.f32.mrb[30].mxu1  ;;  %v7621_v19 = vpop.f32.mrb[31].mxu0  ;;  %9413 = vmatprep.mubr.f32.mxu0 %v14407_v48 }
 0x4c7   : > { %v10960_v36 = vadd.f32 %v8234_v4, %v13884_v46  ;;  %v10955_v54 = vadd.f32 %v7621_v19, %v13884_v46  ;;  %v8236_v41 = vpop.f32.mrb[31].mxu1  ;;  %9930 = vmatprep.mubr.f32.mxu1 %v14407_v48 }
 0x4c8   : > { %11617 = vtanh.f32 %v10954_v22  ;;  %v10961_v27 = vadd.f32 %v8236_v41, %v13884_v46 }
 0x4c9   : > { %11619 = vtanh.f32 %v10960_v36  ;;  %v7626_v20 = vpop.f32.mrb[32].mxu0 }
 0x4ca   : > { %11621 = vtanh.f32 %v10955_v54  ;;  %v10956_v31 = vadd.f32 %v7626_v20, %v13892_v47  ;;  %v8241_v61 = vpop.f32.mrb[32].mxu1  ;;  %v7628_v10 = vpop.f32.mrb[33].mxu0 }
 0x4cb   : > { %11623 = vtanh.f32 %v10961_v27  ;;  %v10962_v14 = vadd.f32 %v8241_v61, %v13892_v47  ;;  %v10957_v40 = vadd.f32 %v7628_v10, %v13892_v47  ;;  %v8243_v58 = vpop.f32.mrb[33].mxu1 }
 0x4cc   : > { %11625 = vtanh.f32 %v10956_v31  ;;  %v10963_v6 = vadd.f32 %v8243_v58, %v13892_v47 }
 0x4cd   : > { %11627 = vtanh.f32 %v10962_v14  ;;  %v7633_v28 = vpop.f32.mrb[34].mxu0 }
 0x4ce   : > { %11629 = vtanh.f32 %v10957_v40  ;;  %v10958_v46 = vadd.f32 %v7633_v28, %v13901_v37  ;;  %v8248_v49 = vpop.f32.mrb[34].mxu1  ;;  %v7635_v11 = vpop.f32.mrb[35].mxu0 }
 0x4cf   : > { %11631 = vtanh.f32 %v10963_v6  ;;  %v10964_v42 = vadd.f32 %v8248_v49, %v13901_v37  ;;  %v10959_v52 = vadd.f32 %v7635_v11, %v13901_v37  ;;  %v8250_v0 = vpop.f32.mrb[35].mxu1 }
 0x4d0   : > { %11633 = vtanh.f32 %v10958_v46  ;;  %v10965_v44 = vadd.f32 %v8250_v0, %v13901_v37 }
 0x4d1   : > { %11635 = vtanh.f32 %v10964_v42 }
 0x4d2   : > { %v11618_v5 = vpop.eup %11617  ;;  %11637 = vtanh.f32 %v10959_v52 }
 0x4d3   : > { %v11620_v47 = vpop.eup %11619  ;;  %11639 = vtanh.f32 %v10965_v44  ;;  %v9345_v34 = vand.u32 4294901760, %v11618_v5 }
 0x4d4   : > { %v11622_v35 = vpop.eup %11621  ;;  %v9862_v45 = vand.u32 4294901760, %v11620_v47 }
 0x4d5   : > { %v11624_v43 = vpop.eup %11623  ;;  %v9343_v7 = vand.u32 4294901760, %v11622_v35  ;;  %v14090_v2 = vsub.f32 %v11618_v5, %v9345_v34 }
 0x4d6   : > { %v11626_v8 = vpop.eup %11625  ;;  %v9860_v53 = vand.u32 4294901760, %v11624_v43  ;;  %v14092_v32 = vsub.f32 %v11620_v47, %v9862_v45 }
 0x4d7   : > { %v11628_v50 = vpop.eup %11627  ;;  %v14094_v33 = vsub.f32 %v11622_v35, %v9343_v7  ;;  %v9349_v37 = vand.u32 4294901760, %v11626_v8  ;;  %v9433_v63 = vand.u32 4294901760, %v14090_v2 }
 0x4d8   : > { %v11630_v30 = vpop.eup %11629  ;;  %v14096_v21 = vsub.f32 %v11624_v43, %v9860_v53  ;;  %v9866_v18 = vand.u32 4294901760, %v11628_v50  ;;  %v9950_v9 = vand.u32 4294901760, %v14092_v32 }
 0x4d9   : > { %v11632_v12 = vpop.eup %11631  ;;  %v9347_v60 = vand.u32 4294901760, %v11630_v30  ;;  %v14100_v16 = vpack.c.bf16 %v9349_v37, %v9345_v34  ;;  %v14102_v51 = vsub.f32 %v11626_v8, %v9349_v37  ;;  %v9427_v55 = vand.u32 4294901760, %v14094_v33 }
 0x4da   : > { %v11634_v23 = vpop.eup %11633  ;;  %v9864_v59 = vand.u32 4294901760, %v11632_v12  ;;  %v14105_v29 = vpack.c.bf16 %v9866_v18, %v9862_v45  ;;  %v14107_v25 = vsub.f32 %v11628_v50, %v9866_v18  ;;  %v9944_v56 = vand.u32 4294901760, %v14096_v21 }
 0x4db   : > { %v11636_v38 = vpop.eup %11635  ;;  %v14110_v24 = vpack.c.bf16 %v9347_v60, %v9343_v7  ;;  %v14112_v57 = vsub.f32 %v11630_v30, %v9347_v60  ;;  %v8298_v17 = vsel %vm702_vm1, %v11634_v23, 0  ;;  %v9428_v39 = vsub.f32 %v14094_v33, %v9427_v55 }
 0x4dc   : > { %v11638_v62 = vpop.eup %11637  ;;  %v14118_v26 = vpack.c.bf16 %v9864_v59, %v9860_v53  ;;  %v14120_v22 = vsub.f32 %v11632_v12, %v9864_v59  ;;  %v14122_v4 = vand.u32 4294901760, %v8298_v17  ;;  %v8304_v19 = vsel %vm702_vm1, %v11636_v38, 0 }
 0x4dd   : > { %v11640_v36 = vpop.eup %11639  ;;  %10847 = vmatprep.subr.bf16.mxu0 %v14110_v24  ;;  %v8301_v54 = vsel %vm702_vm1, %v11638_v62, 0  ;;  %v14127_v41 = vand.u32 4294901760, %v8304_v19  ;;  %v9429_v27 = vand.u32 4294901760, %v9428_v39  ;;  %v9439_v20 = vand.u32 4294901760, %v14112_v57 }
 0x4de   : > { %10871 = vmatprep.subr.bf16.mxu1 %v14118_v26  ;;  %10849 = vmatpush1.bf16.msra.mxu0 %v14100_v16  ;;  %v14132_v31 = vand.u32 4294901760, %v8301_v54  ;;  %v8307_v61 = vsel %vm702_vm1, %v11640_v36, 0  ;;  %v14136_v10 = vsub.f32 %v8298_v17, %v14122_v4  ;;  %v9945_v14 = vsub.f32 %v14096_v21, %v9944_v56 }
 0x4df   : > { %10873 = vmatpush1.bf16.msra.mxu1 %v14105_v29  ;;  %v14142_v40 = vand.u32 4294901760, %v8307_v61  ;;  %v14145_v58 = vsub.f32 %v8304_v19, %v14127_v41  ;;  %v9440_v6 = vsub.f32 %v14112_v57, %v9439_v20  ;;  %v9956_v28 = vand.u32 4294901760, %v14120_v22 }
 0x4e0   : > { %9352 = vmatprep.subr.mxu0 %v14132_v31  ;;  %v9946_v46 = vand.u32 4294901760, %v9945_v14  ;;  %v9434_v49 = vsub.f32 %v14090_v2, %v9433_v63  ;;  %v9445_v11 = vand.u32 4294901760, %v14102_v51  ;;  %v9951_v42 = vsub.f32 %v14092_v32, %v9950_v9 }
 0x4e1   : > { %9869 = vmatprep.subr.mxu1 %v14142_v40  ;;  %v9441_v52 = vand.u32 4294901760, %v9440_v6  ;;  %v9957_v0 = vsub.f32 %v14120_v22, %v9956_v28  ;;  %v9962_v44 = vand.u32 4294901760, %v14107_v25  ;;  %v14161_v5 = vsub.f32 %v8301_v54, %v14132_v31 }
 0x4e2   : > { %9354 = vmatpush1.msra.mxu0 %v14122_v4  ;;  %v9435_v47 = vand.u32 4294901760, %v9434_v49  ;;  %v9446_v34 = vsub.f32 %v14102_v51, %v9445_v11  ;;  %v9952_v35 = vand.u32 4294901760, %v9951_v42  ;;  %v14166_v45 = vsub.f32 %v8307_v61, %v14142_v40 }
 0x4e3   : > { %9871 = vmatpush1.msra.mxu1 %v14127_v41  ;;  %9419 = vmatmul.mubr.f32.vlgmr.msra.gmra.mrb[38].mxu0 %v13918_v3  ;;  %v10850_v43 = vpack.c.bf16 %v9441_v52, %v9429_v27  ;;  %v9958_v7 = vand.u32 4294901760, %v9957_v0  ;;  %v9963_v8 = vsub.f32 %v14107_v25, %v9962_v44  ;;  %v9451_v53 = vand.u32 4294901760, %v14161_v5 }
 0x4e4   : > { %9936 = vmatmul.mubr.f32.vlgmr.msra.gmra.mrb[38].mxu1 %v13918_v3  ;;  %v9447_v50 = vand.u32 4294901760, %v9446_v34  ;;  %v9968_v37 = vand.u32 4294901760, %v14166_v45  ;;  %v9457_v30 = vand.u32 4294901760, %v14136_v10  ;;  %9519 = vmatprep.mubr.f32.mxu0 %v14407_v48  ;;  %v9974_v18 = vand.u32 4294901760, %v14145_v58 }
 0x4e5   : > { %10851 = vmatprep.subr.bf16.mxu0 %v10850_v43  ;;  %v10874_v12 = vpack.c.bf16 %v9958_v7, %v9946_v46  ;;  %v9964_v60 = vand.u32 4294901760, %v9963_v8  ;;  %v9452_v23 = vsub.f32 %v14161_v5, %v9451_v53  ;;  %10036 = vmatprep.mubr.f32.mxu1 %v14407_v48  ;;  %v10854_v3 = vpack.c.bf16 %v14112_v57, %v14094_v33 }
 0x4e6   : > { %v10852_v59 = vpack.c.bf16 %v9447_v50, %v9435_v47  ;;  %v9969_v38 = vsub.f32 %v14166_v45, %v9968_v37  ;;  %v9458_v17 = vsub.f32 %v14136_v10, %v9457_v30  ;;  %v9975_v39 = vsub.f32 %v14145_v58, %v9974_v18 }
 0x4e7   : > { %10875 = vmatprep.subr.bf16.mxu1 %v10874_v12  ;;  %v10876_v62 = vpack.c.bf16 %v9964_v60, %v9952_v35  ;;  %v9453_v19 = vand.u32 4294901760, %v9452_v23  ;;  %v10878_v36 = vpack.c.bf16 %v14120_v22, %v14096_v21  ;;  %v10856_v57 = vpack.c.bf16 %v14102_v51, %v14090_v2 }
 0x4e8   : > { %10853 = vmatpush1.bf16.msra.mxu0 %v10852_v59  ;;  %v9970_v54 = vand.u32 4294901760, %v9969_v38  ;;  %v10880_v27 = vpack.c.bf16 %v14107_v25, %v14092_v32  ;;  %v10862_v61 = vpack.c.bf16 %v9439_v20, %v9427_v55  ;;  %v10886_v14 = vpack.c.bf16 %v9956_v28, %v9944_v56 }
 0x4e9   : > { %10877 = vmatpush1.bf16.msra.mxu1 %v10876_v62  ;;  %9454 = vmatprep.subr.mxu0 %v9453_v19  ;;  %v10864_v6 = vpack.c.bf16 %v9445_v11, %v9433_v63  ;;  %v9459_v22 = vand.u32 4294901760, %v9458_v17  ;;  %v10888_v51 = vpack.c.bf16 %v9962_v44, %v9950_v9  ;;  %v9976_v46 = vand.u32 4294901760, %v9975_v39 }
 0x4ea   : > { %9971 = vmatprep.subr.mxu1 %v9970_v54 }
 0x4ec   : > { %9460 = vmatpush1.msra.mxu0 %v9459_v22 }
 0x4ed   : > { %9977 = vmatpush1.msra.mxu1 %v9976_v46  ;;  %9521 = vmatmul.mubr.f32.vlgmr.msra.gmra.mrb[38].mxu0 %v13887_v1 }
 0x4ee   : > { %10855 = vmatprep.subr.bf16.mxu0 %v10854_v3  ;;  %10038 = vmatmul.mubr.f32.vlgmr.msra.gmra.mrb[38].mxu1 %v13887_v1 }
 0x4ef   : > { %10879 = vmatprep.subr.bf16.mxu1 %v10878_v36  ;;  %10857 = vmatpush1.bf16.msra.mxu0 %v10856_v57 }
 0x4f0   : > { %10881 = vmatpush1.bf16.msra.mxu1 %v10880_v27  ;;  %9541 = vmatprep.subr.mxu0 %v14161_v5 }
 0x4f1   : > { %10058 = vmatprep.subr.mxu1 %v14166_v45  ;;  %9603 = vmatprep.mubr.f32.mxu0 %v14407_v48 }
 0x4f2   : > { %10120 = vmatprep.mubr.f32.mxu1 %v14407_v48 }
 0x4f3   : > { %9544 = vmatpush1.msra.mxu0 %v14136_v10 }
 0x4f4   : > { %10061 = vmatpush1.msra.mxu1 %v14145_v58  ;;  %10859 = vmatprep.subr.bf16.mxu0 %v14110_v24 }
 0x4f5   : > { %10883 = vmatprep.subr.bf16.mxu1 %v14118_v26  ;;  %9606 = vmatmul.mubr.f32.vlgmr.msra.gmra.mrb[38].mxu0 %v13896_v13 }
 0x4f6   : > { %10861 = vmatpush1.bf16.msra.mxu0 %v14100_v16  ;;  %10123 = vmatmul.mubr.f32.vlgmr.msra.gmra.mrb[38].mxu1 %v13896_v13  ;;  %v8281_v13 = vpop.permute.xlu1 %8280 }
 0x4f7   : > { %10885 = vmatpush1.bf16.msra.mxu1 %v14105_v29  ;;  %9621 = vmatprep.subr.mxu0 %v14132_v31 }
 0x4f8   : > { %10138 = vmatprep.subr.mxu1 %v14142_v40  ;;  %9682 = vmatprep.mubr.f32.mxu0 %v14407_v48 }
 0x4f9   : > { %10199 = vmatprep.mubr.f32.mxu1 %v14407_v48 }
 0x4fa   : > { %9623 = vmatpush1.msra.mxu0 %v14122_v4 }
 0x4fb   : > { %10140 = vmatpush1.msra.mxu1 %v14127_v41  ;;  %10863 = vmatprep.subr.bf16.mxu0 %v10862_v61 }
 0x4fc   : > { %10887 = vmatprep.subr.bf16.mxu1 %v10886_v14 }
 0x4fd   : > { %9686 = vmatmul.mubr.f32.vlgmr.msra.gmra.mrb[38].mxu0 %v13905_v15 }
 0x4fe   : > { %10865 = vmatpush1.bf16.msra.mxu0 %v10864_v6  ;;  %10203 = vmatmul.mubr.f32.vlgmr.msra.gmra.mrb[38].mxu1 %v13905_v15 }
 0x4ff   : > { %10889 = vmatpush1.bf16.msra.mxu1 %v10888_v51  ;;  %9711 = vmatprep.subr.mxu0 %v9451_v53 }
 0x500   : > { %10228 = vmatprep.subr.mxu1 %v9968_v37  ;;  %9774 = vmatprep.mubr.f32.mxu0 %v14407_v48 }
 0x501   : > { %10291 = vmatprep.mubr.f32.mxu1 %v14407_v48 }
 0x502   : > { %9715 = vmatpush1.msra.mxu0 %v9457_v30 }
 0x503   : > { %10232 = vmatpush1.msra.mxu1 %v9974_v18  ;;  %10867 = vmatprep.subr.bf16.mxu0 %v14110_v24 }
 0x504   : > { %10891 = vmatprep.subr.bf16.mxu1 %v14118_v26 }
 0x505   : > { %9776 = vmatmul.mubr.f32.vlgmr.msra.gmra.mrb[38].mxu0 %v13887_v1 }
 0x506   : > { %10869 = vmatpush1.bf16.msra.mxu0 %v14100_v16  ;;  %10293 = vmatmul.mubr.f32.vlgmr.msra.gmra.mrb[38].mxu1 %v13887_v1 }
 0x507   : > { %10893 = vmatpush1.bf16.msra.mxu1 %v14105_v29  ;;  %9791 = vmatprep.subr.mxu0 %v14132_v31 }
 0x508   : > { %10308 = vmatprep.subr.mxu1 %v14142_v40  ;;  %9852 = vmatprep.mubr.f32.mxu0 %v14407_v48 }
 0x509   : > { %10369 = vmatprep.mubr.f32.mxu1 %v14407_v48 }
 0x50a   : > { %9793 = vmatpush1.msra.mxu0 %v14122_v4 }
 0x50b   : > { %10310 = vmatpush1.msra.mxu1 %v14127_v41 }
 0x50d   : > { %9854 = vmatmul.mubr.f32.vlgmr.msra.gmra.mrb[38].mxu0 %v13887_v1 }
 0x50e   : > { %10371 = vmatmul.mubr.f32.vlgmr.msra.gmra.mrb[38].mxu1 %v13887_v1 }
 0x598   : > { %v8821_v15 = vpop.f32.mrb[36].mxu0 }
 0x599   : > { %v10966_v2 = vadd.f32 %v8821_v15, %v8281_v13  ;;  %v9338_v32 = vpop.f32.mrb[36].mxu1  ;;  %v8823_v33 = vpop.f32.mrb[37].mxu0 }
 0x59a   : > { %v10968_v21 = vadd.f32 %v9338_v32, %v8281_v13  ;;  %v10967_v63 = vadd.f32 %v8823_v33, %v8281_v13  ;;  %v9340_v9 = vpop.f32.mrb[37].mxu1 }
 0x59b   : > { %v10969_v16 = vadd.f32 %v9340_v9, %v8281_v13 }
 0x59c   : > { %v10385_v48 = vcombine.low %v10966_v2, %v10967_v63 }
 0x59d   : > { %v10386_v55 = vcombine.low %v10968_v21, %v10969_v16 }
 0x59e   : > { %10393 = vst [vmem:[%s228_s7] sm:$0x77] %v10385_v48 }
 0x59f   : > { %10394 = vst [vmem:[%s228_s7 + $0x8] sm:$0x77] %v10386_v55 }
 0x5e0   : > { %v9855_v29 = vpop.f32.mrb[38].mxu0 }
 0x5e1   : > { %v10970_v25 = vadd.f32 %v9855_v29, %v8281_v13  ;;  %v10372_v1 = vpop.f32.mrb[38].mxu1  ;;  %v9857_v56 = vpop.f32.mrb[39].mxu0 }
 0x5e2   : > { %v10972_v24 = vadd.f32 %v10372_v1, %v8281_v13  ;;  %v10971_v26 = vadd.f32 %v9857_v56, %v8281_v13  ;;  %v10374_v4 = vpop.f32.mrb[39].mxu1 }
 0x5e3   : > { %v10973_v41 = vadd.f32 %v10374_v4, %v8281_v13 }
 0x5e4   : > { %v10387_v20 = vcombine.low %v10970_v25, %v10971_v26 }
 0x5e5   : > { %v10388_v31 = vcombine.low %v10972_v24, %v10973_v41 }
 0x5e6   : > { %10395 = vst [vmem:[%s228_s7 + $0x10] sm:$0x77] %v10387_v20 }
 0x5e7   : > { %10396 = vst [vmem:[%s228_s7 + $0x18] sm:$0x77] %v10388_v31 }
 0x5e8   : > { %11716 = shalt.err (!%p11713_p7)
}
 0x5e9   : > { %s11717_s25 = scalar_lea.hbm %s14258_s11, 512  ;;  %s11721_s14 = scalar_lea.hbm %s14306_s4, 1024 }
 0x5ea   : > { %p11718_p9 = scmp.ne.s32.totalorder %s14258_s11, %s11717_s25  ;;  %p11722_p0 = scmp.lt.u32.totalorder %s14258_s11, %s14306_s4 }
 0x5eb   : > { %p11723_p11 = scmp.lt.u32.totalorder %s11721_s14, %s11717_s25  ;;  %p11725_p4 = scmp.lt.u32.totalorder %s11717_s25, %s14258_s11 }
 0x5ec   : > { %p11719_p2 = pnand %p11718_p9, %p11902_p12 }
 0x5ed   : > { %p11724_p1 = por %p11723_p11, %p11722_p0 }
 0x5ee   : > { %p11720_p5 = pneg %p11719_p2 }
 0x5ef   : > { %p11726_p6 = por %p11725_p4, %p11724_p1 }
 0x5f1   : > { %p11727_p8 = pnand %p11726_p6, %p11720_p5 }
 0x5f3   : > { %11730 = shalt.err (!%p11727_p8)
}
 0x5f4   : > { %11380 = dma.vmem_to_hbm [thread:$0]  (%p11902_p12), %s14260_s8, 512, %s14258_s11, %s10398_s23  }
 0x5f5 PF: > { %s10424_s5 = sand.u32 1, %s11761_s15   ;;  %p14436_p10 = scmp.ne.s32.totalorder %s14349_s22, 0 }
 0x5f6   : > { %p14437_p13 = scmp.ge.s32.totalorder %s11773_s18, 2  ;;  %s10425_s7 = scalar_lea.sflag [#allocation4], %s10424_s5 }
 0x5f8   : > { %p11391_p3 = pnand %p14437_p13, %p14436_p10 }
 0x5fa   : > { %11756 = dma.done.wait (!%p11391_p3), %s10425_s7, 512  }
 0x5fb   : > { %11758 = vsyncadd (!%p11391_p3), %s10425_s7, 4294966784  ;;  %p18_p7 = scmp.ge.s32.totalorder %s11867_s27, 4   ;;  %s14438_s15 = smov %s11765_s16 }
 0x5fc   : > { %s14439_s16 = smov %s11769_s17  ;;  %s14440_s17 = smov %s11898_s24 }
 0x5fd   : > { %s14441_s18 = smov %s11867_s27  ;;  %20 = sbr.rel (!%p18_p7) target bundleno = 6 (0x6), region = 87 }
 0x604   :  { %10430 = vsyncpa [#allocation3], 1 }
 0x605   :  { %10432 = vsyncpa [#allocation3 + $0x1], 1 }
 0x606   :  { %10433 = vsyncpa [#allocation6], 1 }
 0x607   :  { %10434 = vsyncpa [#allocation4], 1 }
 0x608   :  { %10436 = vsyncpa [#allocation4 + $0x1], 1 }

</bundles_post_ra>
